<compile_context>
chip_gen: v6e
topology: v6e:2x2x1
jax: 0.10.0
libtpu: 0.0.40
codegen_flags: <defaults>
</compile_context>

<pallas_src>
import functools
import math

import jax
import jax.numpy as jnp
from jax.experimental import pallas as pl
from jax.experimental.pallas import tpu as pltpu


_VMEM_LIMIT = 48 * 1024 * 1024          # < 64 MiB physical on v7x, > scoped default everywhere
_RESIDENT_WEIGHT_BYTES = 16 * 1024 * 1024  # weight-resident path when the bf16 weight fits this


# ----------------------------------------------------------------------------
# Small helpers
# ----------------------------------------------------------------------------
def _pick_tile(dim, target, align):
    """Largest multiple of `align` that divides `dim` and is <= target, else full dim."""
    if dim <= target:
        return dim
    t = (target // align) * align
    while t >= align:
        if dim % t == 0:
            return t
        t -= align
    return dim


def _pick_head_group(num_heads, dh):
    """Heads per attention grid step so the group width is a multiple of 128 lanes."""
    cands = [hg for hg in range(1, num_heads + 1)
             if num_heads % hg == 0 and (hg * dh) % 128 == 0]
    if not cands:
        return num_heads          # fall back: group == all heads (block == full hidden dim)
    for hg in cands:
        if hg * dh >= 256:
            return hg
    return cands[-1]


def _gelu_tanh(y):
    return 0.5 * y * (1.0 + jnp.tanh(0.7978845608028654 * (y + 0.044715 * y * y * y)))


def _softmax_exp_dtype():
    """bf16 exp on v6e/v7x (bf16 EUP); f32 on v5e / unknown chips."""
    try:
        kind = jax.devices()[0].device_kind.lower()
    except Exception:
        return jnp.float32
    if "v6" in kind or "v7" in kind:
        return jnp.bfloat16
    return jnp.float32


# ----------------------------------------------------------------------------
# Weight-resident dense kernel: x @ W + b  [+ GELU] [+ residual] [+ LayerNorm]
# ----------------------------------------------------------------------------
def _dense_resident_kernel(x_ref, w_ref, b_ref, *rest, activation, has_residual,
                           has_ln, eps):
    rest = list(rest)
    r_ref = rest.pop(0) if has_residual else None
    if has_ln:
        g_ref = rest.pop(0)
        bb_ref = rest.pop(0)
    o_ref = rest.pop(0)

    y = jnp.dot(x_ref[...], w_ref[...], preferred_element_type=jnp.float32)
    y = y + b_ref[...].astype(jnp.float32)
    if activation == "gelu_tanh":
        y = _gelu_tanh(y)
    if has_residual:
        y = y + r_ref[...].astype(jnp.float32)
    if has_ln:
        mu = jnp.mean(y, axis=-1, keepdims=True)
        yc = y - mu
        var = jnp.mean(yc * yc, axis=-1, keepdims=True)
        y = yc * jax.lax.rsqrt(var + eps) * g_ref[...] + bb_ref[...]
    o_ref[...] = y.astype(o_ref.dtype)


# ----------------------------------------------------------------------------
# Fallback: 3-D tiled matmul (+bias, +GELU, +residual) with f32 VMEM accumulator
# ----------------------------------------------------------------------------
def _matmul_tiled_kernel(x_ref, w_ref, b_ref, *rest, activation, has_residual):
    if has_residual:
        r_ref, o_ref, acc_ref = rest
    else:
        o_ref, acc_ref = rest

    k = pl.program_id(2)

    @pl.when(k == 0)
    def _():
        acc_ref[...] = jnp.zeros_like(acc_ref)

    acc_ref[...] += jnp.dot(x_ref[...], w_ref[...], preferred_element_type=jnp.float32)

    @pl.when(k == pl.num_programs(2) - 1)
    def _():
        y = acc_ref[...] + b_ref[...].astype(jnp.float32)
        if activation == "gelu_tanh":
            y = _gelu_tanh(y)
        if has_residual:
            y = y + r_ref[...].astype(jnp.float32)
        o_ref[...] = y.astype(o_ref.dtype)


def _matmul_tiled(x, w, b, *, activation="none", residual=None,
                  tm_t=512, tn_t=512, tk_t=512):
    M, K = x.shape
    N = w.shape[1]
    tm = _pick_tile(M, tm_t, 8)
    tk = _pick_tile(K, tk_t, 128)
    tn = _pick_tile(N, tn_t, 128)
    grid = (M // tm, N // tn, K // tk)

    in_specs = [
        pl.BlockSpec((tm, tk), lambda i, j, k: (i, k)),
        pl.BlockSpec((tk, tn), lambda i, j, k: (k, j)),
        pl.BlockSpec((1, tn), lambda i, j, k: (0, j)),
    ]
    args = [x, w, b.reshape(1, N)]
    has_residual = residual is not None
    if has_residual:
        in_specs.append(pl.BlockSpec((tm, tn), lambda i, j, k: (i, j)))
        args.append(residual)

    kernel = functools.partial(_matmul_tiled_kernel, activation=activation,
                               has_residual=has_residual)
    return pl.pallas_call(
        kernel,
        out_shape=jax.ShapeDtypeStruct((M, N), x.dtype),
        grid=grid,
        in_specs=in_specs,
        out_specs=pl.BlockSpec((tm, tn), lambda i, j, k: (i, j)),
        scratch_shapes=[pltpu.VMEM((tm, tn), jnp.float32)],
        compiler_params=pltpu.CompilerParams(
            dimension_semantics=("parallel", "parallel", "arbitrary"),
            vmem_limit_bytes=_VMEM_LIMIT),
    )(*args)


# ----------------------------------------------------------------------------
# Dense wrappers
# ----------------------------------------------------------------------------
def dense2(x2, w, b, *, activation="none", residual=None, ln=None, tm_t=512):
    """x2: [M, K] bf16, w: [K, N] bf16, b: [N] f32 -> [M, N] bf16.

    Optional fused GELU, fused residual add, and fused LayerNorm epilogue
    (ln = (gamma, beta, eps); requires the weight-resident path, i.e. full N)."""
    M, K = x2.shape
    N = w.shape[1]
    has_residual = residual is not None
    w_bytes = K * N * jnp.dtype(w.dtype).itemsize

    if w_bytes <= _RESIDENT_WEIGHT_BYTES:
        tm = _pick_tile(M, tm_t, 8)
        in_specs = [pl.BlockSpec((tm, K), lambda i: (i, 0)),
                    pl.BlockSpec((K, N), lambda i: (0, 0)),
                    pl.BlockSpec((1, N), lambda i: (0, 0))]
        args = [x2, w, b.reshape(1, N)]
        if has_residual:
            in_specs.append(pl.BlockSpec((tm, N), lambda i: (i, 0)))
            args.append(residual)
        has_ln = ln is not None
        eps = 0.0
        if has_ln:
            g, bb, eps = ln
            in_specs += [pl.BlockSpec((1, N), lambda i: (0, 0)),
                         pl.BlockSpec((1, N), lambda i: (0, 0))]
            args += [g.reshape(1, N), bb.reshape(1, N)]
        kernel = functools.partial(_dense_resident_kernel, activation=activation,
                                   has_residual=has_residual, has_ln=has_ln, eps=eps)
        return pl.pallas_call(
            kernel,
            out_shape=jax.ShapeDtypeStruct((M, N), x2.dtype),
            grid=(M // tm,),
            in_specs=in_specs,
            out_specs=pl.BlockSpec((tm, N), lambda i: (i, 0)),
            compiler_params=pltpu.CompilerParams(
                dimension_semantics=("parallel",),
                vmem_limit_bytes=_VMEM_LIMIT),
        )(*args)

    # Fallback for weights too large to keep resident.
    y = _matmul_tiled(x2, w, b, activation=activation, residual=residual)
    if ln is not None:
        g, bb, eps = ln
        y = layernorm(y, g, bb, eps)
    return y


def _qkv_resident_kernel(x_ref, w_ref, b_ref, o_ref):
    x = x_ref[...]
    for g in range(3):
        y = jnp.dot(x, w_ref[g], preferred_element_type=jnp.float32)
        y = y + b_ref[g].astype(jnp.float32)
        o_ref[g] = y.astype(o_ref.dtype)


def qkv_project(x2, w3, b3, *, tm_t=512):
    """Fused QKV projection.

    x2: [M, K] bf16, w3: [3, K, H] bf16 (1/sqrt(dh) folded into Wq), b3: [3, 1, H] f32
    -> [3, M, H] bf16 (q / k / v stacked on the leading dim, merged-head layout)."""
    M, K = x2.shape
    G, _, Hn = w3.shape
    w_bytes = G * K * Hn * jnp.dtype(w3.dtype).itemsize
    if w_bytes <= _RESIDENT_WEIGHT_BYTES:
        tm = _pick_tile(M, tm_t, 8)
        return pl.pallas_call(
            _qkv_resident_kernel,
            out_shape=jax.ShapeDtypeStruct((G, M, Hn), x2.dtype),
            grid=(M // tm,),
            in_specs=[pl.BlockSpec((tm, K), lambda i: (i, 0)),
                      pl.BlockSpec((G, K, Hn), lambda i: (0, 0, 0)),
                      pl.BlockSpec((G, 1, Hn), lambda i: (0, 0, 0))],
            out_specs=pl.BlockSpec((G, tm, Hn), lambda i: (0, i, 0)),
            compiler_params=pltpu.CompilerParams(
                dimension_semantics=("parallel",),
                vmem_limit_bytes=_VMEM_LIMIT),
        )(x2, w3, b3)
    # Fallback: three separate (tiled) projections.
    return jnp.stack([dense2(x2, w3[g], b3[g, 0]) for g in range(G)], axis=0)


# ----------------------------------------------------------------------------
# LayerNorm (standalone; used for embedding LN, ext pre-LNs and fallback path)
# ----------------------------------------------------------------------------
def _ln_kernel(x_ref, g_ref, b_ref, o_ref, *, eps):
    x = x_ref[...].astype(jnp.float32)
    mu = jnp.mean(x, axis=-1, keepdims=True)
    xc = x - mu
    var = jnp.mean(xc * xc, axis=-1, keepdims=True)
    y = xc * jax.lax.rsqrt(var + eps) * g_ref[...] + b_ref[...]
    o_ref[...] = y.astype(o_ref.dtype)


def layernorm(x2, gamma, beta, eps, out_dtype=None):
    M, H = x2.shape
    od = x2.dtype if out_dtype is None else out_dtype
    tm = _pick_tile(M, 1024, 8)
    return pl.pallas_call(
        functools.partial(_ln_kernel, eps=eps),
        out_shape=jax.ShapeDtypeStruct((M, H), od),
        grid=(M // tm,),
        in_specs=[pl.BlockSpec((tm, H), lambda i: (i, 0)),
                  pl.BlockSpec((1, H), lambda i: (0, 0)),
                  pl.BlockSpec((1, H), lambda i: (0, 0))],
        out_specs=pl.BlockSpec((tm, H), lambda i: (i, 0)),
        compiler_params=pltpu.CompilerParams(
            dimension_semantics=("parallel",),
            vmem_limit_bytes=_VMEM_LIMIT),
    )(x2, gamma.reshape(1, H), beta.reshape(1, H))


# ----------------------------------------------------------------------------
# Attention: head-group per grid step, merged-head layout in/out, no transposes
# ----------------------------------------------------------------------------
def _attn_kernel(qkv_ref, bias_ref, o_ref, *, heads, dh, exp_dtype):
    q_all = qkv_ref[0]                                     # [S, gd] bf16 (scale folded in Wq)
    k_all = qkv_ref[1]
    v_all = qkv_ref[2]
    bias = bias_ref[...]                                   # [1, S] f32, broadcast over rows
    for h in range(heads):
        sl = slice(h * dh, (h + 1) * dh)
        q = q_all[:, sl]
        k = k_all[:, sl]
        v = v_all[:, sl]
        s = jax.lax.dot_general(q, k, (((1,), (1,)), ((), ())),
                                preferred_element_type=jnp.float32)   # [S, S]
        s = s + bias
        s = s - jnp.max(s, axis=-1, keepdims=True)
        p = jnp.exp(s.astype(exp_dtype))                   # bf16 exp on v6e/v7x, f32 on v5e
        inv = pl.reciprocal(jnp.sum(p.astype(jnp.float32), axis=-1, keepdims=True),
                            approx=True)
        ctx = jnp.dot(p.astype(v.dtype), v, preferred_element_type=jnp.float32)
        o_ref[:, sl] = (ctx * inv).astype(o_ref.dtype)     # direct per-head store


def attention(qkv3, bias, num_heads):
    """qkv3: [3, B, S, H] (q/k/v stacked, merged heads); bias: [B, 1, S] -> [B, S, H]."""
    G, B, S, H = qkv3.shape
    dh = H // num_heads
    hg = _pick_head_group(num_heads, dh)
    gd = hg * dh
    ng = num_heads // hg
    kernel = functools.partial(_attn_kernel, heads=hg, dh=dh,
                               exp_dtype=_softmax_exp_dtype())
    return pl.pallas_call(
        kernel,
        out_shape=jax.ShapeDtypeStruct((B, S, H), qkv3.dtype),
        grid=(B, ng),
        in_specs=[
            pl.BlockSpec((G, None, S, gd), lambda b, g: (0, b, 0, g)),   # packed QKV group
            pl.BlockSpec((None, 1, S), lambda b, g: (b, 0, 0)),          # key mask bias
        ],
        out_specs=pl.BlockSpec((None, S, gd), lambda b, g: (b, 0, g)),
        compiler_params=pltpu.CompilerParams(
            dimension_semantics=("parallel", "parallel"),
            vmem_limit_bytes=_VMEM_LIMIT),
    )(qkv3, bias.astype(jnp.float32))


# ----------------------------------------------------------------------------
# Fused final LayerNorm + classifier: sigmoid(LN(x) @ wo + b) * mask
# ----------------------------------------------------------------------------
def _ln_score_kernel(x_ref, g_ref, b_ref, w_ref, wb_ref, m_ref, o_ref, *, eps):
    x = x_ref[...].astype(jnp.float32)
    mu = jnp.mean(x, axis=-1, keepdims=True)
    xc = x - mu
    var = jnp.mean(xc * xc, axis=-1, keepdims=True)
    xn = xc * jax.lax.rsqrt(var + eps) * g_ref[...] + b_ref[...]
    logits = jnp.dot(xn.astype(w_ref.dtype), w_ref[...],
                     preferred_element_type=jnp.float32) + wb_ref[...]
    o_ref[...] = (1.0 / (1.0 + jnp.exp(-logits))) * m_ref[...]


def ln_classifier_scores(x3, gamma, beta, wo, wo_b, mask, eps):
    """x3: [B, N, H] bf16 -> sigmoid(LN(x) @ wo + b) * mask, [B, N] f32."""
    B, N, H = x3.shape
    M = B * N
    LANES = 128
    w_pad = jnp.zeros((H, LANES), jnp.float32).at[:, 0].set(
        wo.reshape(H)).astype(jnp.bfloat16)                   # pre-cast, lane-dense output
    b_pad = jnp.zeros((1, LANES), jnp.float32).at[0, 0].set(wo_b)
    x2 = x3.reshape(M, H)
    m2 = mask.reshape(M, 1).astype(jnp.float32)
    tm = _pick_tile(M, 1024, 8)
    out = pl.pallas_call(
        functools.partial(_ln_score_kernel, eps=eps),
        out_shape=jax.ShapeDtypeStruct((M, LANES), jnp.float32),
        grid=(M // tm,),
        in_specs=[pl.BlockSpec((tm, H), lambda i: (i, 0)),
                  pl.BlockSpec((1, H), lambda i: (0, 0)),
                  pl.BlockSpec((1, H), lambda i: (0, 0)),
                  pl.BlockSpec((H, LANES), lambda i: (0, 0)),
                  pl.BlockSpec((1, LANES), lambda i: (0, 0)),
                  pl.BlockSpec((tm, 1), lambda i: (i, 0))],
        out_specs=pl.BlockSpec((tm, LANES), lambda i: (i, 0)),
        compiler_params=pltpu.CompilerParams(
            dimension_semantics=("parallel",),
            vmem_limit_bytes=_VMEM_LIMIT),
    )(x2, gamma.reshape(1, H), beta.reshape(1, H), w_pad, b_pad, m2)
    return out[:, 0].reshape(B, N)


# ----------------------------------------------------------------------------
# Model assembly (glue in plain JAX, compute in the kernels above)
# ----------------------------------------------------------------------------
def xlmr_encoder(params, src, mask_src, cfg):
    """Simplified XLM-RoBERTa backbone -> last_hidden_state [B, S, H] (bf16)."""
    B, S = src.shape
    H = cfg["hidden"]
    nH = cfg["bert_heads"]
    pad_idx = 1

    # RoBERTa-style position ids (pad positions keep padding_idx).
    not_pad = (src != pad_idx).astype(jnp.int32)
    pos_ids = jnp.cumsum(not_pad, axis=1) * not_pad + pad_idx

    # Embedding sum + LN in f32, cast to bf16 only afterwards.
    emb = params["word_emb"][src] + params["pos_emb"][pos_ids] + params["type_emb"][0]
    x2 = layernorm(emb.reshape(B * S, H), params["emb_ln_g"], params["emb_ln_b"],
                   1e-5, out_dtype=jnp.bfloat16)

    attn_bias = (1.0 - mask_src.astype(jnp.float32))[:, None, :] * -1e9  # [B, 1, S]

    for lp in params["bert_layers"]:
        qkv = qkv_project(x2, lp["Wqkv"], lp["bqkv"]).reshape(3, B, S, H)
        ctx = attention(qkv, attn_bias, nH)                               # [B, S, H]
        # Wo projection with fused residual add + post-LN epilogue.
        x2 = dense2(ctx.reshape(B * S, H), lp["Wo"], lp["bo"], residual=x2,
                    ln=(lp["ln1_g"], lp["ln1_b"], 1e-5))
        h = dense2(x2, lp["W1"], lp["b1"], activation="gelu_tanh")
        # W2 projection with fused residual add + post-LN epilogue.
        x2 = dense2(h, lp["W2"], lp["b2"], residual=x2,
                    ln=(lp["ln2_g"], lp["ln2_b"], 1e-5))
    return x2.reshape(B, S, H)


def ext_transformer_encoder(params, sents_vec, mask_cls, cfg):
    """PreSumm ExtTransformerEncoder -> sent_scores [B, N]."""
    B, N, H = sents_vec.shape
    nH = cfg["ext_heads"]
    m = mask_cls.astype(jnp.float32)

    x = sents_vec.astype(jnp.float32) * m[:, :, None]
    x = x + params["pe"][None, :N, :]
    x2 = x.reshape(B * N, H).astype(jnp.bfloat16)
    attn_bias = (1.0 - m)[:, None, :] * -1e18          # masked_fill(~mask, -1e18)

    for i, lp in enumerate(params["ext_layers"]):
        if i != 0:
            xin2 = layernorm(x2, lp["ln_g"], lp["ln_b"], 1e-6)
        else:
            xin2 = x2
        qkv = qkv_project(xin2, lp["Wqkv"], lp["bqkv"]).reshape(3, B, N, H)
        ctx = attention(qkv, attn_bias, nH)
        x2 = dense2(ctx.reshape(B * N, H), lp["Wo"], lp["bo"], residual=x2)  # fused residual

        # PositionwiseFeedForward: LN -> linear -> gelu -> linear -> +residual (fused)
        xn2 = layernorm(x2, lp["ff_ln_g"], lp["ff_ln_b"], 1e-6)
        h = dense2(xn2, lp["W1"], lp["b1"], activation="gelu_tanh")
        x2 = dense2(h, lp["W2"], lp["b2"], residual=x2)                      # fused residual

    # Final LayerNorm + sigmoid classifier + mask, fused in one kernel.
    return ln_classifier_scores(x2.reshape(B, N, H), params["final_ln_g"],
                                params["final_ln_b"], params["wo"], params["wo_b"],
                                m, 1e-6)


def ext_summarizer_forward(params, src, segs, clss, mask_src, mask_cls, cfg):
    # segs is accepted (matching the PyTorch signature) but unused by XLM_R.forward.
    del segs
    top_vec = xlmr_encoder(params, src, mask_src, cfg)                       # [B, S, H]
    sents_vec = jnp.take_along_axis(top_vec, clss[:, :, None], axis=1)       # gather clss rows
    sents_vec = sents_vec * mask_cls[:, :, None].astype(top_vec.dtype)
    sent_scores = ext_transformer_encoder(params, sents_vec, mask_cls, cfg)  # [B, N]
    return sent_scores, mask_cls


# ----------------------------------------------------------------------------
# Deterministic parameter construction (bf16 matmul weights, f32 LN / biases)
# ----------------------------------------------------------------------------
def init_params(key, cfg, max_sents=8):
    H, Fb, Fe = cfg["hidden"], cfg["bert_ff"], cfg["ext_ff"]
    nHb, nHe = cfg["bert_heads"], cfg["ext_heads"]
    keys = iter(jax.random.split(key, 512))

    def w(shape, scale=0.02):
        return jax.random.normal(next(keys), shape, jnp.float32) * scale

    bf16 = lambda a: a.astype(jnp.bfloat16)
    zeros = lambda s: jnp.zeros(s, jnp.float32)
    ones = lambda s: jnp.ones(s, jnp.float32)

    params = {
        "word_emb": w((cfg["vocab"], H)),
        "pos_emb": w((cfg["max_pos"], H)),
        "type_emb": w((1, H)),
        "emb_ln_g": ones((H,)), "emb_ln_b": zeros((H,)),
        "bert_layers": [], "ext_layers": [],
    }

    def attn_block(num_heads):
        sc = 1.0 / math.sqrt(H // num_heads)
        Wq, Wk, Wv = w((H, H)), w((H, H)), w((H, H))
        bq, bk, bv = zeros((H,)), zeros((H,)), zeros((H,))
        Wqkv = bf16(jnp.stack([Wq * sc, Wk, Wv], axis=0))        # [3, H, H], scale folded in Wq
        bqkv = jnp.stack([bq * sc, bk, bv], axis=0)[:, None, :]  # [3, 1, H] f32
        return Wqkv, bqkv

    for _ in range(cfg["bert_layers"]):
        Wqkv, bqkv = attn_block(nHb)
        params["bert_layers"].append(dict(
            Wqkv=Wqkv, bqkv=bqkv,
            Wo=bf16(w((H, H))), bo=zeros((H,)),
            ln1_g=ones((H,)), ln1_b=zeros((H,)),
            W1=bf16(w((H, Fb))), b1=zeros((Fb,)),
            W2=bf16(w((Fb, H))), b2=zeros((H,)),
            ln2_g=ones((H,)), ln2_b=zeros((H,)),
        ))
    for _ in range(cfg["ext_layers"]):
        Wqkv, bqkv = attn_block(nHe)
        params["ext_layers"].append(dict(
            ln_g=ones((H,)), ln_b=zeros((H,)),
            Wqkv=Wqkv, bqkv=bqkv,
            Wo=bf16(w((H, H))), bo=zeros((H,)),
            ff_ln_g=ones((H,)), ff_ln_b=zeros((H,)),
            W1=bf16(w((H, Fe))), b1=zeros((Fe,)),
            W2=bf16(w((Fe, H))), b2=zeros((H,)),
        ))
    params["final_ln_g"] = ones((H,))
    params["final_ln_b"] = zeros((H,))
    params["wo"] = w((H,))                       # Linear(H, 1) weight
    params["wo_b"] = jnp.zeros((), jnp.float32)

    # PreSumm sinusoidal positional encoding for the inter-sentence encoder.
    pos = jnp.arange(max_sents, dtype=jnp.float32)[:, None]
    div = jnp.exp(jnp.arange(0, H, 2, dtype=jnp.float32) * -(math.log(10000.0) / H))
    pe = jnp.zeros((max_sents, H), jnp.float32)
    pe = pe.at[:, 0::2].set(jnp.sin(pos * div))
    pe = pe.at[:, 1::2].set(jnp.cos(pos * div))
    params["pe"] = pe
    return params


# ----------------------------------------------------------------------------
if __name__ == "__main__":
    cfg = dict(vocab=64, hidden=32, max_pos=64,
               bert_heads=4, bert_ff=64, bert_layers=2,
               ext_heads=4, ext_ff=64, ext_layers=2)

    params = init_params(jax.random.PRNGKey(0), cfg)

    B, S, N = 2, 16, 4
    src = jax.random.randint(jax.random.PRNGKey(0), (B, S), 2, cfg["vocab"], dtype=jnp.int32)
    src = src.at[1, -2:].set(1)                       # pad tokens (pad_idx = 1)
    mask_src = (src != 1).astype(jnp.float32)         # [B, S]
    segs = jnp.zeros((B, S), jnp.int32)               # unused by XLM_R.forward
    clss = jnp.array([[0, 4, 8, 12], [0, 5, 9, 13]], dtype=jnp.int32)  # [B, N]
    mask_cls = jnp.array([[1, 1, 1, 1], [1, 1, 1, 0]], dtype=jnp.float32)

    fwd = jax.jit(functools.partial(ext_summarizer_forward, cfg=cfg))
    sent_scores, mcls = fwd(params, src, segs, clss, mask_src, mask_cls)
    sent_scores = jax.block_until_ready(sent_scores)
    assert sent_scores.shape == (B, N)
    assert bool(jnp.all(jnp.isfinite(sent_scores)))
    print("KERNEL_OK")
</pallas_src>

<mosaic_0001>
module attributes {stable_mosaic.version = 11 : i64} {
  func.func @_ln_kernel(%arg0: i32, %arg1: memref<32x32xf32, #tpu.memory_space<vmem>>, %arg2: memref<1x32xf32, #tpu.memory_space<vmem>>, %arg3: memref<1x32xf32, #tpu.memory_space<vmem>>, %arg4: memref<32x32xbf16, #tpu.memory_space<vmem>>) attributes {dimension_semantics = [#tpu.dimension_semantics<parallel>], iteration_bounds = array<i64: 1>, scalar_prefetch = 0 : i64, scratch_operands = 0 : i64, tpu.core_type = #tpu.core_type<tc>, window_params = [{transform_indices = @transform_0, window_bounds = array<i64: 32, 32>}, {pipeline_mode = #tpu.pipeline_mode<synchronous>, transform_indices = @transform_1, window_bounds = array<i64: 1, 32>}, {pipeline_mode = #tpu.pipeline_mode<synchronous>, transform_indices = @transform_2, window_bounds = array<i64: 1, 32>}, {transform_indices = @transform_3, window_bounds = array<i64: 32, 32>}]} {
    %c0 = arith.constant 0 : index
    %c0_0 = arith.constant 0 : index
    %0 = vector.load %arg1[%c0, %c0_0] : memref<32x32xf32, #tpu.memory_space<vmem>>, vector<32x32xf32>
    %cst = arith.constant dense<0.000000e+00> : vector<32xf32>
    %1 = vector.multi_reduction <add>, %0, %cst [1] : vector<32x32xf32> to vector<32xf32>
    %2 = vector.shape_cast %1 : vector<32xf32> to vector<32x1xf32>
    %cst_1 = arith.constant 3.200000e+01 : f32
    %3 = vector.broadcast %cst_1 : f32 to vector<32x1xf32>
    %4 = arith.divf %2, %3 : vector<32x1xf32>
    %5 = vector.broadcast %4 : vector<32x1xf32> to vector<32x32xf32>
    %6 = arith.subf %0, %5 : vector<32x32xf32>
    %7 = arith.mulf %6, %6 : vector<32x32xf32>
    %cst_2 = arith.constant dense<0.000000e+00> : vector<32xf32>
    %8 = vector.multi_reduction <add>, %7, %cst_2 [1] : vector<32x32xf32> to vector<32xf32>
    %9 = vector.shape_cast %8 : vector<32xf32> to vector<32x1xf32>
    %cst_3 = arith.constant 3.200000e+01 : f32
    %10 = vector.broadcast %cst_3 : f32 to vector<32x1xf32>
    %11 = arith.divf %9, %10 : vector<32x1xf32>
    %cst_4 = arith.constant 9.99999974E-6 : f32
    %12 = vector.broadcast %cst_4 : f32 to vector<32x1xf32>
    %13 = arith.addf %11, %12 : vector<32x1xf32>
    %14 = math.rsqrt %13 : vector<32x1xf32>
    %15 = vector.broadcast %14 : vector<32x1xf32> to vector<32x32xf32>
    %16 = arith.mulf %6, %15 : vector<32x32xf32>
    %c0_5 = arith.constant 0 : index
    %c0_6 = arith.constant 0 : index
    %17 = vector.load %arg2[%c0_5, %c0_6] : memref<1x32xf32, #tpu.memory_space<vmem>>, vector<1x32xf32>
    %18 = vector.broadcast %17 : vector<1x32xf32> to vector<32x32xf32>
    %19 = arith.mulf %16, %18 : vector<32x32xf32>
    %c0_7 = arith.constant 0 : index
    %c0_8 = arith.constant 0 : index
    %20 = vector.load %arg3[%c0_7, %c0_8] : memref<1x32xf32, #tpu.memory_space<vmem>>, vector<1x32xf32>
    %21 = vector.broadcast %20 : vector<1x32xf32> to vector<32x32xf32>
    %22 = arith.addf %19, %21 : vector<32x32xf32>
    %23 = arith.truncf %22 : vector<32x32xf32> to vector<32x32xbf16>
    %c0_9 = arith.constant 0 : index
    %c0_10 = arith.constant 0 : index
    %24 = vector.load %arg4[%c0_9, %c0_10] : memref<32x32xbf16, #tpu.memory_space<vmem>>, vector<32x32xbf16>
    tpu.vector_store %arg4[%c0_9, %c0_10], %23 {strides = array<i32>} : memref<32x32xbf16, #tpu.memory_space<vmem>>, vector<32x32xbf16>,
    return
  }
  func.func @transform_0(%arg0: i32) -> (i32, i32) {
    %c0_i32 = arith.constant 0 : i32
    %c0_i32_0 = arith.constant 0 : i32
    return %arg0, %c0_i32 : i32, i32
  }
  func.func @transform_1(%arg0: i32) -> (i32, i32) {
    %c0_i32 = arith.constant 0 : i32
    %c0_i32_0 = arith.constant 0 : i32
    %c0_i32_1 = arith.constant 0 : i32
    return %c0_i32, %c0_i32_0 : i32, i32
  }
  func.func @transform_2(%arg0: i32) -> (i32, i32) {
    %c0_i32 = arith.constant 0 : i32
    %c0_i32_0 = arith.constant 0 : i32
    %c0_i32_1 = arith.constant 0 : i32
    return %c0_i32, %c0_i32_0 : i32, i32
  }
  func.func @transform_3(%arg0: i32) -> (i32, i32) {
    %c0_i32 = arith.constant 0 : i32
    %c0_i32_0 = arith.constant 0 : i32
    return %arg0, %c0_i32 : i32, i32
  }
}

module attributes {stable_mosaic.version = 11 : i64} {
  func.func @_qkv_resident_kernel(%arg0: i32, %arg1: memref<32x32xbf16, #tpu.memory_space<vmem>>, %arg2: memref<3x32x32xbf16, #tpu.memory_space<vmem>>, %arg3: memref<3x1x32xf32, #tpu.memory_space<vmem>>, %arg4: memref<3x32x32xbf16, #tpu.memory_space<vmem>>) attributes {dimension_semantics = [#tpu.dimension_semantics<parallel>], iteration_bounds = array<i64: 1>, scalar_prefetch = 0 : i64, scratch_operands = 0 : i64, tpu.core_type = #tpu.core_type<tc>, window_params = [{transform_indices = @transform_0, window_bounds = array<i64: 32, 32>}, {pipeline_mode = #tpu.pipeline_mode<synchronous>, transform_indices = @transform_1, window_bounds = array<i64: 3, 32, 32>}, {pipeline_mode = #tpu.pipeline_mode<synchronous>, transform_indices = @transform_2, window_bounds = array<i64: 3, 1, 32>}, {transform_indices = @transform_3, window_bounds = array<i64: 3, 32, 32>}]} {
    %c0 = arith.constant 0 : index
    %c0_0 = arith.constant 0 : index
    %0 = vector.load %arg1[%c0, %c0_0] : memref<32x32xbf16, #tpu.memory_space<vmem>>, vector<32x32xbf16>
    %c0_1 = arith.constant 0 : index
    %c0_2 = arith.constant 0 : index
    %c0_3 = arith.constant 0 : index
    %1 = vector.load %arg2[%c0_1, %c0_2, %c0_3] : memref<3x32x32xbf16, #tpu.memory_space<vmem>>, vector<1x32x32xbf16>
    %2 = vector.shape_cast %1 : vector<1x32x32xbf16> to vector<32x32xbf16>
    %cst = arith.constant dense<0.000000e+00> : vector<32x32xf32>
    %3 = tpu.matmul %0, %2, %cst {dimension_numbers = #tpu.dot_dimension_numbers<[1], [0], [0], [1], [0, 0, 1, 1], [], []>} : vector<32x32xbf16>, vector<32x32xbf16>, vector<32x32xf32> -> vector<32x32xf32>
    %c0_4 = arith.constant 0 : index
    %c0_5 = arith.constant 0 : index
    %c0_6 = arith.constant 0 : index
    %4 = vector.load %arg3[%c0_4, %c0_5, %c0_6] : memref<3x1x32xf32, #tpu.memory_space<vmem>>, vector<1x1x32xf32>
    %5 = vector.shape_cast %4 : vector<1x1x32xf32> to vector<1x32xf32>
    %6 = vector.broadcast %5 : vector<1x32xf32> to vector<32x32xf32>
    %7 = arith.addf %3, %6 : vector<32x32xf32>
    %8 = arith.truncf %7 : vector<32x32xf32> to vector<32x32xbf16>
    %c0_7 = arith.constant 0 : index
    %c0_8 = arith.constant 0 : index
    %c0_9 = arith.constant 0 : index
    %9 = vector.load %arg4[%c0_7, %c0_8, %c0_9] : memref<3x32x32xbf16, #tpu.memory_space<vmem>>, vector<1x32x32xbf16>
    %10 = vector.shape_cast %9 : vector<1x32x32xbf16> to vector<32x32xbf16>
    %11 = vector.shape_cast %8 : vector<32x32xbf16> to vector<1x32x32xbf16>
    tpu.vector_store %arg4[%c0_7, %c0_8, %c0_9], %11 {strides = array<i32>} : memref<3x32x32xbf16, #tpu.memory_space<vmem>>, vector<1x32x32xbf16>,
    %c1 = arith.constant 1 : index
    %c0_10 = arith.constant 0 : index
    %c0_11 = arith.constant 0 : index
    %12 = vector.load %arg2[%c1, %c0_10, %c0_11] : memref<3x32x32xbf16, #tpu.memory_space<vmem>>, vector<1x32x32xbf16>
    %13 = vector.shape_cast %12 : vector<1x32x32xbf16> to vector<32x32xbf16>
    %cst_12 = arith.constant dense<0.000000e+00> : vector<32x32xf32>
    %14 = tpu.matmul %0, %13, %cst_12 {dimension_numbers = #tpu.dot_dimension_numbers<[1], [0], [0], [1], [0, 0, 1, 1], [], []>} : vector<32x32xbf16>, vector<32x32xbf16>, vector<32x32xf32> -> vector<32x32xf32>
    %c1_13 = arith.constant 1 : index
    %c0_14 = arith.constant 0 : index
    %c0_15 = arith.constant 0 : index
    %15 = vector.load %arg3[%c1_13, %c0_14, %c0_15] : memref<3x1x32xf32, #tpu.memory_space<vmem>>, vector<1x1x32xf32>
    %16 = vector.shape_cast %15 : vector<1x1x32xf32> to vector<1x32xf32>
    %17 = vector.broadcast %16 : vector<1x32xf32> to vector<32x32xf32>
    %18 = arith.addf %14, %17 : vector<32x32xf32>
    %19 = arith.truncf %18 : vector<32x32xf32> to vector<32x32xbf16>
    %c1_16 = arith.constant 1 : index
    %c0_17 = arith.constant 0 : index
    %c0_18 = arith.constant 0 : index
    %20 = vector.load %arg4[%c1_16, %c0_17, %c0_18] : memref<3x32x32xbf16, #tpu.memory_space<vmem>>, vector<1x32x32xbf16>
    %21 = vector.shape_cast %20 : vector<1x32x32xbf16> to vector<32x32xbf16>
    %22 = vector.shape_cast %19 : vector<32x32xbf16> to vector<1x32x32xbf16>
    tpu.vector_store %arg4[%c1_16, %c0_17, %c0_18], %22 {strides = array<i32>} : memref<3x32x32xbf16, #tpu.memory_space<vmem>>, vector<1x32x32xbf16>,
    %c2 = arith.constant 2 : index
    %c0_19 = arith.constant 0 : index
    %c0_20 = arith.constant 0 : index
    %23 = vector.load %arg2[%c2, %c0_19, %c0_20] : memref<3x32x32xbf16, #tpu.memory_space<vmem>>, vector<1x32x32xbf16>
    %24 = vector.shape_cast %23 : vector<1x32x32xbf16> to vector<32x32xbf16>
    %cst_21 = arith.constant dense<0.000000e+00> : vector<32x32xf32>
    %25 = tpu.matmul %0, %24, %cst_21 {dimension_numbers = #tpu.dot_dimension_numbers<[1], [0], [0], [1], [0, 0, 1, 1], [], []>} : vector<32x32xbf16>, vector<32x32xbf16>, vector<32x32xf32> -> vector<32x32xf32>
    %c2_22 = arith.constant 2 : index
    %c0_23 = arith.constant 0 : index
    %c0_24 = arith.constant 0 : index
    %26 = vector.load %arg3[%c2_22, %c0_23, %c0_24] : memref<3x1x32xf32, #tpu.memory_space<vmem>>, vector<1x1x32xf32>
    %27 = vector.shape_cast %26 : vector<1x1x32xf32> to vector<1x32xf32>
    %28 = vector.broadcast %27 : vector<1x32xf32> to vector<32x32xf32>
    %29 = arith.addf %25, %28 : vector<32x32xf32>
    %30 = arith.truncf %29 : vector<32x32xf32> to vector<32x32xbf16>
    %c2_25 = arith.constant 2 : index
    %c0_26 = arith.constant 0 : index
    %c0_27 = arith.constant 0 : index
    %31 = vector.load %arg4[%c2_25, %c0_26, %c0_27] : memref<3x32x32xbf16, #tpu.memory_space<vmem>>, vector<1x32x32xbf16>
    %32 = vector.shape_cast %31 : vector<1x32x32xbf16> to vector<32x32xbf16>
    %33 = vector.shape_cast %30 : vector<32x32xbf16> to vector<1x32x32xbf16>
    tpu.vector_store %arg4[%c2_25, %c0_26, %c0_27], %33 {strides = array<i32>} : memref<3x32x32xbf16, #tpu.memory_space<vmem>>, vector<1x32x32xbf16>,
    return
  }
  func.func @transform_0(%arg0: i32) -> (i32, i32) {
    %c0_i32 = arith.constant 0 : i32
    %c0_i32_0 = arith.constant 0 : i32
    return %arg0, %c0_i32 : i32, i32
  }
  func.func @transform_1(%arg0: i32) -> (i32, i32, i32) {
    %c0_i32 = arith.constant 0 : i32
    %c0_i32_0 = arith.constant 0 : i32
    %c0_i32_1 = arith.constant 0 : i32
    %c0_i32_2 = arith.constant 0 : i32
    return %c0_i32, %c0_i32_0, %c0_i32_1 : i32, i32, i32
  }
  func.func @transform_2(%arg0: i32) -> (i32, i32, i32) {
    %c0_i32 = arith.constant 0 : i32
    %c0_i32_0 = arith.constant 0 : i32
    %c0_i32_1 = arith.constant 0 : i32
    %c0_i32_2 = arith.constant 0 : i32
    return %c0_i32, %c0_i32_0, %c0_i32_1 : i32, i32, i32
  }
  func.func @transform_3(%arg0: i32) -> (i32, i32, i32) {
    %c0_i32 = arith.constant 0 : i32
    %c0_i32_0 = arith.constant 0 : i32
    %c0_i32_1 = arith.constant 0 : i32
    return %c0_i32, %arg0, %c0_i32_0 : i32, i32, i32
  }
}

module attributes {stable_mosaic.version = 11 : i64} {
  func.func @_dense_resident_kernel(%arg0: i32, %arg1: memref<32x32xbf16, #tpu.memory_space<vmem>>, %arg2: memref<32x32xbf16, #tpu.memory_space<vmem>>, %arg3: memref<1x32xf32, #tpu.memory_space<vmem>>, %arg4: memref<32x32xbf16, #tpu.memory_space<vmem>>, %arg5: memref<1x32xf32, #tpu.memory_space<vmem>>, %arg6: memref<1x32xf32, #tpu.memory_space<vmem>>, %arg7: memref<32x32xbf16, #tpu.memory_space<vmem>>) attributes {dimension_semantics = [#tpu.dimension_semantics<parallel>], iteration_bounds = array<i64: 1>, scalar_prefetch = 0 : i64, scratch_operands = 0 : i64, tpu.core_type = #tpu.core_type<tc>, window_params = [{transform_indices = @transform_0, window_bounds = array<i64: 32, 32>}, {pipeline_mode = #tpu.pipeline_mode<synchronous>, transform_indices = @transform_1, window_bounds = array<i64: 32, 32>}, {pipeline_mode = #tpu.pipeline_mode<synchronous>, transform_indices = @transform_2, window_bounds = array<i64: 1, 32>}, {transform_indices = @transform_3, window_bounds = array<i64: 32, 32>}, {pipeline_mode = #tpu.pipeline_mode<synchronous>, transform_indices = @transform_4, window_bounds = array<i64: 1, 32>}, {pipeline_mode = #tpu.pipeline_mode<synchronous>, transform_indices = @transform_5, window_bounds = array<i64: 1, 32>}, {transform_indices = @transform_6, window_bounds = array<i64: 32, 32>}]} {
    %c0 = arith.constant 0 : index
    %c0_0 = arith.constant 0 : index
    %0 = vector.load %arg1[%c0, %c0_0] : memref<32x32xbf16, #tpu.memory_space<vmem>>, vector<32x32xbf16>
    %c0_1 = arith.constant 0 : index
    %c0_2 = arith.constant 0 : index
    %1 = vector.load %arg2[%c0_1, %c0_2] : memref<32x32xbf16, #tpu.memory_space<vmem>>, vector<32x32xbf16>
    %cst = arith.constant dense<0.000000e+00> : vector<32x32xf32>
    %2 = tpu.matmul %0, %1, %cst {dimension_numbers = #tpu.dot_dimension_numbers<[1], [0], [0], [1], [0, 0, 1, 1], [], []>} : vector<32x32xbf16>, vector<32x32xbf16>, vector<32x32xf32> -> vector<32x32xf32>
    %c0_3 = arith.constant 0 : index
    %c0_4 = arith.constant 0 : index
    %3 = vector.load %arg3[%c0_3, %c0_4] : memref<1x32xf32, #tpu.memory_space<vmem>>, vector<1x32xf32>
    %4 = vector.broadcast %3 : vector<1x32xf32> to vector<32x32xf32>
    %5 = arith.addf %2, %4 : vector<32x32xf32>
    %c0_5 = arith.constant 0 : index
    %c0_6 = arith.constant 0 : index
    %6 = vector.load %arg4[%c0_5, %c0_6] : memref<32x32xbf16, #tpu.memory_space<vmem>>, vector<32x32xbf16>
    %7 = arith.extf %6 : vector<32x32xbf16> to vector<32x32xf32>
    %8 = arith.addf %5, %7 : vector<32x32xf32>
    %cst_7 = arith.constant dense<0.000000e+00> : vector<32xf32>
    %9 = vector.multi_reduction <add>, %8, %cst_7 [1] : vector<32x32xf32> to vector<32xf32>
    %10 = vector.shape_cast %9 : vector<32xf32> to vector<32x1xf32>
    %cst_8 = arith.constant 3.200000e+01 : f32
    %11 = vector.broadcast %cst_8 : f32 to vector<32x1xf32>
    %12 = arith.divf %10, %11 : vector<32x1xf32>
    %13 = vector.broadcast %12 : vector<32x1xf32> to vector<32x32xf32>
    %14 = arith.subf %8, %13 : vector<32x32xf32>
    %15 = arith.mulf %14, %14 : vector<32x32xf32>
    %cst_9 = arith.constant dense<0.000000e+00> : vector<32xf32>
    %16 = vector.multi_reduction <add>, %15, %cst_9 [1] : vector<32x32xf32> to vector<32xf32>
    %17 = vector.shape_cast %16 : vector<32xf32> to vector<32x1xf32>
    %cst_10 = arith.constant 3.200000e+01 : f32
    %18 = vector.broadcast %cst_10 : f32 to vector<32x1xf32>
    %19 = arith.divf %17, %18 : vector<32x1xf32>
    %cst_11 = arith.constant 9.99999974E-6 : f32
    %20 = vector.broadcast %cst_11 : f32 to vector<32x1xf32>
    %21 = arith.addf %19, %20 : vector<32x1xf32>
    %22 = math.rsqrt %21 : vector<32x1xf32>
    %23 = vector.broadcast %22 : vector<32x1xf32> to vector<32x32xf32>
    %24 = arith.mulf %14, %23 : vector<32x32xf32>
    %c0_12 = arith.constant 0 : index
    %c0_13 = arith.constant 0 : index
    %25 = vector.load %arg5[%c0_12, %c0_13] : memref<1x32xf32, #tpu.memory_space<vmem>>, vector<1x32xf32>
    %26 = vector.broadcast %25 : vector<1x32xf32> to vector<32x32xf32>
    %27 = arith.mulf %24, %26 : vector<32x32xf32>
    %c0_14 = arith.constant 0 : index
    %c0_15 = arith.constant 0 : index
    %28 = vector.load %arg6[%c0_14, %c0_15] : memref<1x32xf32, #tpu.memory_space<vmem>>, vector<1x32xf32>
    %29 = vector.broadcast %28 : vector<1x32xf32> to vector<32x32xf32>
    %30 = arith.addf %27, %29 : vector<32x32xf32>
    %31 = arith.truncf %30 : vector<32x32xf32> to vector<32x32xbf16>
    %c0_16 = arith.constant 0 : index
    %c0_17 = arith.constant 0 : index
    %32 = vector.load %arg7[%c0_16, %c0_17] : memref<32x32xbf16, #tpu.memory_space<vmem>>, vector<32x32xbf16>
    tpu.vector_store %arg7[%c0_16, %c0_17], %31 {strides = array<i32>} : memref<32x32xbf16, #tpu.memory_space<vmem>>, vector<32x32xbf16>,
    return
  }
  func.func @transform_0(%arg0: i32) -> (i32, i32) {
    %c0_i32 = arith.constant 0 : i32
    %c0_i32_0 = arith.constant 0 : i32
    return %arg0, %c0_i32 : i32, i32
  }
  func.func @transform_1(%arg0: i32) -> (i32, i32) {
    %c0_i32 = arith.constant 0 : i32
    %c0_i32_0 = arith.constant 0 : i32
    %c0_i32_1 = arith.constant 0 : i32
    return %c0_i32, %c0_i32_0 : i32, i32
  }
  func.func @transform_2(%arg0: i32) -> (i32, i32) {
    %c0_i32 = arith.constant 0 : i32
    %c0_i32_0 = arith.constant 0 : i32
    %c0_i32_1 = arith.constant 0 : i32
    return %c0_i32, %c0_i32_0 : i32, i32
  }
  func.func @transform_3(%arg0: i32) -> (i32, i32) {
    %c0_i32 = arith.constant 0 : i32
    %c0_i32_0 = arith.constant 0 : i32
    return %arg0, %c0_i32 : i32, i32
  }
  func.func @transform_4(%arg0: i32) -> (i32, i32) {
    %c0_i32 = arith.constant 0 : i32
    %c0_i32_0 = arith.constant 0 : i32
    %c0_i32_1 = arith.constant 0 : i32
    return %c0_i32, %c0_i32_0 : i32, i32
  }
  func.func @transform_5(%arg0: i32) -> (i32, i32) {
    %c0_i32 = arith.constant 0 : i32
    %c0_i32_0 = arith.constant 0 : i32
    %c0_i32_1 = arith.constant 0 : i32
    return %c0_i32, %c0_i32_0 : i32, i32
  }
  func.func @transform_6(%arg0: i32) -> (i32, i32) {
    %c0_i32 = arith.constant 0 : i32
    %c0_i32_0 = arith.constant 0 : i32
    return %arg0, %c0_i32 : i32, i32
  }
}

module attributes {stable_mosaic.version = 11 : i64} {
  func.func @_attn_kernel(%arg0: i32, %arg1: i32, %arg2: memref<3x1x16x32xbf16, #tpu.memory_space<vmem>>, %arg3: memref<1x1x16xf32, #tpu.memory_space<vmem>>, %arg4: memref<1x16x32xbf16, #tpu.memory_space<vmem>>) attributes {dimension_semantics = [#tpu.dimension_semantics<parallel>, #tpu.dimension_semantics<parallel>], iteration_bounds = array<i64: 2, 1>, scalar_prefetch = 0 : i64, scratch_operands = 0 : i64, tpu.core_type = #tpu.core_type<tc>, window_params = [{transform_indices = @transform_0, window_bounds = array<i64: 3, 1, 16, 32>}, {transform_indices = @transform_1, window_bounds = array<i64: 1, 1, 16>}, {transform_indices = @transform_2, window_bounds = array<i64: 1, 16, 32>}]} {
    %c0 = arith.constant 0 : index
    %c0_0 = arith.constant 0 : index
    %c0_1 = arith.constant 0 : index
    %c0_2 = arith.constant 0 : index
    %0 = vector.load %arg2[%c0, %c0_0, %c0_1, %c0_2] : memref<3x1x16x32xbf16, #tpu.memory_space<vmem>>, vector<1x1x16x32xbf16>
    %1 = vector.shape_cast %0 : vector<1x1x16x32xbf16> to vector<16x32xbf16>
    %c1 = arith.constant 1 : index
    %c0_3 = arith.constant 0 : index
    %c0_4 = arith.constant 0 : index
    %c0_5 = arith.constant 0 : index
    %2 = vector.load %arg2[%c1, %c0_3, %c0_4, %c0_5] : memref<3x1x16x32xbf16, #tpu.memory_space<vmem>>, vector<1x1x16x32xbf16>
    %3 = vector.shape_cast %2 : vector<1x1x16x32xbf16> to vector<16x32xbf16>
    %c2 = arith.constant 2 : index
    %c0_6 = arith.constant 0 : index
    %c0_7 = arith.constant 0 : index
    %c0_8 = arith.constant 0 : index
    %4 = vector.load %arg2[%c2, %c0_6, %c0_7, %c0_8] : memref<3x1x16x32xbf16, #tpu.memory_space<vmem>>, vector<1x1x16x32xbf16>
    %5 = vector.shape_cast %4 : vector<1x1x16x32xbf16> to vector<16x32xbf16>
    %c0_9 = arith.constant 0 : index
    %c0_10 = arith.constant 0 : index
    %c0_11 = arith.constant 0 : index
    %6 = vector.load %arg3[%c0_9, %c0_10, %c0_11] : memref<1x1x16xf32, #tpu.memory_space<vmem>>, vector<1x1x16xf32>
    %7 = vector.shape_cast %6 : vector<1x1x16xf32> to vector<1x16xf32>
    %8 = vector.extract_strided_slice %1 {offsets = [0, 0], sizes = [16, 8], strides = [1, 1]} : vector<16x32xbf16> to vector<16x8xbf16>
    %9 = vector.extract_strided_slice %3 {offsets = [0, 0], sizes = [16, 8], strides = [1, 1]} : vector<16x32xbf16> to vector<16x8xbf16>
    %10 = vector.extract_strided_slice %5 {offsets = [0, 0], sizes = [16, 8], strides = [1, 1]} : vector<16x32xbf16> to vector<16x8xbf16>
    %cst = arith.constant dense<0.000000e+00> : vector<16x16xf32>
    %11 = tpu.matmul %8, %9, %cst {dimension_numbers = #tpu.dot_dimension_numbers<[1], [1], [0], [0], [0, 0, 1, 0], [], []>} : vector<16x8xbf16>, vector<16x8xbf16>, vector<16x16xf32> -> vector<16x16xf32>
    %12 = vector.broadcast %7 : vector<1x16xf32> to vector<16x16xf32>
    %13 = arith.addf %11, %12 : vector<16x16xf32>
    %cst_12 = arith.constant dense<0xFF800000> : vector<16xf32>
    %14 = vector.multi_reduction <maximumf>, %13, %cst_12 [1] : vector<16x16xf32> to vector<16xf32>
    %15 = vector.shape_cast %14 : vector<16xf32> to vector<16x1xf32>
    %16 = vector.broadcast %15 : vector<16x1xf32> to vector<16x16xf32>
    %17 = arith.subf %13, %16 : vector<16x16xf32>
    %18 = math.exp %17 : vector<16x16xf32>
    %cst_13 = arith.constant dense<0.000000e+00> : vector<16xf32>
    %19 = vector.multi_reduction <add>, %18, %cst_13 [1] : vector<16x16xf32> to vector<16xf32>
    %20 = vector.shape_cast %19 : vector<16xf32> to vector<16x1xf32>
    %21 = tpu.reciprocal %20 {approx = true} : vector<16x1xf32> -> vector<16x1xf32>
    %22 = arith.truncf %18 : vector<16x16xf32> to vector<16x16xbf16>
    %cst_14 = arith.constant dense<0.000000e+00> : vector<16x8xf32>
    %23 = tpu.matmul %22, %10, %cst_14 {dimension_numbers = #tpu.dot_dimension_numbers<[1], [0], [0], [1], [0, 0, 1, 1], [], []>} : vector<16x16xbf16>, vector<16x8xbf16>, vector<16x8xf32> -> vector<16x8xf32>
    %24 = vector.broadcast %21 : vector<16x1xf32> to vector<16x8xf32>
    %25 = arith.mulf %23, %24 : vector<16x8xf32>
    %26 = arith.truncf %25 : vector<16x8xf32> to vector<16x8xbf16>
    %c0_15 = arith.constant 0 : index
    %c0_16 = arith.constant 0 : index
    %c0_17 = arith.constant 0 : index
    %27 = vector.load %arg4[%c0_15, %c0_16, %c0_17] : memref<1x16x32xbf16, #tpu.memory_space<vmem>>, vector<1x16x8xbf16>
    %28 = vector.shape_cast %27 : vector<1x16x8xbf16> to vector<16x8xbf16>
    %29 = vector.shape_cast %26 : vector<16x8xbf16> to vector<1x16x8xbf16>
    tpu.vector_store %arg4[%c0_15, %c0_16, %c0_17], %29 {strides = array<i32>} : memref<1x16x32xbf16, #tpu.memory_space<vmem>>, vector<1x16x8xbf16>,
    %30 = vector.extract_strided_slice %1 {offsets = [0, 8], sizes = [16, 8], strides = [1, 1]} : vector<16x32xbf16> to vector<16x8xbf16>
    %31 = vector.extract_strided_slice %3 {offsets = [0, 8], sizes = [16, 8], strides = [1, 1]} : vector<16x32xbf16> to vector<16x8xbf16>
    %32 = vector.extract_strided_slice %5 {offsets = [0, 8], sizes = [16, 8], strides = [1, 1]} : vector<16x32xbf16> to vector<16x8xbf16>
    %cst_18 = arith.constant dense<0.000000e+00> : vector<16x16xf32>
    %33 = tpu.matmul %30, %31, %cst_18 {dimension_numbers = #tpu.dot_dimension_numbers<[1], [1], [0], [0], [0, 0, 1, 0], [], []>} : vector<16x8xbf16>, vector<16x8xbf16>, vector<16x16xf32> -> vector<16x16xf32>
    %34 = vector.broadcast %7 : vector<1x16xf32> to vector<16x16xf32>
    %35 = arith.addf %33, %34 : vector<16x16xf32>
    %cst_19 = arith.constant dense<0xFF800000> : vector<16xf32>
    %36 = vector.multi_reduction <maximumf>, %35, %cst_19 [1] : vector<16x16xf32> to vector<16xf32>
    %37 = vector.shape_cast %36 : vector<16xf32> to vector<16x1xf32>
    %38 = vector.broadcast %37 : vector<16x1xf32> to vector<16x16xf32>
    %39 = arith.subf %35, %38 : vector<16x16xf32>
    %40 = math.exp %39 : vector<16x16xf32>
    %cst_20 = arith.constant dense<0.000000e+00> : vector<16xf32>
    %41 = vector.multi_reduction <add>, %40, %cst_20 [1] : vector<16x16xf32> to vector<16xf32>
    %42 = vector.shape_cast %41 : vector<16xf32> to vector<16x1xf32>
    %43 = tpu.reciprocal %42 {approx = true} : vector<16x1xf32> -> vector<16x1xf32>
    %44 = arith.truncf %40 : vector<16x16xf32> to vector<16x16xbf16>
    %cst_21 = arith.constant dense<0.000000e+00> : vector<16x8xf32>
    %45 = tpu.matmul %44, %32, %cst_21 {dimension_numbers = #tpu.dot_dimension_numbers<[1], [0], [0], [1], [0, 0, 1, 1], [], []>} : vector<16x16xbf16>, vector<16x8xbf16>, vector<16x8xf32> -> vector<16x8xf32>
    %46 = vector.broadcast %43 : vector<16x1xf32> to vector<16x8xf32>
    %47 = arith.mulf %45, %46 : vector<16x8xf32>
    %48 = arith.truncf %47 : vector<16x8xf32> to vector<16x8xbf16>
    %c0_22 = arith.constant 0 : index
    %c0_23 = arith.constant 0 : index
    %c8 = arith.constant 8 : index
    %49 = vector.load %arg4[%c0_22, %c0_23, %c8] : memref<1x16x32xbf16, #tpu.memory_space<vmem>>, vector<1x16x8xbf16>
    %50 = vector.shape_cast %49 : vector<1x16x8xbf16> to vector<16x8xbf16>
    %51 = vector.shape_cast %48 : vector<16x8xbf16> to vector<1x16x8xbf16>
    tpu.vector_store %arg4[%c0_22, %c0_23, %c8], %51 {strides = array<i32>} : memref<1x16x32xbf16, #tpu.memory_space<vmem>>, vector<1x16x8xbf16>,
    %52 = vector.extract_strided_slice %1 {offsets = [0, 16], sizes = [16, 8], strides = [1, 1]} : vector<16x32xbf16> to vector<16x8xbf16>
    %53 = vector.extract_strided_slice %3 {offsets = [0, 16], sizes = [16, 8], strides = [1, 1]} : vector<16x32xbf16> to vector<16x8xbf16>
    %54 = vector.extract_strided_slice %5 {offsets = [0, 16], sizes = [16, 8], strides = [1, 1]} : vector<16x32xbf16> to vector<16x8xbf16>
    %cst_24 = arith.constant dense<0.000000e+00> : vector<16x16xf32>
    %55 = tpu.matmul %52, %53, %cst_24 {dimension_numbers = #tpu.dot_dimension_numbers<[1], [1], [0], [0], [0, 0, 1, 0], [], []>} : vector<16x8xbf16>, vector<16x8xbf16>, vector<16x16xf32> -> vector<16x16xf32>
    %56 = vector.broadcast %7 : vector<1x16xf32> to vector<16x16xf32>
    %57 = arith.addf %55, %56 : vector<16x16xf32>
    %cst_25 = arith.constant dense<0xFF800000> : vector<16xf32>
    %58 = vector.multi_reduction <maximumf>, %57, %cst_25 [1] : vector<16x16xf32> to vector<16xf32>
    %59 = vector.shape_cast %58 : vector<16xf32> to vector<16x1xf32>
    %60 = vector.broadcast %59 : vector<16x1xf32> to vector<16x16xf32>
    %61 = arith.subf %57, %60 : vector<16x16xf32>
    %62 = math.exp %61 : vector<16x16xf32>
    %cst_26 = arith.constant dense<0.000000e+00> : vector<16xf32>
    %63 = vector.multi_reduction <add>, %62, %cst_26 [1] : vector<16x16xf32> to vector<16xf32>
    %64 = vector.shape_cast %63 : vector<16xf32> to vector<16x1xf32>
    %65 = tpu.reciprocal %64 {approx = true} : vector<16x1xf32> -> vector<16x1xf32>
    %66 = arith.truncf %62 : vector<16x16xf32> to vector<16x16xbf16>
    %cst_27 = arith.constant dense<0.000000e+00> : vector<16x8xf32>
    %67 = tpu.matmul %66, %54, %cst_27 {dimension_numbers = #tpu.dot_dimension_numbers<[1], [0], [0], [1], [0, 0, 1, 1], [], []>} : vector<16x16xbf16>, vector<16x8xbf16>, vector<16x8xf32> -> vector<16x8xf32>
    %68 = vector.broadcast %65 : vector<16x1xf32> to vector<16x8xf32>
    %69 = arith.mulf %67, %68 : vector<16x8xf32>
    %70 = arith.truncf %69 : vector<16x8xf32> to vector<16x8xbf16>
    %c0_28 = arith.constant 0 : index
    %c0_29 = arith.constant 0 : index
    %c16 = arith.constant 16 : index
    %71 = vector.load %arg4[%c0_28, %c0_29, %c16] : memref<1x16x32xbf16, #tpu.memory_space<vmem>>, vector<1x16x8xbf16>
    %72 = vector.shape_cast %71 : vector<1x16x8xbf16> to vector<16x8xbf16>
    %73 = vector.shape_cast %70 : vector<16x8xbf16> to vector<1x16x8xbf16>
    tpu.vector_store %arg4[%c0_28, %c0_29, %c16], %73 {strides = array<i32>} : memref<1x16x32xbf16, #tpu.memory_space<vmem>>, vector<1x16x8xbf16>,
    %74 = vector.extract_strided_slice %1 {offsets = [0, 24], sizes = [16, 8], strides = [1, 1]} : vector<16x32xbf16> to vector<16x8xbf16>
    %75 = vector.extract_strided_slice %3 {offsets = [0, 24], sizes = [16, 8], strides = [1, 1]} : vector<16x32xbf16> to vector<16x8xbf16>
    %76 = vector.extract_strided_slice %5 {offsets = [0, 24], sizes = [16, 8], strides = [1, 1]} : vector<16x32xbf16> to vector<16x8xbf16>
    %cst_30 = arith.constant dense<0.000000e+00> : vector<16x16xf32>
    %77 = tpu.matmul %74, %75, %cst_30 {dimension_numbers = #tpu.dot_dimension_numbers<[1], [1], [0], [0], [0, 0, 1, 0], [], []>} : vector<16x8xbf16>, vector<16x8xbf16>, vector<16x16xf32> -> vector<16x16xf32>
    %78 = vector.broadcast %7 : vector<1x16xf32> to vector<16x16xf32>
    %79 = arith.addf %77, %78 : vector<16x16xf32>
    %cst_31 = arith.constant dense<0xFF800000> : vector<16xf32>
    %80 = vector.multi_reduction <maximumf>, %79, %cst_31 [1] : vector<16x16xf32> to vector<16xf32>
    %81 = vector.shape_cast %80 : vector<16xf32> to vector<16x1xf32>
    %82 = vector.broadcast %81 : vector<16x1xf32> to vector<16x16xf32>
    %83 = arith.subf %79, %82 : vector<16x16xf32>
    %84 = math.exp %83 : vector<16x16xf32>
    %cst_32 = arith.constant dense<0.000000e+00> : vector<16xf32>
    %85 = vector.multi_reduction <add>, %84, %cst_32 [1] : vector<16x16xf32> to vector<16xf32>
    %86 = vector.shape_cast %85 : vector<16xf32> to vector<16x1xf32>
    %87 = tpu.reciprocal %86 {approx = true} : vector<16x1xf32> -> vector<16x1xf32>
    %88 = arith.truncf %84 : vector<16x16xf32> to vector<16x16xbf16>
    %cst_33 = arith.constant dense<0.000000e+00> : vector<16x8xf32>
    %89 = tpu.matmul %88, %76, %cst_33 {dimension_numbers = #tpu.dot_dimension_numbers<[1], [0], [0], [1], [0, 0, 1, 1], [], []>} : vector<16x16xbf16>, vector<16x8xbf16>, vector<16x8xf32> -> vector<16x8xf32>
    %90 = vector.broadcast %87 : vector<16x1xf32> to vector<16x8xf32>
    %91 = arith.mulf %89, %90 : vector<16x8xf32>
    %92 = arith.truncf %91 : vector<16x8xf32> to vector<16x8xbf16>
    %c0_34 = arith.constant 0 : index
    %c0_35 = arith.constant 0 : index
    %c24 = arith.constant 24 : index
    %93 = vector.load %arg4[%c0_34, %c0_35, %c24] : memref<1x16x32xbf16, #tpu.memory_space<vmem>>, vector<1x16x8xbf16>
    %94 = vector.shape_cast %93 : vector<1x16x8xbf16> to vector<16x8xbf16>
    %95 = vector.shape_cast %92 : vector<16x8xbf16> to vector<1x16x8xbf16>
    tpu.vector_store %arg4[%c0_34, %c0_35, %c24], %95 {strides = array<i32>} : memref<1x16x32xbf16, #tpu.memory_space<vmem>>, vector<1x16x8xbf16>,
    return
  }
  func.func @transform_0(%arg0: i32, %arg1: i32) -> (i32, i32, i32, i32) {
    %c0_i32 = arith.constant 0 : i32
    %c0_i32_0 = arith.constant 0 : i32
    %c0_i32_1 = arith.constant 0 : i32
    return %c0_i32, %arg0, %c0_i32_0, %arg1 : i32, i32, i32, i32
  }
  func.func @transform_1(%arg0: i32, %arg1: i32) -> (i32, i32, i32) {
    %c0_i32 = arith.constant 0 : i32
    %c0_i32_0 = arith.constant 0 : i32
    %c0_i32_1 = arith.constant 0 : i32
    return %arg0, %c0_i32, %c0_i32_0 : i32, i32, i32
  }
  func.func @transform_2(%arg0: i32, %arg1: i32) -> (i32, i32, i32) {
    %c0_i32 = arith.constant 0 : i32
    %c0_i32_0 = arith.constant 0 : i32
    return %arg0, %c0_i32, %arg1 : i32, i32, i32
  }
}

module attributes {stable_mosaic.version = 11 : i64} {
  func.func @_dense_resident_kernel(%arg0: i32, %arg1: memref<32x32xbf16, #tpu.memory_space<vmem>>, %arg2: memref<32x64xbf16, #tpu.memory_space<vmem>>, %arg3: memref<1x64xf32, #tpu.memory_space<vmem>>, %arg4: memref<32x64xbf16, #tpu.memory_space<vmem>>) attributes {dimension_semantics = [#tpu.dimension_semantics<parallel>], iteration_bounds = array<i64: 1>, scalar_prefetch = 0 : i64, scratch_operands = 0 : i64, tpu.core_type = #tpu.core_type<tc>, window_params = [{transform_indices = @transform_0, window_bounds = array<i64: 32, 32>}, {pipeline_mode = #tpu.pipeline_mode<synchronous>, transform_indices = @transform_1, window_bounds = array<i64: 32, 64>}, {pipeline_mode = #tpu.pipeline_mode<synchronous>, transform_indices = @transform_2, window_bounds = array<i64: 1, 64>}, {transform_indices = @transform_3, window_bounds = array<i64: 32, 64>}]} {
    %c0 = arith.constant 0 : index
    %c0_0 = arith.constant 0 : index
    %0 = vector.load %arg1[%c0, %c0_0] : memref<32x32xbf16, #tpu.memory_space<vmem>>, vector<32x32xbf16>
    %c0_1 = arith.constant 0 : index
    %c0_2 = arith.constant 0 : index
    %1 = vector.load %arg2[%c0_1, %c0_2] : memref<32x64xbf16, #tpu.memory_space<vmem>>, vector<32x64xbf16>
    %cst = arith.constant dense<0.000000e+00> : vector<32x64xf32>
    %2 = tpu.matmul %0, %1, %cst {dimension_numbers = #tpu.dot_dimension_numbers<[1], [0], [0], [1], [0, 0, 1, 1], [], []>} : vector<32x32xbf16>, vector<32x64xbf16>, vector<32x64xf32> -> vector<32x64xf32>
    %c0_3 = arith.constant 0 : index
    %c0_4 = arith.constant 0 : index
    %3 = vector.load %arg3[%c0_3, %c0_4] : memref<1x64xf32, #tpu.memory_space<vmem>>, vector<1x64xf32>
    %4 = vector.broadcast %3 : vector<1x64xf32> to vector<32x64xf32>
    %5 = arith.addf %2, %4 : vector<32x64xf32>
    %cst_5 = arith.constant 5.000000e-01 : f32
    %6 = vector.broadcast %cst_5 : f32 to vector<32x64xf32>
    %7 = arith.mulf %6, %5 : vector<32x64xf32>
    %cst_6 = arith.constant 4.471500e-02 : f32
    %8 = vector.broadcast %cst_6 : f32 to vector<32x64xf32>
    %9 = arith.mulf %8, %5 : vector<32x64xf32>
    %10 = arith.mulf %9, %5 : vector<32x64xf32>
    %11 = arith.mulf %10, %5 : vector<32x64xf32>
    %12 = arith.addf %5, %11 : vector<32x64xf32>
    %cst_7 = arith.constant 0.797884583 : f32
    %13 = vector.broadcast %cst_7 : f32 to vector<32x64xf32>
    %14 = arith.mulf %13, %12 : vector<32x64xf32>
    %15 = math.tanh %14 : vector<32x64xf32>
    %cst_8 = arith.constant 1.000000e+00 : f32
    %16 = vector.broadcast %cst_8 : f32 to vector<32x64xf32>
    %17 = arith.addf %16, %15 : vector<32x64xf32>
    %18 = arith.mulf %7, %17 : vector<32x64xf32>
    %19 = arith.truncf %18 : vector<32x64xf32> to vector<32x64xbf16>
    %c0_9 = arith.constant 0 : index
    %c0_10 = arith.constant 0 : index
    %20 = vector.load %arg4[%c0_9, %c0_10] : memref<32x64xbf16, #tpu.memory_space<vmem>>, vector<32x64xbf16>
    tpu.vector_store %arg4[%c0_9, %c0_10], %19 {strides = array<i32>} : memref<32x64xbf16, #tpu.memory_space<vmem>>, vector<32x64xbf16>,
    return
  }
  func.func @transform_0(%arg0: i32) -> (i32, i32) {
    %c0_i32 = arith.constant 0 : i32
    %c0_i32_0 = arith.constant 0 : i32
    return %arg0, %c0_i32 : i32, i32
  }
  func.func @transform_1(%arg0: i32) -> (i32, i32) {
    %c0_i32 = arith.constant 0 : i32
    %c0_i32_0 = arith.constant 0 : i32
    %c0_i32_1 = arith.constant 0 : i32
    return %c0_i32, %c0_i32_0 : i32, i32
  }
  func.func @transform_2(%arg0: i32) -> (i32, i32) {
    %c0_i32 = arith.constant 0 : i32
    %c0_i32_0 = arith.constant 0 : i32
    %c0_i32_1 = arith.constant 0 : i32
    return %c0_i32, %c0_i32_0 : i32, i32
  }
  func.func @transform_3(%arg0: i32) -> (i32, i32) {
    %c0_i32 = arith.constant 0 : i32
    %c0_i32_0 = arith.constant 0 : i32
    return %arg0, %c0_i32 : i32, i32
  }
}

module attributes {stable_mosaic.version = 11 : i64} {
  func.func @_dense_resident_kernel(%arg0: i32, %arg1: memref<32x64xbf16, #tpu.memory_space<vmem>>, %arg2: memref<64x32xbf16, #tpu.memory_space<vmem>>, %arg3: memref<1x32xf32, #tpu.memory_space<vmem>>, %arg4: memref<32x32xbf16, #tpu.memory_space<vmem>>, %arg5: memref<1x32xf32, #tpu.memory_space<vmem>>, %arg6: memref<1x32xf32, #tpu.memory_space<vmem>>, %arg7: memref<32x32xbf16, #tpu.memory_space<vmem>>) attributes {dimension_semantics = [#tpu.dimension_semantics<parallel>], iteration_bounds = array<i64: 1>, scalar_prefetch = 0 : i64, scratch_operands = 0 : i64, tpu.core_type = #tpu.core_type<tc>, window_params = [{transform_indices = @transform_0, window_bounds = array<i64: 32, 64>}, {pipeline_mode = #tpu.pipeline_mode<synchronous>, transform_indices = @transform_1, window_bounds = array<i64: 64, 32>}, {pipeline_mode = #tpu.pipeline_mode<synchronous>, transform_indices = @transform_2, window_bounds = array<i64: 1, 32>}, {transform_indices = @transform_3, window_bounds = array<i64: 32, 32>}, {pipeline_mode = #tpu.pipeline_mode<synchronous>, transform_indices = @transform_4, window_bounds = array<i64: 1, 32>}, {pipeline_mode = #tpu.pipeline_mode<synchronous>, transform_indices = @transform_5, window_bounds = array<i64: 1, 32>}, {transform_indices = @transform_6, window_bounds = array<i64: 32, 32>}]} {
    %c0 = arith.constant 0 : index
    %c0_0 = arith.constant 0 : index
    %0 = vector.load %arg1[%c0, %c0_0] : memref<32x64xbf16, #tpu.memory_space<vmem>>, vector<32x64xbf16>
    %c0_1 = arith.constant 0 : index
    %c0_2 = arith.constant 0 : index
    %1 = vector.load %arg2[%c0_1, %c0_2] : memref<64x32xbf16, #tpu.memory_space<vmem>>, vector<64x32xbf16>
    %cst = arith.constant dense<0.000000e+00> : vector<32x32xf32>
    %2 = tpu.matmul %0, %1, %cst {dimension_numbers = #tpu.dot_dimension_numbers<[1], [0], [0], [1], [0, 0, 1, 1], [], []>} : vector<32x64xbf16>, vector<64x32xbf16>, vector<32x32xf32> -> vector<32x32xf32>
    %c0_3 = arith.constant 0 : index
    %c0_4 = arith.constant 0 : index
    %3 = vector.load %arg3[%c0_3, %c0_4] : memref<1x32xf32, #tpu.memory_space<vmem>>, vector<1x32xf32>
    %4 = vector.broadcast %3 : vector<1x32xf32> to vector<32x32xf32>
    %5 = arith.addf %2, %4 : vector<32x32xf32>
    %c0_5 = arith.constant 0 : index
    %c0_6 = arith.constant 0 : index
    %6 = vector.load %arg4[%c0_5, %c0_6] : memref<32x32xbf16, #tpu.memory_space<vmem>>, vector<32x32xbf16>
    %7 = arith.extf %6 : vector<32x32xbf16> to vector<32x32xf32>
    %8 = arith.addf %5, %7 : vector<32x32xf32>
    %cst_7 = arith.constant dense<0.000000e+00> : vector<32xf32>
    %9 = vector.multi_reduction <add>, %8, %cst_7 [1] : vector<32x32xf32> to vector<32xf32>
    %10 = vector.shape_cast %9 : vector<32xf32> to vector<32x1xf32>
    %cst_8 = arith.constant 3.200000e+01 : f32
    %11 = vector.broadcast %cst_8 : f32 to vector<32x1xf32>
    %12 = arith.divf %10, %11 : vector<32x1xf32>
    %13 = vector.broadcast %12 : vector<32x1xf32> to vector<32x32xf32>
    %14 = arith.subf %8, %13 : vector<32x32xf32>
    %15 = arith.mulf %14, %14 : vector<32x32xf32>
    %cst_9 = arith.constant dense<0.000000e+00> : vector<32xf32>
    %16 = vector.multi_reduction <add>, %15, %cst_9 [1] : vector<32x32xf32> to vector<32xf32>
    %17 = vector.shape_cast %16 : vector<32xf32> to vector<32x1xf32>
    %cst_10 = arith.constant 3.200000e+01 : f32
    %18 = vector.broadcast %cst_10 : f32 to vector<32x1xf32>
    %19 = arith.divf %17, %18 : vector<32x1xf32>
    %cst_11 = arith.constant 9.99999974E-6 : f32
    %20 = vector.broadcast %cst_11 : f32 to vector<32x1xf32>
    %21 = arith.addf %19, %20 : vector<32x1xf32>
    %22 = math.rsqrt %21 : vector<32x1xf32>
    %23 = vector.broadcast %22 : vector<32x1xf32> to vector<32x32xf32>
    %24 = arith.mulf %14, %23 : vector<32x32xf32>
    %c0_12 = arith.constant 0 : index
    %c0_13 = arith.constant 0 : index
    %25 = vector.load %arg5[%c0_12, %c0_13] : memref<1x32xf32, #tpu.memory_space<vmem>>, vector<1x32xf32>
    %26 = vector.broadcast %25 : vector<1x32xf32> to vector<32x32xf32>
    %27 = arith.mulf %24, %26 : vector<32x32xf32>
    %c0_14 = arith.constant 0 : index
    %c0_15 = arith.constant 0 : index
    %28 = vector.load %arg6[%c0_14, %c0_15] : memref<1x32xf32, #tpu.memory_space<vmem>>, vector<1x32xf32>
    %29 = vector.broadcast %28 : vector<1x32xf32> to vector<32x32xf32>
    %30 = arith.addf %27, %29 : vector<32x32xf32>
    %31 = arith.truncf %30 : vector<32x32xf32> to vector<32x32xbf16>
    %c0_16 = arith.constant 0 : index
    %c0_17 = arith.constant 0 : index
    %32 = vector.load %arg7[%c0_16, %c0_17] : memref<32x32xbf16, #tpu.memory_space<vmem>>, vector<32x32xbf16>
    tpu.vector_store %arg7[%c0_16, %c0_17], %31 {strides = array<i32>} : memref<32x32xbf16, #tpu.memory_space<vmem>>, vector<32x32xbf16>,
    return
  }
  func.func @transform_0(%arg0: i32) -> (i32, i32) {
    %c0_i32 = arith.constant 0 : i32
    %c0_i32_0 = arith.constant 0 : i32
    return %arg0, %c0_i32 : i32, i32
  }
  func.func @transform_1(%arg0: i32) -> (i32, i32) {
    %c0_i32 = arith.constant 0 : i32
    %c0_i32_0 = arith.constant 0 : i32
    %c0_i32_1 = arith.constant 0 : i32
    return %c0_i32, %c0_i32_0 : i32, i32
  }
  func.func @transform_2(%arg0: i32) -> (i32, i32) {
    %c0_i32 = arith.constant 0 : i32
    %c0_i32_0 = arith.constant 0 : i32
    %c0_i32_1 = arith.constant 0 : i32
    return %c0_i32, %c0_i32_0 : i32, i32
  }
  func.func @transform_3(%arg0: i32) -> (i32, i32) {
    %c0_i32 = arith.constant 0 : i32
    %c0_i32_0 = arith.constant 0 : i32
    return %arg0, %c0_i32 : i32, i32
  }
  func.func @transform_4(%arg0: i32) -> (i32, i32) {
    %c0_i32 = arith.constant 0 : i32
    %c0_i32_0 = arith.constant 0 : i32
    %c0_i32_1 = arith.constant 0 : i32
    return %c0_i32, %c0_i32_0 : i32, i32
  }
  func.func @transform_5(%arg0: i32) -> (i32, i32) {
    %c0_i32 = arith.constant 0 : i32
    %c0_i32_0 = arith.constant 0 : i32
    %c0_i32_1 = arith.constant 0 : i32
    return %c0_i32, %c0_i32_0 : i32, i32
  }
  func.func @transform_6(%arg0: i32) -> (i32, i32) {
    %c0_i32 = arith.constant 0 : i32
    %c0_i32_0 = arith.constant 0 : i32
    return %arg0, %c0_i32 : i32, i32
  }
}

module attributes {stable_mosaic.version = 11 : i64} {
  func.func @_qkv_resident_kernel(%arg0: i32, %arg1: memref<8x32xbf16, #tpu.memory_space<vmem>>, %arg2: memref<3x32x32xbf16, #tpu.memory_space<vmem>>, %arg3: memref<3x1x32xf32, #tpu.memory_space<vmem>>, %arg4: memref<3x8x32xbf16, #tpu.memory_space<vmem>>) attributes {dimension_semantics = [#tpu.dimension_semantics<parallel>], iteration_bounds = array<i64: 1>, scalar_prefetch = 0 : i64, scratch_operands = 0 : i64, tpu.core_type = #tpu.core_type<tc>, window_params = [{transform_indices = @transform_0, window_bounds = array<i64: 8, 32>}, {pipeline_mode = #tpu.pipeline_mode<synchronous>, transform_indices = @transform_1, window_bounds = array<i64: 3, 32, 32>}, {pipeline_mode = #tpu.pipeline_mode<synchronous>, transform_indices = @transform_2, window_bounds = array<i64: 3, 1, 32>}, {transform_indices = @transform_3, window_bounds = array<i64: 3, 8, 32>}]} {
    %c0 = arith.constant 0 : index
    %c0_0 = arith.constant 0 : index
    %0 = vector.load %arg1[%c0, %c0_0] : memref<8x32xbf16, #tpu.memory_space<vmem>>, vector<8x32xbf16>
    %c0_1 = arith.constant 0 : index
    %c0_2 = arith.constant 0 : index
    %c0_3 = arith.constant 0 : index
    %1 = vector.load %arg2[%c0_1, %c0_2, %c0_3] : memref<3x32x32xbf16, #tpu.memory_space<vmem>>, vector<1x32x32xbf16>
    %2 = vector.shape_cast %1 : vector<1x32x32xbf16> to vector<32x32xbf16>
    %cst = arith.constant dense<0.000000e+00> : vector<8x32xf32>
    %3 = tpu.matmul %0, %2, %cst {dimension_numbers = #tpu.dot_dimension_numbers<[1], [0], [0], [1], [0, 0, 1, 1], [], []>} : vector<8x32xbf16>, vector<32x32xbf16>, vector<8x32xf32> -> vector<8x32xf32>
    %c0_4 = arith.constant 0 : index
    %c0_5 = arith.constant 0 : index
    %c0_6 = arith.constant 0 : index
    %4 = vector.load %arg3[%c0_4, %c0_5, %c0_6] : memref<3x1x32xf32, #tpu.memory_space<vmem>>, vector<1x1x32xf32>
    %5 = vector.shape_cast %4 : vector<1x1x32xf32> to vector<1x32xf32>
    %6 = vector.broadcast %5 : vector<1x32xf32> to vector<8x32xf32>
    %7 = arith.addf %3, %6 : vector<8x32xf32>
    %8 = arith.truncf %7 : vector<8x32xf32> to vector<8x32xbf16>
    %c0_7 = arith.constant 0 : index
    %c0_8 = arith.constant 0 : index
    %c0_9 = arith.constant 0 : index
    %9 = vector.load %arg4[%c0_7, %c0_8, %c0_9] : memref<3x8x32xbf16, #tpu.memory_space<vmem>>, vector<1x8x32xbf16>
    %10 = vector.shape_cast %9 : vector<1x8x32xbf16> to vector<8x32xbf16>
    %11 = vector.shape_cast %8 : vector<8x32xbf16> to vector<1x8x32xbf16>
    tpu.vector_store %arg4[%c0_7, %c0_8, %c0_9], %11 {strides = array<i32>} : memref<3x8x32xbf16, #tpu.memory_space<vmem>>, vector<1x8x32xbf16>,
    %c1 = arith.constant 1 : index
    %c0_10 = arith.constant 0 : index
    %c0_11 = arith.constant 0 : index
    %12 = vector.load %arg2[%c1, %c0_10, %c0_11] : memref<3x32x32xbf16, #tpu.memory_space<vmem>>, vector<1x32x32xbf16>
    %13 = vector.shape_cast %12 : vector<1x32x32xbf16> to vector<32x32xbf16>
    %cst_12 = arith.constant dense<0.000000e+00> : vector<8x32xf32>
    %14 = tpu.matmul %0, %13, %cst_12 {dimension_numbers = #tpu.dot_dimension_numbers<[1], [0], [0], [1], [0, 0, 1, 1], [], []>} : vector<8x32xbf16>, vector<32x32xbf16>, vector<8x32xf32> -> vector<8x32xf32>
    %c1_13 = arith.constant 1 : index
    %c0_14 = arith.constant 0 : index
    %c0_15 = arith.constant 0 : index
    %15 = vector.load %arg3[%c1_13, %c0_14, %c0_15] : memref<3x1x32xf32, #tpu.memory_space<vmem>>, vector<1x1x32xf32>
    %16 = vector.shape_cast %15 : vector<1x1x32xf32> to vector<1x32xf32>
    %17 = vector.broadcast %16 : vector<1x32xf32> to vector<8x32xf32>
    %18 = arith.addf %14, %17 : vector<8x32xf32>
    %19 = arith.truncf %18 : vector<8x32xf32> to vector<8x32xbf16>
    %c1_16 = arith.constant 1 : index
    %c0_17 = arith.constant 0 : index
    %c0_18 = arith.constant 0 : index
    %20 = vector.load %arg4[%c1_16, %c0_17, %c0_18] : memref<3x8x32xbf16, #tpu.memory_space<vmem>>, vector<1x8x32xbf16>
    %21 = vector.shape_cast %20 : vector<1x8x32xbf16> to vector<8x32xbf16>
    %22 = vector.shape_cast %19 : vector<8x32xbf16> to vector<1x8x32xbf16>
    tpu.vector_store %arg4[%c1_16, %c0_17, %c0_18], %22 {strides = array<i32>} : memref<3x8x32xbf16, #tpu.memory_space<vmem>>, vector<1x8x32xbf16>,
    %c2 = arith.constant 2 : index
    %c0_19 = arith.constant 0 : index
    %c0_20 = arith.constant 0 : index
    %23 = vector.load %arg2[%c2, %c0_19, %c0_20] : memref<3x32x32xbf16, #tpu.memory_space<vmem>>, vector<1x32x32xbf16>
    %24 = vector.shape_cast %23 : vector<1x32x32xbf16> to vector<32x32xbf16>
    %cst_21 = arith.constant dense<0.000000e+00> : vector<8x32xf32>
    %25 = tpu.matmul %0, %24, %cst_21 {dimension_numbers = #tpu.dot_dimension_numbers<[1], [0], [0], [1], [0, 0, 1, 1], [], []>} : vector<8x32xbf16>, vector<32x32xbf16>, vector<8x32xf32> -> vector<8x32xf32>
    %c2_22 = arith.constant 2 : index
    %c0_23 = arith.constant 0 : index
    %c0_24 = arith.constant 0 : index
    %26 = vector.load %arg3[%c2_22, %c0_23, %c0_24] : memref<3x1x32xf32, #tpu.memory_space<vmem>>, vector<1x1x32xf32>
    %27 = vector.shape_cast %26 : vector<1x1x32xf32> to vector<1x32xf32>
    %28 = vector.broadcast %27 : vector<1x32xf32> to vector<8x32xf32>
    %29 = arith.addf %25, %28 : vector<8x32xf32>
    %30 = arith.truncf %29 : vector<8x32xf32> to vector<8x32xbf16>
    %c2_25 = arith.constant 2 : index
    %c0_26 = arith.constant 0 : index
    %c0_27 = arith.constant 0 : index
    %31 = vector.load %arg4[%c2_25, %c0_26, %c0_27] : memref<3x8x32xbf16, #tpu.memory_space<vmem>>, vector<1x8x32xbf16>
    %32 = vector.shape_cast %31 : vector<1x8x32xbf16> to vector<8x32xbf16>
    %33 = vector.shape_cast %30 : vector<8x32xbf16> to vector<1x8x32xbf16>
    tpu.vector_store %arg4[%c2_25, %c0_26, %c0_27], %33 {strides = array<i32>} : memref<3x8x32xbf16, #tpu.memory_space<vmem>>, vector<1x8x32xbf16>,
    return
  }
  func.func @transform_0(%arg0: i32) -> (i32, i32) {
    %c0_i32 = arith.constant 0 : i32
    %c0_i32_0 = arith.constant 0 : i32
    return %arg0, %c0_i32 : i32, i32
  }
  func.func @transform_1(%arg0: i32) -> (i32, i32, i32) {
    %c0_i32 = arith.constant 0 : i32
    %c0_i32_0 = arith.constant 0 : i32
    %c0_i32_1 = arith.constant 0 : i32
    %c0_i32_2 = arith.constant 0 : i32
    return %c0_i32, %c0_i32_0, %c0_i32_1 : i32, i32, i32
  }
  func.func @transform_2(%arg0: i32) -> (i32, i32, i32) {
    %c0_i32 = arith.constant 0 : i32
    %c0_i32_0 = arith.constant 0 : i32
    %c0_i32_1 = arith.constant 0 : i32
    %c0_i32_2 = arith.constant 0 : i32
    return %c0_i32, %c0_i32_0, %c0_i32_1 : i32, i32, i32
  }
  func.func @transform_3(%arg0: i32) -> (i32, i32, i32) {
    %c0_i32 = arith.constant 0 : i32
    %c0_i32_0 = arith.constant 0 : i32
    %c0_i32_1 = arith.constant 0 : i32
    return %c0_i32, %arg0, %c0_i32_0 : i32, i32, i32
  }
}

module attributes {stable_mosaic.version = 11 : i64} {
  func.func @_attn_kernel(%arg0: i32, %arg1: i32, %arg2: memref<3x1x4x32xbf16, #tpu.memory_space<vmem>>, %arg3: memref<1x1x4xf32, #tpu.memory_space<vmem>>, %arg4: memref<1x4x32xbf16, #tpu.memory_space<vmem>>) attributes {dimension_semantics = [#tpu.dimension_semantics<parallel>, #tpu.dimension_semantics<parallel>], iteration_bounds = array<i64: 2, 1>, scalar_prefetch = 0 : i64, scratch_operands = 0 : i64, tpu.core_type = #tpu.core_type<tc>, window_params = [{transform_indices = @transform_0, window_bounds = array<i64: 3, 1, 4, 32>}, {transform_indices = @transform_1, window_bounds = array<i64: 1, 1, 4>}, {transform_indices = @transform_2, window_bounds = array<i64: 1, 4, 32>}]} {
    %c0 = arith.constant 0 : index
    %c0_0 = arith.constant 0 : index
    %c0_1 = arith.constant 0 : index
    %c0_2 = arith.constant 0 : index
    %0 = vector.load %arg2[%c0, %c0_0, %c0_1, %c0_2] : memref<3x1x4x32xbf16, #tpu.memory_space<vmem>>, vector<1x1x4x32xbf16>
    %1 = vector.shape_cast %0 : vector<1x1x4x32xbf16> to vector<4x32xbf16>
    %c1 = arith.constant 1 : index
    %c0_3 = arith.constant 0 : index
    %c0_4 = arith.constant 0 : index
    %c0_5 = arith.constant 0 : index
    %2 = vector.load %arg2[%c1, %c0_3, %c0_4, %c0_5] : memref<3x1x4x32xbf16, #tpu.memory_space<vmem>>, vector<1x1x4x32xbf16>
    %3 = vector.shape_cast %2 : vector<1x1x4x32xbf16> to vector<4x32xbf16>
    %c2 = arith.constant 2 : index
    %c0_6 = arith.constant 0 : index
    %c0_7 = arith.constant 0 : index
    %c0_8 = arith.constant 0 : index
    %4 = vector.load %arg2[%c2, %c0_6, %c0_7, %c0_8] : memref<3x1x4x32xbf16, #tpu.memory_space<vmem>>, vector<1x1x4x32xbf16>
    %5 = vector.shape_cast %4 : vector<1x1x4x32xbf16> to vector<4x32xbf16>
    %c0_9 = arith.constant 0 : index
    %c0_10 = arith.constant 0 : index
    %c0_11 = arith.constant 0 : index
    %6 = vector.load %arg3[%c0_9, %c0_10, %c0_11] : memref<1x1x4xf32, #tpu.memory_space<vmem>>, vector<1x1x4xf32>
    %7 = vector.shape_cast %6 : vector<1x1x4xf32> to vector<1x4xf32>
    %8 = vector.extract_strided_slice %1 {offsets = [0, 0], sizes = [4, 8], strides = [1, 1]} : vector<4x32xbf16> to vector<4x8xbf16>
    %9 = vector.extract_strided_slice %3 {offsets = [0, 0], sizes = [4, 8], strides = [1, 1]} : vector<4x32xbf16> to vector<4x8xbf16>
    %10 = vector.extract_strided_slice %5 {offsets = [0, 0], sizes = [4, 8], strides = [1, 1]} : vector<4x32xbf16> to vector<4x8xbf16>
    %cst = arith.constant dense<0.000000e+00> : vector<4x4xf32>
    %11 = tpu.matmul %8, %9, %cst {dimension_numbers = #tpu.dot_dimension_numbers<[1], [1], [0], [0], [0, 0, 1, 0], [], []>} : vector<4x8xbf16>, vector<4x8xbf16>, vector<4x4xf32> -> vector<4x4xf32>
    %12 = vector.broadcast %7 : vector<1x4xf32> to vector<4x4xf32>
    %13 = arith.addf %11, %12 : vector<4x4xf32>
    %cst_12 = arith.constant dense<0xFF800000> : vector<4xf32>
    %14 = vector.multi_reduction <maximumf>, %13, %cst_12 [1] : vector<4x4xf32> to vector<4xf32>
    %15 = vector.shape_cast %14 : vector<4xf32> to vector<4x1xf32>
    %16 = vector.broadcast %15 : vector<4x1xf32> to vector<4x4xf32>
    %17 = arith.subf %13, %16 : vector<4x4xf32>
    %18 = math.exp %17 : vector<4x4xf32>
    %cst_13 = arith.constant dense<0.000000e+00> : vector<4xf32>
    %19 = vector.multi_reduction <add>, %18, %cst_13 [1] : vector<4x4xf32> to vector<4xf32>
    %20 = vector.shape_cast %19 : vector<4xf32> to vector<4x1xf32>
    %21 = tpu.reciprocal %20 {approx = true} : vector<4x1xf32> -> vector<4x1xf32>
    %22 = arith.truncf %18 : vector<4x4xf32> to vector<4x4xbf16>
    %cst_14 = arith.constant dense<0.000000e+00> : vector<4x8xf32>
    %23 = tpu.matmul %22, %10, %cst_14 {dimension_numbers = #tpu.dot_dimension_numbers<[1], [0], [0], [1], [0, 0, 1, 1], [], []>} : vector<4x4xbf16>, vector<4x8xbf16>, vector<4x8xf32> -> vector<4x8xf32>
    %24 = vector.broadcast %21 : vector<4x1xf32> to vector<4x8xf32>
    %25 = arith.mulf %23, %24 : vector<4x8xf32>
    %26 = arith.truncf %25 : vector<4x8xf32> to vector<4x8xbf16>
    %c0_15 = arith.constant 0 : index
    %c0_16 = arith.constant 0 : index
    %c0_17 = arith.constant 0 : index
    %27 = vector.load %arg4[%c0_15, %c0_16, %c0_17] : memref<1x4x32xbf16, #tpu.memory_space<vmem>>, vector<1x4x8xbf16>
    %28 = vector.shape_cast %27 : vector<1x4x8xbf16> to vector<4x8xbf16>
    %29 = vector.shape_cast %26 : vector<4x8xbf16> to vector<1x4x8xbf16>
    tpu.vector_store %arg4[%c0_15, %c0_16, %c0_17], %29 {strides = array<i32>} : memref<1x4x32xbf16, #tpu.memory_space<vmem>>, vector<1x4x8xbf16>,
    %30 = vector.extract_strided_slice %1 {offsets = [0, 8], sizes = [4, 8], strides = [1, 1]} : vector<4x32xbf16> to vector<4x8xbf16>
    %31 = vector.extract_strided_slice %3 {offsets = [0, 8], sizes = [4, 8], strides = [1, 1]} : vector<4x32xbf16> to vector<4x8xbf16>
    %32 = vector.extract_strided_slice %5 {offsets = [0, 8], sizes = [4, 8], strides = [1, 1]} : vector<4x32xbf16> to vector<4x8xbf16>
    %cst_18 = arith.constant dense<0.000000e+00> : vector<4x4xf32>
    %33 = tpu.matmul %30, %31, %cst_18 {dimension_numbers = #tpu.dot_dimension_numbers<[1], [1], [0], [0], [0, 0, 1, 0], [], []>} : vector<4x8xbf16>, vector<4x8xbf16>, vector<4x4xf32> -> vector<4x4xf32>
    %34 = vector.broadcast %7 : vector<1x4xf32> to vector<4x4xf32>
    %35 = arith.addf %33, %34 : vector<4x4xf32>
    %cst_19 = arith.constant dense<0xFF800000> : vector<4xf32>
    %36 = vector.multi_reduction <maximumf>, %35, %cst_19 [1] : vector<4x4xf32> to vector<4xf32>
    %37 = vector.shape_cast %36 : vector<4xf32> to vector<4x1xf32>
    %38 = vector.broadcast %37 : vector<4x1xf32> to vector<4x4xf32>
    %39 = arith.subf %35, %38 : vector<4x4xf32>
    %40 = math.exp %39 : vector<4x4xf32>
    %cst_20 = arith.constant dense<0.000000e+00> : vector<4xf32>
    %41 = vector.multi_reduction <add>, %40, %cst_20 [1] : vector<4x4xf32> to vector<4xf32>
    %42 = vector.shape_cast %41 : vector<4xf32> to vector<4x1xf32>
    %43 = tpu.reciprocal %42 {approx = true} : vector<4x1xf32> -> vector<4x1xf32>
    %44 = arith.truncf %40 : vector<4x4xf32> to vector<4x4xbf16>
    %cst_21 = arith.constant dense<0.000000e+00> : vector<4x8xf32>
    %45 = tpu.matmul %44, %32, %cst_21 {dimension_numbers = #tpu.dot_dimension_numbers<[1], [0], [0], [1], [0, 0, 1, 1], [], []>} : vector<4x4xbf16>, vector<4x8xbf16>, vector<4x8xf32> -> vector<4x8xf32>
    %46 = vector.broadcast %43 : vector<4x1xf32> to vector<4x8xf32>
    %47 = arith.mulf %45, %46 : vector<4x8xf32>
    %48 = arith.truncf %47 : vector<4x8xf32> to vector<4x8xbf16>
    %c0_22 = arith.constant 0 : index
    %c0_23 = arith.constant 0 : index
    %c8 = arith.constant 8 : index
    %49 = vector.load %arg4[%c0_22, %c0_23, %c8] : memref<1x4x32xbf16, #tpu.memory_space<vmem>>, vector<1x4x8xbf16>
    %50 = vector.shape_cast %49 : vector<1x4x8xbf16> to vector<4x8xbf16>
    %51 = vector.shape_cast %48 : vector<4x8xbf16> to vector<1x4x8xbf16>
    tpu.vector_store %arg4[%c0_22, %c0_23, %c8], %51 {strides = array<i32>} : memref<1x4x32xbf16, #tpu.memory_space<vmem>>, vector<1x4x8xbf16>,
    %52 = vector.extract_strided_slice %1 {offsets = [0, 16], sizes = [4, 8], strides = [1, 1]} : vector<4x32xbf16> to vector<4x8xbf16>
    %53 = vector.extract_strided_slice %3 {offsets = [0, 16], sizes = [4, 8], strides = [1, 1]} : vector<4x32xbf16> to vector<4x8xbf16>
    %54 = vector.extract_strided_slice %5 {offsets = [0, 16], sizes = [4, 8], strides = [1, 1]} : vector<4x32xbf16> to vector<4x8xbf16>
    %cst_24 = arith.constant dense<0.000000e+00> : vector<4x4xf32>
    %55 = tpu.matmul %52, %53, %cst_24 {dimension_numbers = #tpu.dot_dimension_numbers<[1], [1], [0], [0], [0, 0, 1, 0], [], []>} : vector<4x8xbf16>, vector<4x8xbf16>, vector<4x4xf32> -> vector<4x4xf32>
    %56 = vector.broadcast %7 : vector<1x4xf32> to vector<4x4xf32>
    %57 = arith.addf %55, %56 : vector<4x4xf32>
    %cst_25 = arith.constant dense<0xFF800000> : vector<4xf32>
    %58 = vector.multi_reduction <maximumf>, %57, %cst_25 [1] : vector<4x4xf32> to vector<4xf32>
    %59 = vector.shape_cast %58 : vector<4xf32> to vector<4x1xf32>
    %60 = vector.broadcast %59 : vector<4x1xf32> to vector<4x4xf32>
    %61 = arith.subf %57, %60 : vector<4x4xf32>
    %62 = math.exp %61 : vector<4x4xf32>
    %cst_26 = arith.constant dense<0.000000e+00> : vector<4xf32>
    %63 = vector.multi_reduction <add>, %62, %cst_26 [1] : vector<4x4xf32> to vector<4xf32>
    %64 = vector.shape_cast %63 : vector<4xf32> to vector<4x1xf32>
    %65 = tpu.reciprocal %64 {approx = true} : vector<4x1xf32> -> vector<4x1xf32>
    %66 = arith.truncf %62 : vector<4x4xf32> to vector<4x4xbf16>
    %cst_27 = arith.constant dense<0.000000e+00> : vector<4x8xf32>
    %67 = tpu.matmul %66, %54, %cst_27 {dimension_numbers = #tpu.dot_dimension_numbers<[1], [0], [0], [1], [0, 0, 1, 1], [], []>} : vector<4x4xbf16>, vector<4x8xbf16>, vector<4x8xf32> -> vector<4x8xf32>
    %68 = vector.broadcast %65 : vector<4x1xf32> to vector<4x8xf32>
    %69 = arith.mulf %67, %68 : vector<4x8xf32>
    %70 = arith.truncf %69 : vector<4x8xf32> to vector<4x8xbf16>
    %c0_28 = arith.constant 0 : index
    %c0_29 = arith.constant 0 : index
    %c16 = arith.constant 16 : index
    %71 = vector.load %arg4[%c0_28, %c0_29, %c16] : memref<1x4x32xbf16, #tpu.memory_space<vmem>>, vector<1x4x8xbf16>
    %72 = vector.shape_cast %71 : vector<1x4x8xbf16> to vector<4x8xbf16>
    %73 = vector.shape_cast %70 : vector<4x8xbf16> to vector<1x4x8xbf16>
    tpu.vector_store %arg4[%c0_28, %c0_29, %c16], %73 {strides = array<i32>} : memref<1x4x32xbf16, #tpu.memory_space<vmem>>, vector<1x4x8xbf16>,
    %74 = vector.extract_strided_slice %1 {offsets = [0, 24], sizes = [4, 8], strides = [1, 1]} : vector<4x32xbf16> to vector<4x8xbf16>
    %75 = vector.extract_strided_slice %3 {offsets = [0, 24], sizes = [4, 8], strides = [1, 1]} : vector<4x32xbf16> to vector<4x8xbf16>
    %76 = vector.extract_strided_slice %5 {offsets = [0, 24], sizes = [4, 8], strides = [1, 1]} : vector<4x32xbf16> to vector<4x8xbf16>
    %cst_30 = arith.constant dense<0.000000e+00> : vector<4x4xf32>
    %77 = tpu.matmul %74, %75, %cst_30 {dimension_numbers = #tpu.dot_dimension_numbers<[1], [1], [0], [0], [0, 0, 1, 0], [], []>} : vector<4x8xbf16>, vector<4x8xbf16>, vector<4x4xf32> -> vector<4x4xf32>
    %78 = vector.broadcast %7 : vector<1x4xf32> to vector<4x4xf32>
    %79 = arith.addf %77, %78 : vector<4x4xf32>
    %cst_31 = arith.constant dense<0xFF800000> : vector<4xf32>
    %80 = vector.multi_reduction <maximumf>, %79, %cst_31 [1] : vector<4x4xf32> to vector<4xf32>
    %81 = vector.shape_cast %80 : vector<4xf32> to vector<4x1xf32>
    %82 = vector.broadcast %81 : vector<4x1xf32> to vector<4x4xf32>
    %83 = arith.subf %79, %82 : vector<4x4xf32>
    %84 = math.exp %83 : vector<4x4xf32>
    %cst_32 = arith.constant dense<0.000000e+00> : vector<4xf32>
    %85 = vector.multi_reduction <add>, %84, %cst_32 [1] : vector<4x4xf32> to vector<4xf32>
    %86 = vector.shape_cast %85 : vector<4xf32> to vector<4x1xf32>
    %87 = tpu.reciprocal %86 {approx = true} : vector<4x1xf32> -> vector<4x1xf32>
    %88 = arith.truncf %84 : vector<4x4xf32> to vector<4x4xbf16>
    %cst_33 = arith.constant dense<0.000000e+00> : vector<4x8xf32>
    %89 = tpu.matmul %88, %76, %cst_33 {dimension_numbers = #tpu.dot_dimension_numbers<[1], [0], [0], [1], [0, 0, 1, 1], [], []>} : vector<4x4xbf16>, vector<4x8xbf16>, vector<4x8xf32> -> vector<4x8xf32>
    %90 = vector.broadcast %87 : vector<4x1xf32> to vector<4x8xf32>
    %91 = arith.mulf %89, %90 : vector<4x8xf32>
    %92 = arith.truncf %91 : vector<4x8xf32> to vector<4x8xbf16>
    %c0_34 = arith.constant 0 : index
    %c0_35 = arith.constant 0 : index
    %c24 = arith.constant 24 : index
    %93 = vector.load %arg4[%c0_34, %c0_35, %c24] : memref<1x4x32xbf16, #tpu.memory_space<vmem>>, vector<1x4x8xbf16>
    %94 = vector.shape_cast %93 : vector<1x4x8xbf16> to vector<4x8xbf16>
    %95 = vector.shape_cast %92 : vector<4x8xbf16> to vector<1x4x8xbf16>
    tpu.vector_store %arg4[%c0_34, %c0_35, %c24], %95 {strides = array<i32>} : memref<1x4x32xbf16, #tpu.memory_space<vmem>>, vector<1x4x8xbf16>,
    return
  }
  func.func @transform_0(%arg0: i32, %arg1: i32) -> (i32, i32, i32, i32) {
    %c0_i32 = arith.constant 0 : i32
    %c0_i32_0 = arith.constant 0 : i32
    %c0_i32_1 = arith.constant 0 : i32
    return %c0_i32, %arg0, %c0_i32_0, %arg1 : i32, i32, i32, i32
  }
  func.func @transform_1(%arg0: i32, %arg1: i32) -> (i32, i32, i32) {
    %c0_i32 = arith.constant 0 : i32
    %c0_i32_0 = arith.constant 0 : i32
    %c0_i32_1 = arith.constant 0 : i32
    return %arg0, %c0_i32, %c0_i32_0 : i32, i32, i32
  }
  func.func @transform_2(%arg0: i32, %arg1: i32) -> (i32, i32, i32) {
    %c0_i32 = arith.constant 0 : i32
    %c0_i32_0 = arith.constant 0 : i32
    return %arg0, %c0_i32, %arg1 : i32, i32, i32
  }
}

module attributes {stable_mosaic.version = 11 : i64} {
  func.func @_dense_resident_kernel(%arg0: i32, %arg1: memref<8x32xbf16, #tpu.memory_space<vmem>>, %arg2: memref<32x32xbf16, #tpu.memory_space<vmem>>, %arg3: memref<1x32xf32, #tpu.memory_space<vmem>>, %arg4: memref<8x32xbf16, #tpu.memory_space<vmem>>, %arg5: memref<8x32xbf16, #tpu.memory_space<vmem>>) attributes {dimension_semantics = [#tpu.dimension_semantics<parallel>], iteration_bounds = array<i64: 1>, scalar_prefetch = 0 : i64, scratch_operands = 0 : i64, tpu.core_type = #tpu.core_type<tc>, window_params = [{transform_indices = @transform_0, window_bounds = array<i64: 8, 32>}, {pipeline_mode = #tpu.pipeline_mode<synchronous>, transform_indices = @transform_1, window_bounds = array<i64: 32, 32>}, {pipeline_mode = #tpu.pipeline_mode<synchronous>, transform_indices = @transform_2, window_bounds = array<i64: 1, 32>}, {transform_indices = @transform_3, window_bounds = array<i64: 8, 32>}, {transform_indices = @transform_4, window_bounds = array<i64: 8, 32>}]} {
    %c0 = arith.constant 0 : index
    %c0_0 = arith.constant 0 : index
    %0 = vector.load %arg1[%c0, %c0_0] : memref<8x32xbf16, #tpu.memory_space<vmem>>, vector<8x32xbf16>
    %c0_1 = arith.constant 0 : index
    %c0_2 = arith.constant 0 : index
    %1 = vector.load %arg2[%c0_1, %c0_2] : memref<32x32xbf16, #tpu.memory_space<vmem>>, vector<32x32xbf16>
    %cst = arith.constant dense<0.000000e+00> : vector<8x32xf32>
    %2 = tpu.matmul %0, %1, %cst {dimension_numbers = #tpu.dot_dimension_numbers<[1], [0], [0], [1], [0, 0, 1, 1], [], []>} : vector<8x32xbf16>, vector<32x32xbf16>, vector<8x32xf32> -> vector<8x32xf32>
    %c0_3 = arith.constant 0 : index
    %c0_4 = arith.constant 0 : index
    %3 = vector.load %arg3[%c0_3, %c0_4] : memref<1x32xf32, #tpu.memory_space<vmem>>, vector<1x32xf32>
    %4 = vector.broadcast %3 : vector<1x32xf32> to vector<8x32xf32>
    %5 = arith.addf %2, %4 : vector<8x32xf32>
    %c0_5 = arith.constant 0 : index
    %c0_6 = arith.constant 0 : index
    %6 = vector.load %arg4[%c0_5, %c0_6] : memref<8x32xbf16, #tpu.memory_space<vmem>>, vector<8x32xbf16>
    %7 = arith.extf %6 : vector<8x32xbf16> to vector<8x32xf32>
    %8 = arith.addf %5, %7 : vector<8x32xf32>
    %9 = arith.truncf %8 : vector<8x32xf32> to vector<8x32xbf16>
    %c0_7 = arith.constant 0 : index
    %c0_8 = arith.constant 0 : index
    %10 = vector.load %arg5[%c0_7, %c0_8] : memref<8x32xbf16, #tpu.memory_space<vmem>>, vector<8x32xbf16>
    tpu.vector_store %arg5[%c0_7, %c0_8], %9 {strides = array<i32>} : memref<8x32xbf16, #tpu.memory_space<vmem>>, vector<8x32xbf16>,
    return
  }
  func.func @transform_0(%arg0: i32) -> (i32, i32) {
    %c0_i32 = arith.constant 0 : i32
    %c0_i32_0 = arith.constant 0 : i32
    return %arg0, %c0_i32 : i32, i32
  }
  func.func @transform_1(%arg0: i32) -> (i32, i32) {
    %c0_i32 = arith.constant 0 : i32
    %c0_i32_0 = arith.constant 0 : i32
    %c0_i32_1 = arith.constant 0 : i32
    return %c0_i32, %c0_i32_0 : i32, i32
  }
  func.func @transform_2(%arg0: i32) -> (i32, i32) {
    %c0_i32 = arith.constant 0 : i32
    %c0_i32_0 = arith.constant 0 : i32
    %c0_i32_1 = arith.constant 0 : i32
    return %c0_i32, %c0_i32_0 : i32, i32
  }
  func.func @transform_3(%arg0: i32) -> (i32, i32) {
    %c0_i32 = arith.constant 0 : i32
    %c0_i32_0 = arith.constant 0 : i32
    return %arg0, %c0_i32 : i32, i32
  }
  func.func @transform_4(%arg0: i32) -> (i32, i32) {
    %c0_i32 = arith.constant 0 : i32
    %c0_i32_0 = arith.constant 0 : i32
    return %arg0, %c0_i32 : i32, i32
  }
}

module attributes {stable_mosaic.version = 11 : i64} {
  func.func @_ln_kernel(%arg0: i32, %arg1: memref<8x32xbf16, #tpu.memory_space<vmem>>, %arg2: memref<1x32xf32, #tpu.memory_space<vmem>>, %arg3: memref<1x32xf32, #tpu.memory_space<vmem>>, %arg4: memref<8x32xbf16, #tpu.memory_space<vmem>>) attributes {dimension_semantics = [#tpu.dimension_semantics<parallel>], iteration_bounds = array<i64: 1>, scalar_prefetch = 0 : i64, scratch_operands = 0 : i64, tpu.core_type = #tpu.core_type<tc>, window_params = [{transform_indices = @transform_0, window_bounds = array<i64: 8, 32>}, {pipeline_mode = #tpu.pipeline_mode<synchronous>, transform_indices = @transform_1, window_bounds = array<i64: 1, 32>}, {pipeline_mode = #tpu.pipeline_mode<synchronous>, transform_indices = @transform_2, window_bounds = array<i64: 1, 32>}, {transform_indices = @transform_3, window_bounds = array<i64: 8, 32>}]} {
    %c0 = arith.constant 0 : index
    %c0_0 = arith.constant 0 : index
    %0 = vector.load %arg1[%c0, %c0_0] : memref<8x32xbf16, #tpu.memory_space<vmem>>, vector<8x32xbf16>
    %1 = arith.extf %0 : vector<8x32xbf16> to vector<8x32xf32>
    %cst = arith.constant dense<0.000000e+00> : vector<8xf32>
    %2 = vector.multi_reduction <add>, %1, %cst [1] : vector<8x32xf32> to vector<8xf32>
    %3 = vector.shape_cast %2 : vector<8xf32> to vector<8x1xf32>
    %cst_1 = arith.constant 3.200000e+01 : f32
    %4 = vector.broadcast %cst_1 : f32 to vector<8x1xf32>
    %5 = arith.divf %3, %4 : vector<8x1xf32>
    %6 = vector.broadcast %5 : vector<8x1xf32> to vector<8x32xf32>
    %7 = arith.subf %1, %6 : vector<8x32xf32>
    %8 = arith.mulf %7, %7 : vector<8x32xf32>
    %cst_2 = arith.constant dense<0.000000e+00> : vector<8xf32>
    %9 = vector.multi_reduction <add>, %8, %cst_2 [1] : vector<8x32xf32> to vector<8xf32>
    %10 = vector.shape_cast %9 : vector<8xf32> to vector<8x1xf32>
    %cst_3 = arith.constant 3.200000e+01 : f32
    %11 = vector.broadcast %cst_3 : f32 to vector<8x1xf32>
    %12 = arith.divf %10, %11 : vector<8x1xf32>
    %cst_4 = arith.constant 9.99999997E-7 : f32
    %13 = vector.broadcast %cst_4 : f32 to vector<8x1xf32>
    %14 = arith.addf %12, %13 : vector<8x1xf32>
    %15 = math.rsqrt %14 : vector<8x1xf32>
    %16 = vector.broadcast %15 : vector<8x1xf32> to vector<8x32xf32>
    %17 = arith.mulf %7, %16 : vector<8x32xf32>
    %c0_5 = arith.constant 0 : index
    %c0_6 = arith.constant 0 : index
    %18 = vector.load %arg2[%c0_5, %c0_6] : memref<1x32xf32, #tpu.memory_space<vmem>>, vector<1x32xf32>
    %19 = vector.broadcast %18 : vector<1x32xf32> to vector<8x32xf32>
    %20 = arith.mulf %17, %19 : vector<8x32xf32>
    %c0_7 = arith.constant 0 : index
    %c0_8 = arith.constant 0 : index
    %21 = vector.load %arg3[%c0_7, %c0_8] : memref<1x32xf32, #tpu.memory_space<vmem>>, vector<1x32xf32>
    %22 = vector.broadcast %21 : vector<1x32xf32> to vector<8x32xf32>
    %23 = arith.addf %20, %22 : vector<8x32xf32>
    %24 = arith.truncf %23 : vector<8x32xf32> to vector<8x32xbf16>
    %c0_9 = arith.constant 0 : index
    %c0_10 = arith.constant 0 : index
    %25 = vector.load %arg4[%c0_9, %c0_10] : memref<8x32xbf16, #tpu.memory_space<vmem>>, vector<8x32xbf16>
    tpu.vector_store %arg4[%c0_9, %c0_10], %24 {strides = array<i32>} : memref<8x32xbf16, #tpu.memory_space<vmem>>, vector<8x32xbf16>,
    return
  }
  func.func @transform_0(%arg0: i32) -> (i32, i32) {
    %c0_i32 = arith.constant 0 : i32
    %c0_i32_0 = arith.constant 0 : i32
    return %arg0, %c0_i32 : i32, i32
  }
  func.func @transform_1(%arg0: i32) -> (i32, i32) {
    %c0_i32 = arith.constant 0 : i32
    %c0_i32_0 = arith.constant 0 : i32
    %c0_i32_1 = arith.constant 0 : i32
    return %c0_i32, %c0_i32_0 : i32, i32
  }
  func.func @transform_2(%arg0: i32) -> (i32, i32) {
    %c0_i32 = arith.constant 0 : i32
    %c0_i32_0 = arith.constant 0 : i32
    %c0_i32_1 = arith.constant 0 : i32
    return %c0_i32, %c0_i32_0 : i32, i32
  }
  func.func @transform_3(%arg0: i32) -> (i32, i32) {
    %c0_i32 = arith.constant 0 : i32
    %c0_i32_0 = arith.constant 0 : i32
    return %arg0, %c0_i32 : i32, i32
  }
}

module attributes {stable_mosaic.version = 11 : i64} {
  func.func @_dense_resident_kernel(%arg0: i32, %arg1: memref<8x32xbf16, #tpu.memory_space<vmem>>, %arg2: memref<32x64xbf16, #tpu.memory_space<vmem>>, %arg3: memref<1x64xf32, #tpu.memory_space<vmem>>, %arg4: memref<8x64xbf16, #tpu.memory_space<vmem>>) attributes {dimension_semantics = [#tpu.dimension_semantics<parallel>], iteration_bounds = array<i64: 1>, scalar_prefetch = 0 : i64, scratch_operands = 0 : i64, tpu.core_type = #tpu.core_type<tc>, window_params = [{transform_indices = @transform_0, window_bounds = array<i64: 8, 32>}, {pipeline_mode = #tpu.pipeline_mode<synchronous>, transform_indices = @transform_1, window_bounds = array<i64: 32, 64>}, {pipeline_mode = #tpu.pipeline_mode<synchronous>, transform_indices = @transform_2, window_bounds = array<i64: 1, 64>}, {transform_indices = @transform_3, window_bounds = array<i64: 8, 64>}]} {
    %c0 = arith.constant 0 : index
    %c0_0 = arith.constant 0 : index
    %0 = vector.load %arg1[%c0, %c0_0] : memref<8x32xbf16, #tpu.memory_space<vmem>>, vector<8x32xbf16>
    %c0_1 = arith.constant 0 : index
    %c0_2 = arith.constant 0 : index
    %1 = vector.load %arg2[%c0_1, %c0_2] : memref<32x64xbf16, #tpu.memory_space<vmem>>, vector<32x64xbf16>
    %cst = arith.constant dense<0.000000e+00> : vector<8x64xf32>
    %2 = tpu.matmul %0, %1, %cst {dimension_numbers = #tpu.dot_dimension_numbers<[1], [0], [0], [1], [0, 0, 1, 1], [], []>} : vector<8x32xbf16>, vector<32x64xbf16>, vector<8x64xf32> -> vector<8x64xf32>
    %c0_3 = arith.constant 0 : index
    %c0_4 = arith.constant 0 : index
    %3 = vector.load %arg3[%c0_3, %c0_4] : memref<1x64xf32, #tpu.memory_space<vmem>>, vector<1x64xf32>
    %4 = vector.broadcast %3 : vector<1x64xf32> to vector<8x64xf32>
    %5 = arith.addf %2, %4 : vector<8x64xf32>
    %cst_5 = arith.constant 5.000000e-01 : f32
    %6 = vector.broadcast %cst_5 : f32 to vector<8x64xf32>
    %7 = arith.mulf %6, %5 : vector<8x64xf32>
    %cst_6 = arith.constant 4.471500e-02 : f32
    %8 = vector.broadcast %cst_6 : f32 to vector<8x64xf32>
    %9 = arith.mulf %8, %5 : vector<8x64xf32>
    %10 = arith.mulf %9, %5 : vector<8x64xf32>
    %11 = arith.mulf %10, %5 : vector<8x64xf32>
    %12 = arith.addf %5, %11 : vector<8x64xf32>
    %cst_7 = arith.constant 0.797884583 : f32
    %13 = vector.broadcast %cst_7 : f32 to vector<8x64xf32>
    %14 = arith.mulf %13, %12 : vector<8x64xf32>
    %15 = math.tanh %14 : vector<8x64xf32>
    %cst_8 = arith.constant 1.000000e+00 : f32
    %16 = vector.broadcast %cst_8 : f32 to vector<8x64xf32>
    %17 = arith.addf %16, %15 : vector<8x64xf32>
    %18 = arith.mulf %7, %17 : vector<8x64xf32>
    %19 = arith.truncf %18 : vector<8x64xf32> to vector<8x64xbf16>
    %c0_9 = arith.constant 0 : index
    %c0_10 = arith.constant 0 : index
    %20 = vector.load %arg4[%c0_9, %c0_10] : memref<8x64xbf16, #tpu.memory_space<vmem>>, vector<8x64xbf16>
    tpu.vector_store %arg4[%c0_9, %c0_10], %19 {strides = array<i32>} : memref<8x64xbf16, #tpu.memory_space<vmem>>, vector<8x64xbf16>,
    return
  }
  func.func @transform_0(%arg0: i32) -> (i32, i32) {
    %c0_i32 = arith.constant 0 : i32
    %c0_i32_0 = arith.constant 0 : i32
    return %arg0, %c0_i32 : i32, i32
  }
  func.func @transform_1(%arg0: i32) -> (i32, i32) {
    %c0_i32 = arith.constant 0 : i32
    %c0_i32_0 = arith.constant 0 : i32
    %c0_i32_1 = arith.constant 0 : i32
    return %c0_i32, %c0_i32_0 : i32, i32
  }
  func.func @transform_2(%arg0: i32) -> (i32, i32) {
    %c0_i32 = arith.constant 0 : i32
    %c0_i32_0 = arith.constant 0 : i32
    %c0_i32_1 = arith.constant 0 : i32
    return %c0_i32, %c0_i32_0 : i32, i32
  }
  func.func @transform_3(%arg0: i32) -> (i32, i32) {
    %c0_i32 = arith.constant 0 : i32
    %c0_i32_0 = arith.constant 0 : i32
    return %arg0, %c0_i32 : i32, i32
  }
}

module attributes {stable_mosaic.version = 11 : i64} {
  func.func @_dense_resident_kernel(%arg0: i32, %arg1: memref<8x64xbf16, #tpu.memory_space<vmem>>, %arg2: memref<64x32xbf16, #tpu.memory_space<vmem>>, %arg3: memref<1x32xf32, #tpu.memory_space<vmem>>, %arg4: memref<8x32xbf16, #tpu.memory_space<vmem>>, %arg5: memref<8x32xbf16, #tpu.memory_space<vmem>>) attributes {dimension_semantics = [#tpu.dimension_semantics<parallel>], iteration_bounds = array<i64: 1>, scalar_prefetch = 0 : i64, scratch_operands = 0 : i64, tpu.core_type = #tpu.core_type<tc>, window_params = [{transform_indices = @transform_0, window_bounds = array<i64: 8, 64>}, {pipeline_mode = #tpu.pipeline_mode<synchronous>, transform_indices = @transform_1, window_bounds = array<i64: 64, 32>}, {pipeline_mode = #tpu.pipeline_mode<synchronous>, transform_indices = @transform_2, window_bounds = array<i64: 1, 32>}, {transform_indices = @transform_3, window_bounds = array<i64: 8, 32>}, {transform_indices = @transform_4, window_bounds = array<i64: 8, 32>}]} {
    %c0 = arith.constant 0 : index
    %c0_0 = arith.constant 0 : index
    %0 = vector.load %arg1[%c0, %c0_0] : memref<8x64xbf16, #tpu.memory_space<vmem>>, vector<8x64xbf16>
    %c0_1 = arith.constant 0 : index
    %c0_2 = arith.constant 0 : index
    %1 = vector.load %arg2[%c0_1, %c0_2] : memref<64x32xbf16, #tpu.memory_space<vmem>>, vector<64x32xbf16>
    %cst = arith.constant dense<0.000000e+00> : vector<8x32xf32>
    %2 = tpu.matmul %0, %1, %cst {dimension_numbers = #tpu.dot_dimension_numbers<[1], [0], [0], [1], [0, 0, 1, 1], [], []>} : vector<8x64xbf16>, vector<64x32xbf16>, vector<8x32xf32> -> vector<8x32xf32>
    %c0_3 = arith.constant 0 : index
    %c0_4 = arith.constant 0 : index
    %3 = vector.load %arg3[%c0_3, %c0_4] : memref<1x32xf32, #tpu.memory_space<vmem>>, vector<1x32xf32>
    %4 = vector.broadcast %3 : vector<1x32xf32> to vector<8x32xf32>
    %5 = arith.addf %2, %4 : vector<8x32xf32>
    %c0_5 = arith.constant 0 : index
    %c0_6 = arith.constant 0 : index
    %6 = vector.load %arg4[%c0_5, %c0_6] : memref<8x32xbf16, #tpu.memory_space<vmem>>, vector<8x32xbf16>
    %7 = arith.extf %6 : vector<8x32xbf16> to vector<8x32xf32>
    %8 = arith.addf %5, %7 : vector<8x32xf32>
    %9 = arith.truncf %8 : vector<8x32xf32> to vector<8x32xbf16>
    %c0_7 = arith.constant 0 : index
    %c0_8 = arith.constant 0 : index
    %10 = vector.load %arg5[%c0_7, %c0_8] : memref<8x32xbf16, #tpu.memory_space<vmem>>, vector<8x32xbf16>
    tpu.vector_store %arg5[%c0_7, %c0_8], %9 {strides = array<i32>} : memref<8x32xbf16, #tpu.memory_space<vmem>>, vector<8x32xbf16>,
    return
  }
  func.func @transform_0(%arg0: i32) -> (i32, i32) {
    %c0_i32 = arith.constant 0 : i32
    %c0_i32_0 = arith.constant 0 : i32
    return %arg0, %c0_i32 : i32, i32
  }
  func.func @transform_1(%arg0: i32) -> (i32, i32) {
    %c0_i32 = arith.constant 0 : i32
    %c0_i32_0 = arith.constant 0 : i32
    %c0_i32_1 = arith.constant 0 : i32
    return %c0_i32, %c0_i32_0 : i32, i32
  }
  func.func @transform_2(%arg0: i32) -> (i32, i32) {
    %c0_i32 = arith.constant 0 : i32
    %c0_i32_0 = arith.constant 0 : i32
    %c0_i32_1 = arith.constant 0 : i32
    return %c0_i32, %c0_i32_0 : i32, i32
  }
  func.func @transform_3(%arg0: i32) -> (i32, i32) {
    %c0_i32 = arith.constant 0 : i32
    %c0_i32_0 = arith.constant 0 : i32
    return %arg0, %c0_i32 : i32, i32
  }
  func.func @transform_4(%arg0: i32) -> (i32, i32) {
    %c0_i32 = arith.constant 0 : i32
    %c0_i32_0 = arith.constant 0 : i32
    return %arg0, %c0_i32 : i32, i32
  }
}

module attributes {stable_mosaic.version = 11 : i64} {
  func.func @_ln_score_kernel(%arg0: i32, %arg1: memref<8x32xbf16, #tpu.memory_space<vmem>>, %arg2: memref<1x32xf32, #tpu.memory_space<vmem>>, %arg3: memref<1x32xf32, #tpu.memory_space<vmem>>, %arg4: memref<32x128xbf16, #tpu.memory_space<vmem>>, %arg5: memref<1x128xf32, #tpu.memory_space<vmem>>, %arg6: memref<8x1xf32, #tpu.memory_space<vmem>>, %arg7: memref<8x128xf32, #tpu.memory_space<vmem>>) attributes {dimension_semantics = [#tpu.dimension_semantics<parallel>], iteration_bounds = array<i64: 1>, scalar_prefetch = 0 : i64, scratch_operands = 0 : i64, tpu.core_type = #tpu.core_type<tc>, window_params = [{transform_indices = @transform_0, window_bounds = array<i64: 8, 32>}, {pipeline_mode = #tpu.pipeline_mode<synchronous>, transform_indices = @transform_1, window_bounds = array<i64: 1, 32>}, {pipeline_mode = #tpu.pipeline_mode<synchronous>, transform_indices = @transform_2, window_bounds = array<i64: 1, 32>}, {pipeline_mode = #tpu.pipeline_mode<synchronous>, transform_indices = @transform_3, window_bounds = array<i64: 32, 128>}, {pipeline_mode = #tpu.pipeline_mode<synchronous>, transform_indices = @transform_4, window_bounds = array<i64: 1, 128>}, {transform_indices = @transform_5, window_bounds = array<i64: 8, 1>}, {transform_indices = @transform_6, window_bounds = array<i64: 8, 128>}]} {
    %c0 = arith.constant 0 : index
    %c0_0 = arith.constant 0 : index
    %0 = vector.load %arg1[%c0, %c0_0] : memref<8x32xbf16, #tpu.memory_space<vmem>>, vector<8x32xbf16>
    %1 = arith.extf %0 : vector<8x32xbf16> to vector<8x32xf32>
    %cst = arith.constant dense<0.000000e+00> : vector<8xf32>
    %2 = vector.multi_reduction <add>, %1, %cst [1] : vector<8x32xf32> to vector<8xf32>
    %3 = vector.shape_cast %2 : vector<8xf32> to vector<8x1xf32>
    %cst_1 = arith.constant 3.200000e+01 : f32
    %4 = vector.broadcast %cst_1 : f32 to vector<8x1xf32>
    %5 = arith.divf %3, %4 : vector<8x1xf32>
    %6 = vector.broadcast %5 : vector<8x1xf32> to vector<8x32xf32>
    %7 = arith.subf %1, %6 : vector<8x32xf32>
    %8 = arith.mulf %7, %7 : vector<8x32xf32>
    %cst_2 = arith.constant dense<0.000000e+00> : vector<8xf32>
    %9 = vector.multi_reduction <add>, %8, %cst_2 [1] : vector<8x32xf32> to vector<8xf32>
    %10 = vector.shape_cast %9 : vector<8xf32> to vector<8x1xf32>
    %cst_3 = arith.constant 3.200000e+01 : f32
    %11 = vector.broadcast %cst_3 : f32 to vector<8x1xf32>
    %12 = arith.divf %10, %11 : vector<8x1xf32>
    %cst_4 = arith.constant 9.99999997E-7 : f32
    %13 = vector.broadcast %cst_4 : f32 to vector<8x1xf32>
    %14 = arith.addf %12, %13 : vector<8x1xf32>
    %15 = math.rsqrt %14 : vector<8x1xf32>
    %16 = vector.broadcast %15 : vector<8x1xf32> to vector<8x32xf32>
    %17 = arith.mulf %7, %16 : vector<8x32xf32>
    %c0_5 = arith.constant 0 : index
    %c0_6 = arith.constant 0 : index
    %18 = vector.load %arg2[%c0_5, %c0_6] : memref<1x32xf32, #tpu.memory_space<vmem>>, vector<1x32xf32>
    %19 = vector.broadcast %18 : vector<1x32xf32> to vector<8x32xf32>
    %20 = arith.mulf %17, %19 : vector<8x32xf32>
    %c0_7 = arith.constant 0 : index
    %c0_8 = arith.constant 0 : index
    %21 = vector.load %arg3[%c0_7, %c0_8] : memref<1x32xf32, #tpu.memory_space<vmem>>, vector<1x32xf32>
    %22 = vector.broadcast %21 : vector<1x32xf32> to vector<8x32xf32>
    %23 = arith.addf %20, %22 : vector<8x32xf32>
    %24 = arith.truncf %23 : vector<8x32xf32> to vector<8x32xbf16>
    %c0_9 = arith.constant 0 : index
    %c0_10 = arith.constant 0 : index
    %25 = vector.load %arg4[%c0_9, %c0_10] : memref<32x128xbf16, #tpu.memory_space<vmem>>, vector<32x128xbf16>
    %cst_11 = arith.constant dense<0.000000e+00> : vector<8x128xf32>
    %26 = tpu.matmul %24, %25, %cst_11 {dimension_numbers = #tpu.dot_dimension_numbers<[1], [0], [0], [1], [0, 0, 1, 1], [], []>} : vector<8x32xbf16>, vector<32x128xbf16>, vector<8x128xf32> -> vector<8x128xf32>
    %c0_12 = arith.constant 0 : index
    %c0_13 = arith.constant 0 : index
    %27 = vector.load %arg5[%c0_12, %c0_13] : memref<1x128xf32, #tpu.memory_space<vmem>>, vector<1x128xf32>
    %28 = vector.broadcast %27 : vector<1x128xf32> to vector<8x128xf32>
    %29 = arith.addf %26, %28 : vector<8x128xf32>
    %cst_14 = arith.constant 0.000000e+00 : f32
    %30 = vector.broadcast %cst_14 : f32 to vector<8x128xf32>
    %31 = arith.subf %30, %29 : vector<8x128xf32>
    %32 = math.exp %31 : vector<8x128xf32>
    %cst_15 = arith.constant 1.000000e+00 : f32
    %33 = vector.broadcast %cst_15 : f32 to vector<8x128xf32>
    %34 = arith.addf %33, %32 : vector<8x128xf32>
    %cst_16 = arith.constant 1.000000e+00 : f32
    %35 = vector.broadcast %cst_16 : f32 to vector<8x128xf32>
    %36 = arith.divf %35, %34 : vector<8x128xf32>
    %c0_17 = arith.constant 0 : index
    %c0_18 = arith.constant 0 : index
    %37 = vector.load %arg6[%c0_17, %c0_18] : memref<8x1xf32, #tpu.memory_space<vmem>>, vector<8x1xf32>
    %38 = vector.broadcast %37 : vector<8x1xf32> to vector<8x128xf32>
    %39 = arith.mulf %36, %38 : vector<8x128xf32>
    %c0_19 = arith.constant 0 : index
    %c0_20 = arith.constant 0 : index
    %40 = vector.load %arg7[%c0_19, %c0_20] : memref<8x128xf32, #tpu.memory_space<vmem>>, vector<8x128xf32>
    tpu.vector_store %arg7[%c0_19, %c0_20], %39 {strides = array<i32>} : memref<8x128xf32, #tpu.memory_space<vmem>>, vector<8x128xf32>,
    return
  }
  func.func @transform_0(%arg0: i32) -> (i32, i32) {
    %c0_i32 = arith.constant 0 : i32
    %c0_i32_0 = arith.constant 0 : i32
    return %arg0, %c0_i32 : i32, i32
  }
  func.func @transform_1(%arg0: i32) -> (i32, i32) {
    %c0_i32 = arith.constant 0 : i32
    %c0_i32_0 = arith.constant 0 : i32
    %c0_i32_1 = arith.constant 0 : i32
    return %c0_i32, %c0_i32_0 : i32, i32
  }
  func.func @transform_2(%arg0: i32) -> (i32, i32) {
    %c0_i32 = arith.constant 0 : i32
    %c0_i32_0 = arith.constant 0 : i32
    %c0_i32_1 = arith.constant 0 : i32
    return %c0_i32, %c0_i32_0 : i32, i32
  }
  func.func @transform_3(%arg0: i32) -> (i32, i32) {
    %c0_i32 = arith.constant 0 : i32
    %c0_i32_0 = arith.constant 0 : i32
    %c0_i32_1 = arith.constant 0 : i32
    return %c0_i32, %c0_i32_0 : i32, i32
  }
  func.func @transform_4(%arg0: i32) -> (i32, i32) {
    %c0_i32 = arith.constant 0 : i32
    %c0_i32_0 = arith.constant 0 : i32
    %c0_i32_1 = arith.constant 0 : i32
    return %c0_i32, %c0_i32_0 : i32, i32
  }
  func.func @transform_5(%arg0: i32) -> (i32, i32) {
    %c0_i32 = arith.constant 0 : i32
    %c0_i32_0 = arith.constant 0 : i32
    return %arg0, %c0_i32 : i32, i32
  }
  func.func @transform_6(%arg0: i32) -> (i32, i32) {
    %c0_i32 = arith.constant 0 : i32
    %c0_i32_0 = arith.constant 0 : i32
    return %arg0, %c0_i32 : i32, i32
  }
}

</mosaic_0001>

<bundles_post_ra>
// kernel: ext_summarizer_forward.25
= control target key start
LH: loop header
LB: loop body
LE: loop exit
PB: predicated region body
PF: predicated region fallthrough
CT: control target
= control target key end

     0   :  { %vm18_vm0 = vcmask 261120   ;;  %vm110_vm1 = vcmask 257024   ;;  %s199_s0 = inlined_call_operand.vmem [shape: f32[32,32], index: 0, kind: input, shape index: {}]   ;;  %s200_s1 = inlined_call_operand.vmem [shape: f32[1,32], index: 1, kind: input, shape index: {}]   ;;  %s201_s2 = inlined_call_operand.vmem [shape: f32[1,32], index: 2, kind: input, shape index: {}]   ;;  %s202_s3 = inlined_call_operand.vmem [shape: bf16[32,32], index: 3, kind: output, shape index: {}]  }
   0x1   :  { %v14_v0 = vld [vmem:[%s199_s0] sm:$0xff]  ;;  %v16_v1 = vld [vmem:[%s199_s0 + $0x10] sm:$0xff]  ;;  %v15_v2 = vld [vmem:[%s199_s0 + $0x8] sm:$0xff] }
   0x2   :  { %v19_v3 = vsel %vm18_vm0, %v14_v0, 0.0  ;;  %v25_v4 = vsel %vm18_vm0, %v16_v1, 0.0  ;;  %v17_v5 = vld [vmem:[%s199_s0 + $0x18] sm:$0xff]  ;;  %v22_v6 = vsel %vm18_vm0, %v15_v2, 0.0  ;;  %v119_v41 = vld [vmem:[%s200_s1] ss:$0 sm:$0xff] }
   0x3   :  { %20 = vadd.xlane.f32.xlu0 %v19_v3  ;;  %26 = vadd.xlane.f32.xlu1 %v25_v4  ;;  %v28_v7 = vsel %vm18_vm0, %v17_v5, 0.0  ;;  %v120_v43 = vld [vmem:[%s201_s2] ss:$0 sm:$0xff] }
   0x7   :  { %23 = vadd.xlane.f32.xlu0 %v22_v6  ;;  %29 = vadd.xlane.f32.xlu1 %v28_v7 }
  0x8c   :  { %v21_v8 = vpop.xlane.xlu0 %20  ;;  %v27_v9 = vpop.xlane.xlu1 %26 }
  0x8d   :  { %v32_v10 = vmul.f32 0.03125, %v21_v8  ;;  %v34_v11 = vmul.f32 0.03125, %v27_v9 }
  0x8f   :  { %v36_v12 = vsub.f32 %v14_v0, %v32_v10  ;;  %v38_v13 = vsub.f32 %v16_v1, %v34_v11 }
  0x90   :  { %v24_v14 = vpop.xlane.xlu0 %23  ;;  %v30_v15 = vpop.xlane.xlu1 %29 }
  0x91   :  { %v33_v16 = vmul.f32 0.03125, %v24_v14  ;;  %v35_v17 = vmul.f32 0.03125, %v30_v15  ;;  %v40_v18 = vmul.f32 %v36_v12, %v36_v12  ;;  %v42_v19 = vmul.f32 %v38_v13, %v38_v13 }
  0x93   :  { %v37_v20 = vsub.f32 %v15_v2, %v33_v16  ;;  %v39_v21 = vsub.f32 %v17_v5, %v35_v17  ;;  %v44_v22 = vsel %vm18_vm0, %v40_v18, 0.0  ;;  %v50_v23 = vsel %vm18_vm0, %v42_v19, 0.0 }
  0x94   :  { %45 = vadd.xlane.f32.xlu0 %v44_v22 }
  0x95   :  { %v41_v24 = vmul.f32 %v37_v20, %v37_v20  ;;  %v43_v25 = vmul.f32 %v39_v21, %v39_v21 }
  0x97   :  { %v47_v26 = vsel %vm18_vm0, %v41_v24, 0.0  ;;  %v53_v27 = vsel %vm18_vm0, %v43_v25, 0.0 }
  0x98   :  { %51 = vadd.xlane.f32.xlu0 %v50_v23  ;;  %48 = vadd.xlane.f32.xlu1 %v47_v26 }
  0x9c   :  { %54 = vadd.xlane.f32.xlu1 %v53_v27 }
 0x11d   :  { %v46_v28 = vpop.xlane.xlu0 %45 }
 0x11e   :  { %v56_v29 = vmul.f32 0.03125, %v46_v28 }
 0x120   :  { %v60_v30 = vadd.f32 1e-05, %v56_v29 }
 0x121   :  { %v49_v31 = vpop.xlane.xlu1 %48  ;;  %v52_v32 = vpop.xlane.xlu0 %51 }
 0x122   :  { %129 = vrsqrt.f32 %v60_v30  ;;  %v57_v33 = vmul.f32 0.03125, %v49_v31  ;;  %v58_v34 = vmul.f32 0.03125, %v52_v32 }
 0x124   :  { %v61_v35 = vadd.f32 1e-05, %v57_v33  ;;  %v62_v36 = vadd.f32 1e-05, %v58_v34 }
 0x125   :  { %v55_v37 = vpop.xlane.xlu1 %54 }
 0x126   :  { %131 = vrsqrt.f32 %v61_v35  ;;  %v59_v38 = vmul.f32 0.03125, %v55_v37 }
 0x127   :  { %133 = vrsqrt.f32 %v62_v36 }
 0x128   :  { %v63_v39 = vadd.f32 1e-05, %v59_v38 }
 0x12a   :  { %135 = vrsqrt.f32 %v63_v39 }
 0x12f   :  { %v130_v40 = vpop.eup %129 }
 0x130   :  { %v68_v42 = vmul.f32 %v130_v40, %v36_v12 }
 0x132   :  { %v79_v44 = vmul.f32 %v119_v41, %v68_v42 }
 0x133   :  { %v132_v45 = vpop.eup %131 }
 0x134   :  { %v134_v46 = vpop.eup %133  ;;  %v90_v47 = vadd.f32 %v120_v43, %v79_v44  ;;  %v69_v48 = vmul.f32 %v132_v45, %v37_v20 }
 0x135   :  { %v70_v49 = vmul.f32 %v134_v46, %v38_v13 }
 0x136   :  { %v125_v50 = vpack.c.bf16 %v90_v47, %v90_v47  ;;  %v80_v51 = vmul.f32 %v119_v41, %v69_v48 }
 0x137   :  { %v136_v52 = vpop.eup %135  ;;  %v81_v53 = vmul.f32 %v119_v41, %v70_v49 }
 0x138   :  { %111 = vst.msk [vmem:[%s202_s3] sm:$0xf] %vm110_vm1, %v125_v50  ;;  %v91_v54 = vadd.f32 %v120_v43, %v80_v51  ;;  %v71_v55 = vmul.f32 %v136_v52, %v39_v21 }
 0x139   :  { %v92_v56 = vadd.f32 %v120_v43, %v81_v53 }
 0x13a   :  { %v126_v57 = vpack.c.bf16 %v91_v54, %v91_v54  ;;  %v82_v58 = vmul.f32 %v119_v41, %v71_v55 }
 0x13b   :  { %v127_v59 = vpack.c.bf16 %v92_v56, %v92_v56 }
 0x13c   :  { %112 = vst.msk [vmem:[%s202_s3 + $0x4] sm:$0xf] %vm110_vm1, %v126_v57  ;;  %v93_v60 = vadd.f32 %v120_v43, %v82_v58 }
 0x13d   :  { %113 = vst.msk [vmem:[%s202_s3 + $0x8] sm:$0xf] %vm110_vm1, %v127_v59 }
 0x13e   :  { %v128_v61 = vpack.c.bf16 %v93_v60, %v93_v60 }
 0x140   :  { %114 = vst.msk [vmem:[%s202_s3 + $0xc] sm:$0xf] %vm110_vm1, %v128_v61 }

// kernel: ext_summarizer_forward.28
= control target key start
LH: loop header
LB: loop body
LE: loop exit
PB: predicated region body
PF: predicated region fallthrough
CT: control target
= control target key end

     0   :  { %vm61_vm0 = vcmask 261120   ;;  %vm220_vm1 = vcmask 257024   ;;  %s367_s1 = inlined_call_operand.vmem [shape: bf16[32,32], index: 1, kind: input, shape index: {}]   ;;  %s368_s0 = inlined_call_operand.vmem [shape: bf16[32,32], index: 0, kind: input, shape index: {}]   ;;  %s369_s3 = inlined_call_operand.vmem [shape: bf16[32,32], index: 3, kind: input, shape index: {}]   ;;  %s370_s2 = inlined_call_operand.vmem [shape: f32[1,32], index: 2, kind: input, shape index: {}]   ;;  %s371_s4 = inlined_call_operand.vmem [shape: f32[1,32], index: 4, kind: input, shape index: {}]   ;;  %s372_s5 = inlined_call_operand.vmem [shape: f32[1,32], index: 5, kind: input, shape index: {}]   ;;  %s373_s6 = inlined_call_operand.vmem [shape: bf16[32,32], index: 6, kind: output, shape index: {}]  }
   0x1   :  { %v267_v0 = vld [vmem:[%s367_s1 + $0x8] sm:$0xff]   ;;  %v268_v1 = vld [vmem:[%s367_s1] sm:$0xff]  }
   0x2   :  { %259 = vmatprep.subr.bf16.mxu0 %v267_v0  ;;  %v269_v2 = vld [vmem:[%s368_s0] sm:$0xff]   ;;  %v270_v3 = vld [vmem:[%s368_s0 + $0x8] sm:$0xff]  }
   0x3   :  { %260 = vmatpush3.bf16.msra.mxu0 %v267_v0  ;;  %263 = vmatprep.mubr.msk.bf16.mxu0 %vm61_vm0, %v269_v2  ;;  %v254_v4 = vld [vmem:[%s369_s3 + $0x8] sm:$0xff]   ;;  %v229_v5 = vld [vmem:[%s370_s2] ss:$0 sm:$0xff] }
   0x4   :  { %261 = vmatprep.subr.bf16.mxu0 %v268_v1  ;;  %v247_v6 = vld [vmem:[%s369_s3] sm:$0xff]   ;;  %v252_v7 = vunpack.c.l.bf16 %v254_v4  ;;  %v253_v14 = vunpack.c.h.bf16 %v254_v4 }
   0x5   :  { %v248_v10 = vunpack.c.l.bf16 %v247_v6  ;;  %v249_v19 = vunpack.c.h.bf16 %v247_v6  ;;  %v236_v60 = vld [vmem:[%s371_s4] ss:$0 sm:$0xff] }
   0x6   :  { %v237_v62 = vld [vmem:[%s372_s5] ss:$0 sm:$0xff] }
   0x7   :  { %262 = vmatpush3.bf16.msra.mxu0 %v268_v1 }
   0xa   :  { %264 = vmatmul.mubr.msk.bf16.vlgmr.msra.gmra.mxu0 %vm61_vm0, %v270_v3 }
  0xca   :  { %v265_v8 = vpop.f32.mrf.mxu0 }
  0xcb   :  { %v111_v9 = vadd.f32 %v265_v8, %v229_v5 }
  0xcc   :  { %v102_v11 = vpop.f32.mrf.mxu0 }
  0xcd   :  { %v103_v12 = vadd.f32 %v229_v5, %v102_v11  ;;  %v127_v13 = vadd.f32 %v252_v7, %v111_v9 }
  0xce   :  { %v266_v15 = vpop.f32.mrf.mxu0 }
  0xcf   :  { %v114_v16 = vadd.f32 %v266_v15, %v229_v5  ;;  %v135_v17 = vsel %vm61_vm0, %v127_v13, 0.0  ;;  %v125_v18 = vadd.f32 %v248_v10, %v103_v12 }
  0xd0   :  { %136 = vadd.xlane.f32.xlu1 %v135_v17  ;;  %v105_v20 = vpop.f32.mrf.mxu0 }
  0xd1   :  { %v106_v21 = vadd.f32 %v229_v5, %v105_v20  ;;  %v129_v22 = vsel %vm61_vm0, %v125_v18, 0.0  ;;  %v128_v23 = vadd.f32 %v253_v14, %v114_v16 }
  0xd2   :  { %130 = vadd.xlane.f32.xlu0 %v129_v22 }
  0xd3   :  { %v138_v24 = vsel %vm61_vm0, %v128_v23, 0.0  ;;  %v126_v25 = vadd.f32 %v249_v19, %v106_v21 }
  0xd4   :  { %139 = vadd.xlane.f32.xlu1 %v138_v24 }
  0xd5   :  { %v132_v26 = vsel %vm61_vm0, %v126_v25, 0.0 }
  0xd6   :  { %133 = vadd.xlane.f32.xlu0 %v132_v26 }
 0x159   :  { %v137_v27 = vpop.xlane.xlu1 %136 }
 0x15a   :  { %v144_v28 = vmul.f32 0.03125, %v137_v27 }
 0x15b   :  { %v131_v29 = vpop.xlane.xlu0 %130 }
 0x15c   :  { %v142_v30 = vmul.f32 0.03125, %v131_v29  ;;  %v148_v32 = vsub.f32 %v127_v13, %v144_v28 }
 0x15d   :  { %v140_v31 = vpop.xlane.xlu1 %139 }
 0x15e   :  { %v146_v33 = vsub.f32 %v125_v18, %v142_v30  ;;  %v145_v34 = vmul.f32 0.03125, %v140_v31  ;;  %v152_v41 = vmul.f32 %v148_v32, %v148_v32 }
 0x15f   :  { %v134_v35 = vpop.xlane.xlu0 %133 }
 0x160   :  { %v143_v36 = vmul.f32 0.03125, %v134_v35  ;;  %v150_v37 = vmul.f32 %v146_v33, %v146_v33  ;;  %v149_v38 = vsub.f32 %v128_v23, %v145_v34  ;;  %v160_v43 = vsel %vm61_vm0, %v152_v41, 0.0 }
 0x162   :  { %v147_v39 = vsub.f32 %v126_v25, %v143_v36  ;;  %v154_v40 = vsel %vm61_vm0, %v150_v37, 0.0  ;;  %v153_v45 = vmul.f32 %v149_v38, %v149_v38 }
 0x163   :  { %155 = vadd.xlane.f32.xlu0 %v154_v40 }
 0x164   :  { %v151_v42 = vmul.f32 %v147_v39, %v147_v39  ;;  %v163_v46 = vsel %vm61_vm0, %v153_v45, 0.0 }
 0x166   :  { %v157_v44 = vsel %vm61_vm0, %v151_v42, 0.0 }
 0x167   :  { %161 = vadd.xlane.f32.xlu0 %v160_v43  ;;  %158 = vadd.xlane.f32.xlu1 %v157_v44 }
 0x16b   :  { %164 = vadd.xlane.f32.xlu1 %v163_v46 }
 0x1ec   :  { %v156_v47 = vpop.xlane.xlu0 %155 }
 0x1ed   :  { %v166_v48 = vmul.f32 0.03125, %v156_v47 }
 0x1ef   :  { %v170_v49 = vadd.f32 1e-05, %v166_v48 }
 0x1f0   :  { %v159_v50 = vpop.xlane.xlu1 %158  ;;  %v162_v51 = vpop.xlane.xlu0 %161 }
 0x1f1   :  { %271 = vrsqrt.f32 %v170_v49  ;;  %v167_v52 = vmul.f32 0.03125, %v159_v50  ;;  %v168_v53 = vmul.f32 0.03125, %v162_v51 }
 0x1f3   :  { %v171_v54 = vadd.f32 1e-05, %v167_v52  ;;  %v172_v55 = vadd.f32 1e-05, %v168_v53 }
 0x1f4   :  { %v165_v56 = vpop.xlane.xlu1 %164 }
 0x1f5   :  { %273 = vrsqrt.f32 %v171_v54  ;;  %v169_v57 = vmul.f32 0.03125, %v165_v56 }
 0x1f6   :  { %275 = vrsqrt.f32 %v172_v55 }
 0x1f7   :  { %v173_v58 = vadd.f32 1e-05, %v169_v57 }
 0x1f9   :  { %277 = vrsqrt.f32 %v173_v58 }
 0x1fe   :  { %v272_v59 = vpop.eup %271 }
 0x1ff   :  { %v178_v61 = vmul.f32 %v272_v59, %v146_v33 }
 0x201   :  { %v189_v63 = vmul.f32 %v236_v60, %v178_v61 }
 0x202   :  { %v274_v0 = vpop.eup %273 }
 0x203   :  { %v276_v1 = vpop.eup %275  ;;  %v200_v2 = vadd.f32 %v237_v62, %v189_v63  ;;  %v179_v3 = vmul.f32 %v274_v0, %v147_v39 }
 0x204   :  { %v180_v4 = vmul.f32 %v276_v1, %v148_v32 }
 0x205   :  { %v242_v5 = vpack.c.bf16 %v200_v2, %v200_v2  ;;  %v190_v6 = vmul.f32 %v236_v60, %v179_v3 }
 0x206   :  { %v278_v7 = vpop.eup %277  ;;  %v191_v8 = vmul.f32 %v236_v60, %v180_v4 }
 0x207   :  { %221 = vst.msk [vmem:[%s373_s6] sm:$0xf] %vm220_vm1, %v242_v5  ;;  %v201_v9 = vadd.f32 %v237_v62, %v190_v6  ;;  %v181_v10 = vmul.f32 %v278_v7, %v149_v38 }
 0x208   :  { %v202_v11 = vadd.f32 %v237_v62, %v191_v8 }
 0x209   :  { %v243_v12 = vpack.c.bf16 %v201_v9, %v201_v9  ;;  %v192_v13 = vmul.f32 %v236_v60, %v181_v10 }
 0x20a   :  { %v244_v14 = vpack.c.bf16 %v202_v11, %v202_v11 }
 0x20b   :  { %222 = vst.msk [vmem:[%s373_s6 + $0x4] sm:$0xf] %vm220_vm1, %v243_v12  ;;  %v203_v15 = vadd.f32 %v237_v62, %v192_v13 }
 0x20c   :  { %223 = vst.msk [vmem:[%s373_s6 + $0x8] sm:$0xf] %vm220_vm1, %v244_v14 }
 0x20d   :  { %v245_v16 = vpack.c.bf16 %v203_v15, %v203_v15 }
 0x20f   :  { %224 = vst.msk [vmem:[%s373_s6 + $0xc] sm:$0xf] %vm220_vm1, %v245_v16 }

// kernel: ext_summarizer_forward.26
= control target key start
LH: loop header
LB: loop body
LE: loop exit
PB: predicated region body
PF: predicated region fallthrough
CT: control target
= control target key end

     0   :  { %vm52_vm0 = vcmask 261120   ;;  %vm124_vm1 = vcmask 257024   ;;  %s533_s1 = inlined_call_operand.vmem [shape: bf16[3,32,32], index: 1, kind: input, shape index: {}]   ;;  %s534_s0 = inlined_call_operand.vmem [shape: bf16[32,32], index: 0, kind: input, shape index: {}]   ;;  %s535_s2 = inlined_call_operand.vmem [shape: f32[3,1,32], index: 2, kind: input, shape index: {}]   ;;  %s536_s3 = inlined_call_operand.vmem [shape: bf16[3,32,32], index: 3, kind: output, shape index: {}]  }
   0x1   :  { %v418_v0 = vld [vmem:[%s533_s1 + $0x8] sm:$0xff]   ;;  %v419_v1 = vld [vmem:[%s533_s1 + $0x18] sm:$0xff]   ;;  %v420_v2 = vld [vmem:[%s533_s1] sm:$0xff]  }
   0x2   :  { %394 = vmatprep.subr.bf16.mxu0 %v418_v0  ;;  %402 = vmatprep.subr.bf16.mxu1 %v419_v1  ;;  %v421_v3 = vld [vmem:[%s534_s0] sm:$0xff]   ;;  %v422_v4 = vld [vmem:[%s533_s1 + $0x10] sm:$0xff]   ;;  %v423_v5 = vld [vmem:[%s534_s0 + $0x8] sm:$0xff]  }
   0x3   :  { %395 = vmatpush3.bf16.msra.mxu0 %v418_v0  ;;  %403 = vmatpush3.bf16.msra.mxu1 %v419_v1  ;;  %v424_v6 = vld [vmem:[%s533_s1 + $0x28] sm:$0xff]   ;;  %v425_v7 = vld [vmem:[%s533_s1 + $0x20] sm:$0xff]  }
   0x4   :  { %396 = vmatprep.subr.bf16.mxu0 %v420_v2  ;;  %398 = vmatprep.mubr.msk.bf16.mxu0 %vm52_vm0, %v421_v3  ;;  %v323_v8 = vld [vmem:[%s535_s2] ss:$0 sm:$0xff]  ;;  %v339_v9 = vld [vmem:[%s535_s2 + $0x1] ss:$0 sm:$0xff]  ;;  %v357_v27 = vld [vmem:[%s535_s2 + $0x2] ss:$0 sm:$0xff] }
   0x5   :  { %406 = vmatprep.mubr.msk.bf16.mxu1 %vm52_vm0, %v421_v3  ;;  %404 = vmatprep.subr.bf16.mxu1 %v422_v4 }
   0x7   :  { %397 = vmatpush3.bf16.msra.mxu0 %v420_v2  ;;  %405 = vmatpush3.bf16.msra.mxu1 %v422_v4 }
   0x8   :  { %410 = vmatprep.subr.bf16.mxu0 %v424_v6 }
   0xa   :  { %399 = vmatmul.mubr.msk.bf16.vlgmr.msra.gmra.mxu0 %vm52_vm0, %v423_v5  ;;  %407 = vmatmul.mubr.msk.bf16.vlgmr.msra.gmra.mxu1 %vm52_vm0, %v423_v5 }
   0xb   :  { %411 = vmatpush3.bf16.msra.mxu0 %v424_v6  ;;  %414 = vmatprep.mubr.msk.bf16.mxu0 %vm52_vm0, %v421_v3 }
   0xc   :  { %412 = vmatprep.subr.bf16.mxu0 %v425_v7 }
   0xf   :  { %413 = vmatpush3.bf16.msra.mxu0 %v425_v7 }
  0x12   :  { %415 = vmatmul.mubr.msk.bf16.vlgmr.msra.gmra.mxu0 %vm52_vm0, %v423_v5 }
  0xca   :  { %v400_v10 = vpop.f32.mrf.mxu0  ;;  %v408_v12 = vpop.f32.mrf.mxu1 }
  0xcb   :  { %v102_v11 = vadd.f32 %v400_v10, %v323_v8  ;;  %v197_v14 = vadd.f32 %v408_v12, %v339_v9 }
  0xcc   :  { %v93_v13 = vpop.f32.mrf.mxu0  ;;  %v188_v17 = vpop.f32.mrf.mxu1 }
  0xcd   :  { %v372_v15 = vpack.c.bf16 %v102_v11, %v102_v11  ;;  %v94_v16 = vadd.f32 %v323_v8, %v93_v13  ;;  %v376_v18 = vpack.c.bf16 %v197_v14, %v197_v14  ;;  %v189_v20 = vadd.f32 %v339_v9, %v188_v17 }
  0xce   :  { %v401_v19 = vpop.f32.mrf.mxu0  ;;  %v409_v23 = vpop.f32.mrf.mxu1 }
  0xcf   :  { %127 = vst.msk [vmem:[%s536_s3 + $0x8] sm:$0xf] %vm124_vm1, %v372_v15  ;;  %v370_v21 = vpack.c.bf16 %v94_v16, %v94_v16  ;;  %v105_v22 = vadd.f32 %v401_v19, %v323_v8  ;;  %350 = vst.msk [vmem:[%s536_s3 + $0x18] sm:$0xf] %vm124_vm1, %v376_v18  ;;  %v374_v24 = vpack.c.bf16 %v189_v20, %v189_v20 }
  0xd0   :  { %v96_v25 = vpop.f32.mrf.mxu0  ;;  %v200_v26 = vadd.f32 %v409_v23, %v339_v9  ;;  %v191_v30 = vpop.f32.mrf.mxu1 }
  0xd1   :  { %125 = vst.msk [vmem:[%s536_s3] sm:$0xf] %vm124_vm1, %v370_v21  ;;  %v373_v28 = vpack.c.bf16 %v105_v22, %v105_v22  ;;  %v97_v29 = vadd.f32 %v323_v8, %v96_v25  ;;  %348 = vst.msk [vmem:[%s536_s3 + $0x10] sm:$0xf] %vm124_vm1, %v374_v24  ;;  %v192_v33 = vadd.f32 %v339_v9, %v191_v30 }
  0xd2   :  { %v377_v31 = vpack.c.bf16 %v200_v26, %v200_v26  ;;  %v416_v32 = vpop.f32.mrf.mxu0 }
  0xd3   :  { %128 = vst.msk [vmem:[%s536_s3 + $0xc] sm:$0xf] %vm124_vm1, %v373_v28  ;;  %v371_v34 = vpack.c.bf16 %v97_v29, %v97_v29  ;;  %v292_v35 = vadd.f32 %v416_v32, %v357_v27  ;;  %v375_v36 = vpack.c.bf16 %v192_v33, %v192_v33 }
  0xd4   :  { %351 = vst.msk [vmem:[%s536_s3 + $0x1c] sm:$0xf] %vm124_vm1, %v377_v31  ;;  %v283_v37 = vpop.f32.mrf.mxu0 }
  0xd5   :  { %126 = vst.msk [vmem:[%s536_s3 + $0x4] sm:$0xf] %vm124_vm1, %v371_v34  ;;  %v380_v38 = vpack.c.bf16 %v292_v35, %v292_v35  ;;  %v284_v39 = vadd.f32 %v357_v27, %v283_v37  ;;  %349 = vst.msk [vmem:[%s536_s3 + $0x14] sm:$0xf] %vm124_vm1, %v375_v36 }
  0xd6   :  { %v417_v40 = vpop.f32.mrf.mxu0 }
  0xd7   :  { %368 = vst.msk [vmem:[%s536_s3 + $0x28] sm:$0xf] %vm124_vm1, %v380_v38  ;;  %v378_v41 = vpack.c.bf16 %v284_v39, %v284_v39  ;;  %v295_v42 = vadd.f32 %v417_v40, %v357_v27 }
  0xd8   :  { %v286_v43 = vpop.f32.mrf.mxu0 }
  0xd9   :  { %366 = vst.msk [vmem:[%s536_s3 + $0x20] sm:$0xf] %vm124_vm1, %v378_v41  ;;  %v381_v44 = vpack.c.bf16 %v295_v42, %v295_v42  ;;  %v287_v45 = vadd.f32 %v357_v27, %v286_v43 }
  0xdb   :  { %369 = vst.msk [vmem:[%s536_s3 + $0x2c] sm:$0xf] %vm124_vm1, %v381_v44  ;;  %v379_v46 = vpack.c.bf16 %v287_v45, %v287_v45 }
  0xdd   :  { %367 = vst.msk [vmem:[%s536_s3 + $0x24] sm:$0xf] %vm124_vm1, %v379_v46 }

// kernel: ext_summarizer_forward.27
= control target key start
LH: loop header
LB: loop body
LE: loop exit
PB: predicated region body
PF: predicated region fallthrough
CT: control target
= control target key end

     0   :  { %s1163_s9 = smov 0   ;;  %s1165_s10 = smov 0   ;;  %s1344_s0 = inlined_call_operand.vmem [shape: bf16[3,2,16,32], index: 0, kind: input, shape index: {}]   ;;  %s1345_s1 = inlined_call_operand.vmem [shape: f32[2,1,16], index: 1, kind: input, shape index: {}]   ;;  %s1346_s2 = inlined_call_operand.vmem [shape: bf16[2,16,32], index: 2, kind: output, shape index: {}]  }
   0x1   :  { %s1167_s11 = smov 0   ;;  %s1169_s12 = smov 0  }
   0x2   :  { %s1171_s13 = smov 0  }
   0x3 LB: > { %s24_s14 = sadd.s32 1, %s1134_s12  ;;  %p40_p1 = scmp.ne.s32.totalorder %s1126_s10, %s1122_s9  ;;  %s1138_s13 = sphi %s1171_s13, %s12_s13   ;;  %s1134_s12 = sphi %s1169_s12, %s1350_s12   ;;  %s1130_s11 = sphi %s1167_s11, %s1349_s11   ;;  %s1126_s10 = sphi %s1165_s10, %s1348_s10   ;;  %s1122_s9 = sphi %s1163_s9, %s1347_s9  }
   0x4   : > { %p26_p0 = scmp.ge.s32.totalorder %s24_s14, 2  ;;  %p41_p2 = scmp.eq.s32.totalorder %s1138_s13, 0 }
   0x5   : > { %s33_s16 = sadd.s32 1, %s1126_s10  ;;  %p909_p5 = scmp.ge.s32.totalorder %s1138_s13, 2 }
   0x6   : > { %s1352_s14 = smov (%p26_p0, %s24_s14), 0  ;;  %p42_p3 = por %p41_p2, %p40_p1 }
   0x7   : > { %s28_s15 = ssub.s32 %s1134_s12, %s1352_s14  ;;  %120 = sbr.rel (%p909_p5) target bundleno = 18 (0x12), region = 16 }
   0x8   : > { %p31_p4 = scmp.eq.s32.totalorder %s28_s15, 0 }
   0xa   : > { %s1198_s17 = scalar_select %p31_p4, %s1126_s10, %s33_s16  }
   0xc   : > { %123 = sbr.rel (!%p42_p3) target bundleno = 18 (0x12), region = 20  ;;  %s125_s18 = sand.u32 (%p42_p3), 1, %s1126_s10  }
   0xd   : > { %s941_s19 = sshll.u32 (%p42_p3), %s1134_s12, 3  ;;  %s1015_s20 = smul.u32 (%p42_p3), 24, %s125_s18 }
   0xe   : > { %s131_s23 = scalar_lea.vmem (%p42_p3), %s1344_s0, %s941_s19 }
   0xf   : > { %v148_v0 = vld [vmem:[%s131_s23] sm:$0xff] (%p42_p3)   ;;  %v152_v1 = vld [vmem:[%s131_s23 + $0x10] sm:$0xff] (%p42_p3)   ;;  %s127_s24 = scalar_lea.vmem (%p42_p3), [#allocation2], %s1015_s20 }
  0x10   : > { %v156_v2 = vld [vmem:[%s131_s23 + $0x20] sm:$0xff] (%p42_p3)   ;;  %149 = vst [vmem:[%s127_s24] sm:$0xff] (%p42_p3), %v148_v0   ;;  %153 = vst [vmem:[%s127_s24 + $0x8] sm:$0xff] (%p42_p3), %v152_v1  }
  0x11   : > { %157 = vst [vmem:[%s127_s24 + $0x10] sm:$0xff] %v156_v2  }
  0x12 PF: > { %p912_p6 = scmp.ge.s32.totalorder %s1138_s13, 1  ;;  %p200_p7 = scmp.lt.s32.totalorder %s1138_s13, 3 }
  0x14   : > { %p201_p8 = pnand %p912_p6, %p200_p7 }
  0x15   : > { %s207_s25 = sand.u32 (!%p201_p8), 1, %s1122_s9   ;;  %s1142_s28 = smov (!%p201_p8), 120  }
  0x16   : > { %204 = sbr.rel (%p201_p8) target bundleno = 1139 (0x473), region = 65  ;;  %s1143_s29 = smov (!%p201_p8), 112  }
  0x17   : > { %s1016_s26 = smul.u32 (!%p201_p8), 24, %s207_s25  ;;  %s1144_s30 = smov (!%p201_p8), 104  }
  0x18   : > { %p234_p9 = scmp.lt.s32.totalorder (!%p201_p8), %s1130_s11, 1  ;;  %s1146_s15 = smov (!%p201_p8), 16  }
  0x19   : > { %s1215_s27 = scalar_lea.vmem (!%p201_p8), [#allocation2], %s1016_s26  ;;  %s1147_s16 = smov (!%p201_p8), 24  }
  0x1b   : > { %v1140_v3 = vmov 0.0   ;;  %vm1141_vm0 = vmmov 0   ;;  %vm271_vm1 = vcmask 64512   ;;  %v1065_v4 = vld [vmem:[%s1215_s27 + $0x8] sm:$0xff]   ;;  %v1066_v6 = vld [vmem:[%s1215_s27] sm:$0xff]   ;;  %s1354_s11 = smov (!%p234_p9, %s1130_s11), 1 }
  0x1c   : > { %967 = vmatprep.subr.bf16.mxu0 %v1140_v3  ;;  %969 = vmatprep.mubr.msk.bf16.mxu0 %vm1141_vm0, %v1140_v3  ;;  %v276_v5 = vsel %vm271_vm1, %v1065_v4, 0  ;;  %s236_s5 = scalar_lea.vmem %s1345_s1, %s1354_s11  ;;  %vm319_vm2 = vcmask 130048   ;;  %v1244_v16 = vld [vmem:[%s1215_s27 + $0x10] sm:$0xff]   ;;  %s942_s6 = sshll.u32 %s1354_s11, 3  ;;  %vm401_vm3 = vcmask 60416   ;;  %vm537_vm4 = vcmask 126016  }
  0x1d   : > { %973 = vmatprep.subr.bf16.mxu1 %v1140_v3  ;;  %975 = vmatprep.mubr.msk.bf16.mxu1 %vm1141_vm0, %v1140_v3  ;;  %v1237_v7 = vld [vmem:[%s236_s5] ss:$0 sm:$0xff]  ;;  %s1316_s9 = scalar_lea.vmem %s1346_s2, %s942_s6  ;;  %s1145_s11 = smov 8   ;;  %vm673_vm5 = vcmask 191616   ;;  %vm809_vm6 = vcmask 257216  }
  0x1e   : > { %968 = vmatpush3.bf16.xpose.msra.mxu0 %v276_v5  ;;  %406 = vrot.lane.b32.xlu1 %v1065_v4, %s1142_s28 }
  0x1f   : > { %985 = vmatprep.subr.bf16.mxu0 %v1140_v3  ;;  %974 = vmatpush3.bf16.msra.mxu1 %v1244_v16 }
  0x20   : > { %979 = vmatprep.subr.bf16.mxu1 %v1140_v3 }
  0x22   : > { %404 = vrot.lane.b32.xlu1 %v1066_v6, %s1142_s28 }
  0x25   : > { %970 = vmatmul.mubr.msk.bf16.vlgmr.msra.gmra.mxu0 %vm271_vm1, %v1066_v6 }
  0x26   : > { %987 = vmatprep.mubr.msk.bf16.mxu0 %vm1141_vm0, %v1140_v3  ;;  %540 = vrot.lane.b32.xlu1 %v1066_v6, %s1143_s29 }
  0x2a   : > { %678 = vrot.lane.b32.xlu1 %v1065_v4, %s1144_s30 }
  0x2e   : > { %676 = vrot.lane.b32.xlu1 %v1066_v6, %s1144_s30 }
  0x90   : > { %v407_v23 = vpop.permute.xlu1 %406 }
  0x91   : > { %v412_v26 = vsel %vm271_vm1, %v407_v23, 0 }
  0x94   : > { %v405_v28 = vpop.permute.xlu1 %404 }
  0x98   : > { %v541_v30 = vpop.permute.xlu1 %540 }
  0x9c   : > { %v679_v32 = vpop.permute.xlu1 %678 }
  0x9d   : > { %v684_v33 = vsel %vm271_vm1, %v679_v32, 0 }
  0xa0   : > { %v677_v34 = vpop.permute.xlu1 %676 }
  0xe5   : > { %v312_v8 = vpop.f32.mrf.mxu0 }
  0xe6   : > { %v313_v9 = vadd.f32 %v1237_v7, %v312_v8 }
  0xe7   : > { %v971_v10 = vpop.f32.mrf.mxu0 }
  0xe8   : > { %v320_v11 = vsel %vm319_vm2, %v313_v9, -inf }
  0xe9   : > { %321 = vmax.xlane.f32.xlu0 %v320_v11  ;;  %v315_v12 = vpop.f32.mrf.mxu0 }
  0xea   : > { %v316_v13 = vadd.f32 %v1237_v7, %v315_v12 }
  0xeb   : > { %v972_v14 = vpop.f32.mrf.mxu0 }
  0xec   : > { %v323_v15 = vsel %vm319_vm2, %v316_v13, -inf }
  0xed   : > { %324 = vmax.xlane.f32.xlu0 %v323_v15 }
 0x103   : > { %542 = vrot.lane.b32.xlu0 %v1065_v4, %s1143_s29 }
 0x172   : > { %v322_v17 = vpop.xlane.xlu0 %321 }
 0x173   : > { %v326_v18 = vsub.f32 %v313_v9, %v322_v17 }
 0x175   : > { %v328_v19 = vmul.f32 1.442695, %v326_v18 }
 0x176   : > { %v325_v20 = vpop.xlane.xlu0 %324 }
 0x177   : > { %v327_v21 = vsub.f32 %v316_v13, %v325_v20  ;;  %1068 = vpow2.f32 %v328_v19 }
 0x179   : > { %v330_v22 = vmul.f32 1.442695, %v327_v21 }
 0x17a   : > { %v543_v29 = vpop.permute.xlu0 %542 }
 0x17b   : > { %1070 = vpow2.f32 %v330_v22  ;;  %v548_v31 = vsel %vm271_vm1, %v543_v29, 0 }
 0x184   : > { %v1249_v24 = vpop.eup %1068 }
 0x188   : > { %v1251_v25 = vpop.eup %1070 }
 0x189   : > { %v340_v27 = vpack.c.bf16 %v1251_v25, %v1249_v24 }
 0x18b   : > { %976 = vmatmul.mubr.msk.bf16.vlgmr.msra.gmra.mxu1 %vm319_vm2, %v340_v27 }
 0x18c   : > { %980 = vmatpush3.bf16.xpose.msra.mxu1 %v412_v26  ;;  %981 = vmatprep.mubr.msk.bf16.mxu1 %vm1141_vm0, %v1140_v3 }
 0x18d   : > { %991 = vmatprep.subr.bf16.mxu1 %v1140_v3 }
 0x193   : > { %982 = vmatmul.mubr.msk.bf16.vlgmr.msra.gmra.mxu1 %vm271_vm1, %v405_v28 }
 0x194   : > { %992 = vmatpush3.bf16.xpose.msra.mxu1 %v548_v31  ;;  %993 = vmatprep.mubr.msk.bf16.mxu1 %vm1141_vm0, %v1140_v3  ;;  %v332_v31 = vsel %vm319_vm2, %v1249_v24, 0.0 }
 0x195   : > { %1003 = vmatprep.subr.bf16.mxu1 %v1140_v3 }
 0x19b   : > { %994 = vmatmul.mubr.msk.bf16.vlgmr.msra.gmra.mxu1 %vm271_vm1, %v541_v30 }
 0x19c   : > { %1004 = vmatpush3.bf16.xpose.msra.mxu1 %v684_v33  ;;  %1005 = vmatprep.mubr.msk.bf16.mxu1 %vm1141_vm0, %v1140_v3 }
 0x1a3   : > { %1006 = vmatmul.mubr.msk.bf16.vlgmr.msra.gmra.mxu1 %vm271_vm1, %v677_v34 }
 0x24b   : > { %v1270_v35 = vpop.f32.mrf.mxu1 }
 0x24d   : > { %v977_v36 = vpop.f32.mrf.mxu1 }
 0x24f   : > { %v1272_v37 = vpop.f32.mrf.mxu1 }
 0x251   : > { %v978_v38 = vpop.f32.mrf.mxu1 }
 0x253   : > { %v448_v39 = vpop.f32.mrf.mxu1 }
 0x254   : > { %v449_v40 = vadd.f32 %v1237_v7, %v448_v39 }
 0x255   : > { %v983_v41 = vpop.f32.mrf.mxu1 }
 0x256   : > { %v455_v42 = vsel %vm319_vm2, %v449_v40, -inf }
 0x257   : > { %456 = vmax.xlane.f32.xlu1 %v455_v42  ;;  %v451_v43 = vpop.f32.mrf.mxu1 }
 0x258   : > { %v452_v44 = vadd.f32 %v1237_v7, %v451_v43 }
 0x259   : > { %v984_v45 = vpop.f32.mrf.mxu1 }
 0x25a   : > { %v458_v46 = vsel %vm319_vm2, %v452_v44, -inf }
 0x25b   : > { %459 = vmax.xlane.f32.xlu0 %v458_v46  ;;  %v584_v47 = vpop.f32.mrf.mxu1 }
 0x25c   : > { %v585_v48 = vadd.f32 %v1237_v7, %v584_v47 }
 0x25d   : > { %v995_v49 = vpop.f32.mrf.mxu1 }
 0x25e   : > { %v591_v50 = vsel %vm319_vm2, %v585_v48, -inf }
 0x25f   : > { %592 = vmax.xlane.f32.xlu1 %v591_v50  ;;  %v587_v51 = vpop.f32.mrf.mxu1 }
 0x260   : > { %v588_v52 = vadd.f32 %v1237_v7, %v587_v51 }
 0x261   : > { %v996_v53 = vpop.f32.mrf.mxu1 }
 0x262   : > { %v594_v54 = vsel %vm319_vm2, %v588_v52, -inf }
 0x263   : > { %595 = vmax.xlane.f32.xlu1 %v594_v54  ;;  %v720_v55 = vpop.f32.mrf.mxu1 }
 0x264   : > { %v721_v56 = vadd.f32 %v1237_v7, %v720_v55 }
 0x265   : > { %v1007_v57 = vpop.f32.mrf.mxu1 }
 0x266   : > { %v727_v58 = vsel %vm319_vm2, %v721_v56, -inf }
 0x267   : > { %728 = vmax.xlane.f32.xlu0 %v727_v58  ;;  %v723_v59 = vpop.f32.mrf.mxu1 }
 0x268   : > { %v724_v61 = vadd.f32 %v1237_v7, %v723_v59 }
 0x269   : > { %v1008_v60 = vpop.f32.mrf.mxu1 }
 0x26a   : > { %v730_v62 = vsel %vm319_vm2, %v724_v61, -inf }
 0x274   : > { %612 = vrot.lane.b32.xlu1 %v1244_v16, %s1143_s29 }
 0x27d   : > { %476 = vrot.lane.b32.xlu0 %v1244_v16, %s1142_s28 }
 0x298   : > { %731 = vmax.xlane.f32.xlu1 %v730_v62 }
 0x2a9   : > { %748 = vrot.lane.b32.xlu1 %v1244_v16, %s1144_s30 }
 0x2e0   : > { %v457_v63 = vpop.xlane.xlu1 %456 }
 0x2e1   : > { %v461_v0 = vsub.f32 %v449_v40, %v457_v63 }
 0x2e3   : > { %v463_v1 = vmul.f32 1.442695, %v461_v0 }
 0x2e4   : > { %v460_v2 = vpop.xlane.xlu0 %459 }
 0x2e5   : > { %1072 = vpow2.f32 %v463_v1  ;;  %v462_v4 = vsub.f32 %v452_v44, %v460_v2 }
 0x2e7   : > { %v465_v5 = vmul.f32 1.442695, %v462_v4 }
 0x2e8   : > { %v593_v6 = vpop.xlane.xlu1 %592 }
 0x2e9   : > { %1074 = vpow2.f32 %v465_v5  ;;  %v597_v8 = vsub.f32 %v585_v48, %v593_v6 }
 0x2eb   : > { %v599_v9 = vmul.f32 1.442695, %v597_v8 }
 0x2ec   : > { %v596_v10 = vpop.xlane.xlu1 %595 }
 0x2ed   : > { %1076 = vpow2.f32 %v599_v9  ;;  %v598_v7 = vsub.f32 %v588_v52, %v596_v10 }
 0x2ef   : > { %v601_v11 = vmul.f32 1.442695, %v598_v7 }
 0x2f0   : > { %v729_v12 = vpop.xlane.xlu0 %728  ;;  %v613_v21 = vpop.permute.xlu1 %612 }
 0x2f1   : > { %1078 = vpow2.f32 %v601_v11  ;;  %v733_v13 = vsub.f32 %v721_v56, %v729_v12 }
 0x2f2   : > { %v1073_v14 = vpop.eup %1072 }
 0x2f3   : > { %v735_v15 = vmul.f32 1.442695, %v733_v13  ;;  %v467_v16 = vsel %vm319_vm2, %v1073_v14, 0.0 }
 0x2f4   : > { %468 = vadd.xlane.f32.xlu0 %v467_v16  ;;  %v477_v17 = vpop.permute.xlu0 %476 }
 0x2f5   : > { %1080 = vpow2.f32 %v735_v15  ;;  %986 = vmatpush3.bf16.msra.mxu0 %v477_v17 }
 0x2f6   : > { %v1075_v18 = vpop.eup %1074  ;;  %997 = vmatprep.subr.bf16.mxu0 %v1140_v3 }
 0x2f7   : > { %v470_v19 = vsel %vm319_vm2, %v1075_v18, 0.0  ;;  %v475_v20 = vpack.c.bf16 %v1075_v18, %v1073_v14 }
 0x2f8   : > { %471 = vadd.xlane.f32.xlu1 %v470_v19 }
 0x2f9   : > { %988 = vmatmul.mubr.msk.bf16.vlgmr.msra.gmra.mxu0 %vm319_vm2, %v475_v20 }
 0x2fa   : > { %v1077_v22 = vpop.eup %1076  ;;  %998 = vmatpush3.bf16.msra.mxu0 %v613_v21  ;;  %999 = vmatprep.mubr.msk.bf16.mxu0 %vm1141_vm0, %v1140_v3 }
 0x2fb   : > { %v603_v23 = vsel %vm319_vm2, %v1077_v22, 0.0  ;;  %1009 = vmatprep.subr.bf16.mxu0 %v1140_v3 }
 0x2fc   : > { %604 = vadd.xlane.f32.xlu0 %v603_v23 }
 0x2fe   : > { %v1079_v26 = vpop.eup %1078 }
 0x2ff   : > { %v606_v27 = vsel %vm319_vm2, %v1079_v26, 0.0  ;;  %v611_v28 = vpack.c.bf16 %v1079_v26, %v1077_v22 }
 0x300   : > { %607 = vadd.xlane.f32.xlu0 %v606_v27 }
 0x301   : > { %1000 = vmatmul.mubr.msk.bf16.vlgmr.msra.gmra.mxu0 %vm319_vm2, %v611_v28 }
 0x302   : > { %v1081_v29 = vpop.eup %1080  ;;  %1011 = vmatprep.mubr.msk.bf16.mxu0 %vm1141_vm0, %v1140_v3  ;;  %v335_v3 = vsel %vm319_vm2, %v1251_v25, 0.0 }
 0x303   : > { %v739_v30 = vsel %vm319_vm2, %v1081_v29, 0.0 }
 0x304   : > { %740 = vadd.xlane.f32.xlu1 %v739_v30 }
 0x308   : > { %333 = vadd.xlane.f32.xlu1 %v332_v31 }
 0x321   : > { %v732_v32 = vpop.xlane.xlu1 %731 }
 0x322   : > { %v734_v33 = vsub.f32 %v724_v61, %v732_v32 }
 0x324   : > { %v737_v34 = vmul.f32 1.442695, %v734_v33 }
 0x325   : > { %v749_v36 = vpop.permute.xlu1 %748 }
 0x326   : > { %1082 = vpow2.f32 %v737_v34  ;;  %1010 = vmatpush3.bf16.msra.mxu0 %v749_v36 }
 0x333   : > { %v1083_v38 = vpop.eup %1082 }
 0x334   : > { %v742_v39 = vsel %vm319_vm2, %v1083_v38, 0.0  ;;  %v747_v40 = vpack.c.bf16 %v1083_v38, %v1081_v29 }
 0x335   : > { %743 = vadd.xlane.f32.xlu0 %v742_v39 }
 0x336   : > { %1012 = vmatmul.mubr.msk.bf16.vlgmr.msra.gmra.mxu0 %vm319_vm2, %v747_v40 }
 0x339   : > { %336 = vadd.xlane.f32.xlu0 %v335_v3 }
 0x37d   : > { %v469_v25 = vpop.xlane.xlu0 %468 }
 0x381   : > { %v472_v24 = vpop.xlane.xlu1 %471 }
 0x385   : > { %v605_v46 = vpop.xlane.xlu0 %604 }
 0x389   : > { %v608_v47 = vpop.xlane.xlu0 %607 }
 0x38d   : > { %v741_v41 = vpop.xlane.xlu1 %740 }
 0x391   : > { %v334_v42 = vpop.xlane.xlu1 %333 }
 0x392   : > { %1084 = vrcp.f32 %v334_v42 }
 0x393   : > { %1086 = vrcp.f32 %v469_v25 }
 0x394   : > { %1088 = vrcp.f32 %v472_v24 }
 0x395   : > { %1090 = vrcp.f32 %v605_v46 }
 0x396   : > { %1092 = vrcp.f32 %v608_v47 }
 0x39f   : > { %v1085_v43 = vpop.eup %1084 }
 0x3a0   : > { %v391_v44 = vmul.f32 %v1085_v43, %v1270_v35  ;;  %v1087_v48 = vpop.eup %1086 }
 0x3a1   : > { %v1089_v52 = vpop.eup %1088 }
 0x3a2   : > { %v943_v45 = vpack.c.bf16 %v391_v44, %v391_v44  ;;  %v1091_v58 = vpop.eup %1090 }
 0x3a3   : > { %v1093_v0 = vpop.eup %1092 }
 0x3a4   : > { %402 = vst.msk [vmem:[%s1316_s9] sm:$0xf] %vm401_vm3, %v943_v45 }
 0x3b9   : > { %v516_v49 = vpop.f32.mrf.mxu0 }
 0x3ba   : > { %v523_v35 = vmul.f32 %v1087_v48, %v516_v49 }
 0x3bb   : > { %v989_v50 = vpop.f32.mrf.mxu0 }
 0x3bc   : > { %v945_v51 = vpack.c.bf16 %v523_v35, %v523_v35 }
 0x3bd   : > { %v519_v53 = vpop.f32.mrf.mxu0 }
 0x3be   : > { %v524_v54 = vmul.f32 %v1089_v52, %v519_v53  ;;  %v744_v55 = vpop.xlane.xlu0 %743  ;;  %531 = vrot.lane.b32.xlu1 %v945_v51, %s1145_s11 }
 0x3bf   : > { %v990_v56 = vpop.f32.mrf.mxu0 }
 0x3c0   : > { %v946_v57 = vpack.c.bf16 %v524_v54, %v524_v54 }
 0x3c1   : > { %v652_v59 = vpop.f32.mrf.mxu0 }
 0x3c2   : > { %v659_v60 = vmul.f32 %v1091_v58, %v652_v59  ;;  %v337_v61 = vpop.xlane.xlu0 %336  ;;  %533 = vrot.lane.b32.xlu0 %v946_v57, %s1145_s11 }
 0x3c3   : > { %1094 = vrcp.f32 %v337_v61  ;;  %v1001_v62 = vpop.f32.mrf.mxu0 }
 0x3c4   : > { %v947_v63 = vpack.c.bf16 %v659_v60, %v659_v60  ;;  %1096 = vrcp.f32 %v741_v41 }
 0x3c5   : > { %v655_v1 = vpop.f32.mrf.mxu0  ;;  %1098 = vrcp.f32 %v744_v55 }
 0x3c6   : > { %v660_v2 = vmul.f32 %v1093_v0, %v655_v1  ;;  %667 = vrot.lane.b32.xlu1 %v947_v63, %s1146_s15 }
 0x3c7   : > { %v1002_v4 = vpop.f32.mrf.mxu0 }
 0x3c8   : > { %v948_v5 = vpack.c.bf16 %v660_v2, %v660_v2 }
 0x3ca   : > { %669 = vrot.lane.b32.xlu1 %v948_v5, %s1146_s15 }
 0x3d0   : > { %v1095_v6 = vpop.eup %1094 }
 0x3d1   : > { %v392_v8 = vmul.f32 %v1095_v6, %v1272_v37  ;;  %v1097_v10 = vpop.eup %1096 }
 0x3d2   : > { %v1099_v14 = vpop.eup %1098 }
 0x3d3   : > { %v944_v9 = vpack.c.bf16 %v392_v8, %v392_v8 }
 0x3d5   : > { %403 = vst.msk [vmem:[%s1316_s9 + $0x4] sm:$0xf] %vm401_vm3, %v944_v9 }
 0x3f6   : > { %v788_v7 = vpop.f32.mrf.mxu0 }
 0x3f7   : > { %v795_v11 = vmul.f32 %v1097_v10, %v788_v7 }
 0x3f8   : > { %v1013_v12 = vpop.f32.mrf.mxu0 }
 0x3f9   : > { %v949_v13 = vpack.c.bf16 %v795_v11, %v795_v11 }
 0x3fa   : > { %v791_v15 = vpop.f32.mrf.mxu0 }
 0x3fb   : > { %v796_v16 = vmul.f32 %v1099_v14, %v791_v15  ;;  %803 = vrot.lane.b32.xlu0 %v949_v13, %s1147_s16 }
 0x3fc   : > { %v1014_v37 = vpop.f32.mrf.mxu0 }
 0x3fd   : > { %v950_v17 = vpack.c.bf16 %v796_v16, %v796_v16 }
 0x3ff   : > { %805 = vrot.lane.b32.xlu1 %v950_v17, %s1147_s16 }
 0x430   : > { %v532_v18 = vpop.permute.xlu1 %531 }
 0x431   : > { %538 = vst.msk [vmem:[%s1316_s9] sm:$0xf] %vm537_vm4, %v532_v18 }
 0x434   : > { %v534_v19 = vpop.permute.xlu0 %533 }
 0x435   : > { %539 = vst.msk [vmem:[%s1316_s9 + $0x4] sm:$0xf] %vm537_vm4, %v534_v19 }
 0x438   : > { %v668_v20 = vpop.permute.xlu1 %667 }
 0x439   : > { %674 = vst.msk [vmem:[%s1316_s9] sm:$0xf] %vm673_vm5, %v668_v20 }
 0x43c   : > { %v670_v21 = vpop.permute.xlu1 %669 }
 0x43d   : > { %675 = vst.msk [vmem:[%s1316_s9 + $0x4] sm:$0xf] %vm673_vm5, %v670_v21 }
 0x46d   : > { %v804_v22 = vpop.permute.xlu0 %803 }
 0x46e   : > { %810 = vst.msk [vmem:[%s1316_s9] sm:$0xf] %vm809_vm6, %v804_v22 }
 0x471   : > { %v806_v23 = vpop.permute.xlu1 %805 }
 0x472   : > { %811 = vst.msk [vmem:[%s1316_s9 + $0x4] sm:$0xf] %vm809_vm6, %v806_v23 }
 0x473 PF: > { %s12_s13 = sadd.s32 1, %s1138_s13   ;;  %s1347_s9 = smov %s1126_s10 }
 0x474   : > { %p9_p10 = scmp.ge.s32.totalorder %s12_s13, 4   ;;  %s1348_s10 = smov %s1198_s17 }
 0x475   : > { %s1349_s11 = smov %s1134_s12  ;;  %s1350_s12 = smov %s1352_s14 }
 0x476   :  { %11 = sbr.rel (!%p9_p10) target bundleno = 3 (0x3), region = 109 }

// kernel: ext_summarizer_forward.29
= control target key start
LH: loop header
LB: loop body
LE: loop exit
PB: predicated region body
PF: predicated region fallthrough
CT: control target
= control target key end

     0   :  { %vm52_vm0 = vcmask 261120   ;;  %vm160_vm1 = vcmask 519168   ;;  %s259_s1 = inlined_call_operand.vmem [shape: bf16[32,64], index: 1, kind: input, shape index: {}]   ;;  %s260_s0 = inlined_call_operand.vmem [shape: bf16[32,32], index: 0, kind: input, shape index: {}]   ;;  %s261_s2 = inlined_call_operand.vmem [shape: f32[1,64], index: 2, kind: input, shape index: {}]   ;;  %s262_s3 = inlined_call_operand.vmem [shape: bf16[32,64], index: 3, kind: output, shape index: {}]  }
   0x1   :  { %v196_v0 = vld [vmem:[%s259_s1 + $0x8] sm:$0xff]   ;;  %v197_v1 = vld [vmem:[%s259_s1] sm:$0xff]  }
   0x2   :  { %188 = vmatprep.subr.bf16.mxu0 %v196_v0  ;;  %v198_v2 = vld [vmem:[%s260_s0] sm:$0xff]   ;;  %v199_v3 = vld [vmem:[%s260_s0 + $0x8] sm:$0xff]  }
   0x3   :  { %189 = vmatpush3.bf16.msra.mxu0 %v196_v0  ;;  %192 = vmatprep.mubr.msk.bf16.mxu0 %vm52_vm0, %v198_v2  ;;  %v169_v4 = vld [vmem:[%s261_s2] ss:$0 sm:$0xff] }
   0x4   :  { %190 = vmatprep.subr.bf16.mxu0 %v197_v1 }
   0x7   :  { %191 = vmatpush3.bf16.msra.mxu0 %v197_v1 }
   0xa   :  { %193 = vmatmul.mubr.msk.bf16.vlgmr.msra.gmra.mxu0 %vm52_vm0, %v199_v3 }
  0xca   :  { %v194_v5 = vpop.f32.mrf.mxu0 }
  0xcb   :  { %v102_v6 = vadd.f32 %v194_v5, %v169_v4 }
  0xcc   :  { %v93_v7 = vpop.f32.mrf.mxu0 }
  0xcd   :  { %v114_v8 = vmul.f32 0.044715, %v102_v6  ;;  %v94_v9 = vadd.f32 %v169_v4, %v93_v7  ;;  %v110_v34 = vmul.f32 0.5, %v102_v6 }
  0xce   :  { %v195_v10 = vpop.f32.mrf.mxu0 }
  0xcf   :  { %v118_v11 = vmul.f32 %v114_v8, %v102_v6  ;;  %v112_v12 = vmul.f32 0.044715, %v94_v9  ;;  %v105_v13 = vadd.f32 %v195_v10, %v169_v4  ;;  %v108_v38 = vmul.f32 0.5, %v94_v9 }
  0xd0   :  { %v96_v14 = vpop.f32.mrf.mxu0 }
  0xd1   :  { %v122_v15 = vmul.f32 %v118_v11, %v102_v6  ;;  %v116_v16 = vmul.f32 %v112_v12, %v94_v9  ;;  %v115_v17 = vmul.f32 0.044715, %v105_v13  ;;  %v97_v18 = vadd.f32 %v169_v4, %v96_v14 }
  0xd2   :  { %v111_v43 = vmul.f32 0.5, %v105_v13 }
  0xd3   :  { %v126_v19 = vadd.f32 %v122_v15, %v102_v6  ;;  %v120_v20 = vmul.f32 %v116_v16, %v94_v9  ;;  %v119_v21 = vmul.f32 %v115_v17, %v105_v13  ;;  %v113_v22 = vmul.f32 0.044715, %v97_v18 }
  0xd4   :  { %v109_v48 = vmul.f32 0.5, %v97_v18 }
  0xd5   :  { %v130_v23 = vmul.f32 0.7978846, %v126_v19  ;;  %v124_v24 = vadd.f32 %v120_v20, %v94_v9  ;;  %v123_v25 = vmul.f32 %v119_v21, %v105_v13  ;;  %v117_v26 = vmul.f32 %v113_v22, %v97_v18 }
  0xd7   :  { %200 = vtanh.f32 %v130_v23  ;;  %v128_v27 = vmul.f32 0.7978846, %v124_v24  ;;  %v127_v28 = vadd.f32 %v123_v25, %v105_v13  ;;  %v121_v29 = vmul.f32 %v117_v26, %v97_v18 }
  0xd9   :  { %202 = vtanh.f32 %v128_v27  ;;  %v131_v30 = vmul.f32 0.7978846, %v127_v28  ;;  %v125_v31 = vadd.f32 %v121_v29, %v97_v18 }
  0xdb   :  { %204 = vtanh.f32 %v131_v30  ;;  %v129_v32 = vmul.f32 0.7978846, %v125_v31 }
  0xdd   :  { %206 = vtanh.f32 %v129_v32 }
  0xe4   :  { %v201_v33 = vpop.eup %200 }
  0xe5   :  { %v138_v35 = vadd.f32 1.0, %v201_v33 }
  0xe6   :  { %v203_v36 = vpop.eup %202 }
  0xe7   :  { %v142_v37 = vmul.f32 %v138_v35, %v110_v34  ;;  %v136_v39 = vadd.f32 1.0, %v203_v36 }
  0xe8   :  { %v205_v40 = vpop.eup %204 }
  0xe9   :  { %v182_v41 = vpack.c.bf16 %v142_v37, %v142_v37  ;;  %v140_v42 = vmul.f32 %v136_v39, %v108_v38  ;;  %v139_v44 = vadd.f32 1.0, %v205_v40 }
  0xea   :  { %v207_v45 = vpop.eup %206 }
  0xeb   :  { %163 = vst.msk [vmem:[%s262_s3 + $0x8] sm:$0xf] %vm160_vm1, %v182_v41  ;;  %v180_v46 = vpack.c.bf16 %v140_v42, %v140_v42  ;;  %v143_v47 = vmul.f32 %v139_v44, %v111_v43  ;;  %v137_v49 = vadd.f32 1.0, %v207_v45 }
  0xed   :  { %161 = vst.msk [vmem:[%s262_s3] sm:$0xf] %vm160_vm1, %v180_v46  ;;  %v183_v50 = vpack.c.bf16 %v143_v47, %v143_v47  ;;  %v141_v51 = vmul.f32 %v137_v49, %v109_v48 }
  0xef   :  { %164 = vst.msk [vmem:[%s262_s3 + $0xc] sm:$0xf] %vm160_vm1, %v183_v50  ;;  %v181_v52 = vpack.c.bf16 %v141_v51, %v141_v51 }
  0xf1   :  { %162 = vst.msk [vmem:[%s262_s3 + $0x4] sm:$0xf] %vm160_vm1, %v181_v52 }

// kernel: ext_summarizer_forward.30
= control target key start
LH: loop header
LB: loop body
LE: loop exit
PB: predicated region body
PF: predicated region fallthrough
CT: control target
= control target key end

     0   :  { %vm77_vm0 = vcmask 523264   ;;  %vm145_vm1 = vcmask 261120   ;;  %vm237_vm2 = vcmask 257024   ;;  %s398_s1 = inlined_call_operand.vmem [shape: bf16[64,32], index: 1, kind: input, shape index: {}]   ;;  %s399_s0 = inlined_call_operand.vmem [shape: bf16[32,64], index: 0, kind: input, shape index: {}]   ;;  %s400_s3 = inlined_call_operand.vmem [shape: bf16[32,32], index: 3, kind: input, shape index: {}]   ;;  %s401_s2 = inlined_call_operand.vmem [shape: f32[1,32], index: 2, kind: input, shape index: {}]   ;;  %s402_s4 = inlined_call_operand.vmem [shape: f32[1,32], index: 4, kind: input, shape index: {}]   ;;  %s403_s5 = inlined_call_operand.vmem [shape: f32[1,32], index: 5, kind: input, shape index: {}]   ;;  %s404_s6 = inlined_call_operand.vmem [shape: bf16[32,32], index: 6, kind: output, shape index: {}]  }
   0x1   :  { %v292_v0 = vld [vmem:[%s398_s1 + $0x18] sm:$0xff]   ;;  %v293_v1 = vld [vmem:[%s398_s1 + $0x10] sm:$0xff]   ;;  %v294_v2 = vld [vmem:[%s398_s1 + $0x8] sm:$0xff]  }
   0x2   :  { %280 = vmatprep.subr.bf16.mxu0 %v292_v0  ;;  %v296_v3 = vld [vmem:[%s399_s0] sm:$0xff]   ;;  %v297_v5 = vld [vmem:[%s399_s0 + $0x8] sm:$0xff]  }
   0x3   :  { %281 = vmatpush3.bf16.msra.mxu0 %v292_v0  ;;  %288 = vmatprep.mubr.msk.bf16.mxu0 %vm77_vm0, %v296_v3  ;;  %v295_v4 = vld [vmem:[%s398_s1] sm:$0xff]   ;;  %v273_v6 = vld [vmem:[%s400_s3 + $0x8] sm:$0xff]  }
   0x4   :  { %282 = vmatprep.subr.bf16.mxu0 %v293_v1  ;;  %v246_v7 = vld [vmem:[%s401_s2] ss:$0 sm:$0xff]  ;;  %v271_v9 = vunpack.c.l.bf16 %v273_v6  ;;  %v272_v16 = vunpack.c.h.bf16 %v273_v6 }
   0x5   :  { %v266_v8 = vld [vmem:[%s400_s3] sm:$0xff]  }
   0x6   :  { %v267_v12 = vunpack.c.l.bf16 %v266_v8  ;;  %v268_v21 = vunpack.c.h.bf16 %v266_v8  ;;  %v255_v62 = vld [vmem:[%s402_s4] ss:$0 sm:$0xff] }
   0x7   :  { %283 = vmatpush3.bf16.msra.mxu0 %v293_v1  ;;  %v256_v0 = vld [vmem:[%s403_s5] ss:$0 sm:$0xff] }
   0x8   :  { %284 = vmatprep.subr.bf16.mxu0 %v294_v2 }
   0xb   :  { %285 = vmatpush3.bf16.msra.mxu0 %v294_v2 }
   0xc   :  { %286 = vmatprep.subr.bf16.mxu0 %v295_v4 }
   0xf   :  { %287 = vmatpush3.bf16.msra.mxu0 %v295_v4 }
  0x12   :  { %289 = vmatmul.mubr.msk.bf16.vlgmr.msra.gmra.mxu0 %vm77_vm0, %v297_v5 }
  0xd2   :  { %v290_v10 = vpop.f32.mrf.mxu0 }
  0xd3   :  { %v127_v11 = vadd.f32 %v290_v10, %v246_v7 }
  0xd4   :  { %v118_v13 = vpop.f32.mrf.mxu0 }
  0xd5   :  { %v119_v14 = vadd.f32 %v246_v7, %v118_v13  ;;  %v143_v15 = vadd.f32 %v271_v9, %v127_v11 }
  0xd6   :  { %v291_v17 = vpop.f32.mrf.mxu0 }
  0xd7   :  { %v130_v18 = vadd.f32 %v291_v17, %v246_v7  ;;  %v152_v19 = vsel %vm145_vm1, %v143_v15, 0.0  ;;  %v141_v20 = vadd.f32 %v267_v12, %v119_v14 }
  0xd8   :  { %153 = vadd.xlane.f32.xlu1 %v152_v19  ;;  %v121_v22 = vpop.f32.mrf.mxu0 }
  0xd9   :  { %v122_v23 = vadd.f32 %v246_v7, %v121_v22  ;;  %v146_v24 = vsel %vm145_vm1, %v141_v20, 0.0  ;;  %v144_v25 = vadd.f32 %v272_v16, %v130_v18 }
  0xda   :  { %147 = vadd.xlane.f32.xlu0 %v146_v24 }
  0xdb   :  { %v155_v26 = vsel %vm145_vm1, %v144_v25, 0.0  ;;  %v142_v27 = vadd.f32 %v268_v21, %v122_v23 }
  0xdc   :  { %156 = vadd.xlane.f32.xlu1 %v155_v26 }
  0xdd   :  { %v149_v28 = vsel %vm145_vm1, %v142_v27, 0.0 }
  0xde   :  { %150 = vadd.xlane.f32.xlu0 %v149_v28 }
 0x161   :  { %v154_v29 = vpop.xlane.xlu1 %153 }
 0x162   :  { %v161_v30 = vmul.f32 0.03125, %v154_v29 }
 0x163   :  { %v148_v31 = vpop.xlane.xlu0 %147 }
 0x164   :  { %v159_v32 = vmul.f32 0.03125, %v148_v31  ;;  %v165_v34 = vsub.f32 %v143_v15, %v161_v30 }
 0x165   :  { %v157_v33 = vpop.xlane.xlu1 %156 }
 0x166   :  { %v163_v35 = vsub.f32 %v141_v20, %v159_v32  ;;  %v162_v36 = vmul.f32 0.03125, %v157_v33  ;;  %v169_v43 = vmul.f32 %v165_v34, %v165_v34 }
 0x167   :  { %v151_v37 = vpop.xlane.xlu0 %150 }
 0x168   :  { %v160_v38 = vmul.f32 0.03125, %v151_v37  ;;  %v167_v39 = vmul.f32 %v163_v35, %v163_v35  ;;  %v166_v40 = vsub.f32 %v144_v25, %v162_v36  ;;  %v177_v45 = vsel %vm145_vm1, %v169_v43, 0.0 }
 0x16a   :  { %v164_v41 = vsub.f32 %v142_v27, %v160_v38  ;;  %v171_v42 = vsel %vm145_vm1, %v167_v39, 0.0  ;;  %v170_v47 = vmul.f32 %v166_v40, %v166_v40 }
 0x16b   :  { %172 = vadd.xlane.f32.xlu0 %v171_v42 }
 0x16c   :  { %v168_v44 = vmul.f32 %v164_v41, %v164_v41  ;;  %v180_v48 = vsel %vm145_vm1, %v170_v47, 0.0 }
 0x16e   :  { %v174_v46 = vsel %vm145_vm1, %v168_v44, 0.0 }
 0x16f   :  { %178 = vadd.xlane.f32.xlu0 %v177_v45  ;;  %175 = vadd.xlane.f32.xlu1 %v174_v46 }
 0x173   :  { %181 = vadd.xlane.f32.xlu1 %v180_v48 }
 0x1f4   :  { %v173_v49 = vpop.xlane.xlu0 %172 }
 0x1f5   :  { %v183_v50 = vmul.f32 0.03125, %v173_v49 }
 0x1f7   :  { %v187_v51 = vadd.f32 1e-05, %v183_v50 }
 0x1f8   :  { %v176_v52 = vpop.xlane.xlu1 %175  ;;  %v179_v53 = vpop.xlane.xlu0 %178 }
 0x1f9   :  { %298 = vrsqrt.f32 %v187_v51  ;;  %v184_v54 = vmul.f32 0.03125, %v176_v52  ;;  %v185_v55 = vmul.f32 0.03125, %v179_v53 }
 0x1fb   :  { %v188_v56 = vadd.f32 1e-05, %v184_v54  ;;  %v189_v57 = vadd.f32 1e-05, %v185_v55 }
 0x1fc   :  { %v182_v58 = vpop.xlane.xlu1 %181 }
 0x1fd   :  { %300 = vrsqrt.f32 %v188_v56  ;;  %v186_v59 = vmul.f32 0.03125, %v182_v58 }
 0x1fe   :  { %302 = vrsqrt.f32 %v189_v57 }
 0x1ff   :  { %v190_v60 = vadd.f32 1e-05, %v186_v59 }
 0x201   :  { %304 = vrsqrt.f32 %v190_v60 }
 0x206   :  { %v299_v61 = vpop.eup %298 }
 0x207   :  { %v195_v63 = vmul.f32 %v299_v61, %v163_v35 }
 0x209   :  { %v206_v1 = vmul.f32 %v255_v62, %v195_v63 }
 0x20a   :  { %v301_v2 = vpop.eup %300 }
 0x20b   :  { %v303_v3 = vpop.eup %302  ;;  %v217_v4 = vadd.f32 %v256_v0, %v206_v1  ;;  %v196_v5 = vmul.f32 %v301_v2, %v164_v41 }
 0x20c   :  { %v197_v6 = vmul.f32 %v303_v3, %v165_v34 }
 0x20d   :  { %v261_v7 = vpack.c.bf16 %v217_v4, %v217_v4  ;;  %v207_v8 = vmul.f32 %v255_v62, %v196_v5 }
 0x20e   :  { %v305_v9 = vpop.eup %304  ;;  %v208_v10 = vmul.f32 %v255_v62, %v197_v6 }
 0x20f   :  { %238 = vst.msk [vmem:[%s404_s6] sm:$0xf] %vm237_vm2, %v261_v7  ;;  %v218_v11 = vadd.f32 %v256_v0, %v207_v8  ;;  %v198_v12 = vmul.f32 %v305_v9, %v166_v40 }
 0x210   :  { %v219_v13 = vadd.f32 %v256_v0, %v208_v10 }
 0x211   :  { %v262_v14 = vpack.c.bf16 %v218_v11, %v218_v11  ;;  %v209_v15 = vmul.f32 %v255_v62, %v198_v12 }
 0x212   :  { %v263_v16 = vpack.c.bf16 %v219_v13, %v219_v13 }
 0x213   :  { %239 = vst.msk [vmem:[%s404_s6 + $0x4] sm:$0xf] %vm237_vm2, %v262_v14  ;;  %v220_v17 = vadd.f32 %v256_v0, %v209_v15 }
 0x214   :  { %240 = vst.msk [vmem:[%s404_s6 + $0x8] sm:$0xf] %vm237_vm2, %v263_v16 }
 0x215   :  { %v264_v18 = vpack.c.bf16 %v220_v17, %v220_v17 }
 0x217   :  { %241 = vst.msk [vmem:[%s404_s6 + $0xc] sm:$0xf] %vm237_vm2, %v264_v18 }

// kernel: ext_summarizer_forward.36
= control target key start
LH: loop header
LB: loop body
LE: loop exit
PB: predicated region body
PF: predicated region fallthrough
CT: control target
= control target key end

     0   :  { %v291_v0 = vmov 0.0   ;;  %vm292_vm0 = vmmov 0   ;;  %vm39_vm1 = vcmask 261120   ;;  %vm84_vm2 = vcmask 257024   ;;  %s358_s1 = inlined_call_operand.vmem [shape: bf16[3,32,32], index: 1, kind: input, shape index: {}]   ;;  %s359_s0 = inlined_call_operand.vmem [shape: bf16[8,32], index: 0, kind: input, shape index: {}]   ;;  %s360_s2 = inlined_call_operand.vmem [shape: f32[3,1,32], index: 2, kind: input, shape index: {}]   ;;  %s361_s3 = inlined_call_operand.vmem [shape: bf16[3,8,32], index: 3, kind: output, shape index: {}]  }
   0x1   :  { %259 = vmatprep.subr.bf16.mxu0 %v291_v0  ;;  %v285_v1 = vld [vmem:[%s358_s1 + $0x8] sm:$0xff]   ;;  %267 = vmatprep.subr.bf16.mxu1 %v291_v0  ;;  %v286_v2 = vld [vmem:[%s358_s1 + $0x18] sm:$0xff]   ;;  %v287_v3 = vld [vmem:[%s358_s1] sm:$0xff]  }
   0x2   :  { %263 = vmatprep.mubr.msk.bf16.mxu0 %vm292_vm0, %v291_v0  ;;  %271 = vmatprep.mubr.msk.bf16.mxu1 %vm292_vm0, %v291_v0  ;;  %v288_v4 = vld [vmem:[%s358_s1 + $0x10] sm:$0xff]   ;;  %v15_v5 = vld [vmem:[%s359_s0] sm:$0xf]  ;;  %v289_v6 = vld [vmem:[%s358_s1 + $0x28] sm:$0xff]  }
   0x3   :  { %260 = vmatpush3.bf16.msra.mxu0 %v285_v1  ;;  %268 = vmatpush3.bf16.msra.mxu1 %v286_v2  ;;  %v290_v7 = vld [vmem:[%s358_s1 + $0x20] sm:$0xff]  }
   0x4   :  { %261 = vmatprep.subr.bf16.mxu0 %v291_v0  ;;  %269 = vmatprep.subr.bf16.mxu1 %v291_v0  ;;  %v226_v8 = vld [vmem:[%s360_s2] ss:$0 sm:$0xff]  ;;  %v235_v9 = vld [vmem:[%s360_s2 + $0x1] ss:$0 sm:$0xff]  ;;  %v245_v21 = vld [vmem:[%s360_s2 + $0x2] ss:$0 sm:$0xff] }
   0x7   :  { %262 = vmatpush3.bf16.msra.mxu0 %v287_v3  ;;  %270 = vmatpush3.bf16.msra.mxu1 %v288_v4 }
   0x8   :  { %275 = vmatprep.subr.bf16.mxu0 %v291_v0 }
   0xa   :  { %264 = vmatmul.mubr.msk.bf16.vlgmr.msra.gmra.mxu0 %vm39_vm1, %v15_v5  ;;  %272 = vmatmul.mubr.msk.bf16.vlgmr.msra.gmra.mxu1 %vm39_vm1, %v15_v5 }
   0xb   :  { %276 = vmatpush3.bf16.msra.mxu0 %v289_v6  ;;  %279 = vmatprep.mubr.msk.bf16.mxu0 %vm292_vm0, %v291_v0 }
   0xc   :  { %277 = vmatprep.subr.bf16.mxu0 %v291_v0 }
   0xf   :  { %278 = vmatpush3.bf16.msra.mxu0 %v290_v7 }
  0x12   :  { %280 = vmatmul.mubr.msk.bf16.vlgmr.msra.gmra.mxu0 %vm39_vm1, %v15_v5 }
  0xca   :  { %v77_v10 = vpop.f32.mrf.mxu0  ;;  %v145_v12 = vpop.f32.mrf.mxu1 }
  0xcb   :  { %v78_v11 = vadd.f32 %v226_v8, %v77_v10  ;;  %v146_v14 = vadd.f32 %v235_v9, %v145_v12 }
  0xcc   :  { %v265_v13 = vpop.f32.mrf.mxu0  ;;  %v273_v16 = vpop.f32.mrf.mxu1 }
  0xcd   :  { %v83_v15 = vpack.c.bf16 %v78_v11, %v78_v11  ;;  %v151_v17 = vpack.c.bf16 %v146_v14, %v146_v14 }
  0xce   :  { %v80_v18 = vpop.f32.mrf.mxu0  ;;  %v148_v19 = vpop.f32.mrf.mxu1 }
  0xcf   :  { %85 = vst.msk [vmem:[%s361_s3] sm:$0xf] %vm84_vm2, %v83_v15  ;;  %239 = vst.msk [vmem:[%s361_s3 + $0x4] sm:$0xf] %vm84_vm2, %v151_v17 }
  0xd0   :  { %v266_v20 = vpop.f32.mrf.mxu0  ;;  %v274_v22 = vpop.f32.mrf.mxu1 }
  0xd2   :  { %v213_v23 = vpop.f32.mrf.mxu0 }
  0xd3   :  { %v214_v24 = vadd.f32 %v245_v21, %v213_v23 }
  0xd4   :  { %v281_v25 = vpop.f32.mrf.mxu0 }
  0xd5   :  { %v219_v26 = vpack.c.bf16 %v214_v24, %v214_v24 }
  0xd6   :  { %v216_v27 = vpop.f32.mrf.mxu0 }
  0xd7   :  { %249 = vst.msk [vmem:[%s361_s3 + $0x8] sm:$0xf] %vm84_vm2, %v219_v26 }
  0xd8   :  { %v282_v28 = vpop.f32.mrf.mxu0 }

// kernel: ext_summarizer_forward.38
= control target key start
LH: loop header
LB: loop body
LE: loop exit
PB: predicated region body
PF: predicated region fallthrough
CT: control target
= control target key end

     0   :  { %v115_v0 = vmov 0.0   ;;  %vm116_vm0 = vmmov 0   ;;  %vm42_vm1 = vcmask 261120   ;;  %vm90_vm2 = vcmask 257024   ;;  %s160_s1 = inlined_call_operand.vmem [shape: bf16[32,32], index: 1, kind: input, shape index: {}]   ;;  %s161_s0 = inlined_call_operand.vmem [shape: bf16[8,32], index: 0, kind: input, shape index: {}]   ;;  %s162_s3 = inlined_call_operand.vmem [shape: bf16[8,32], index: 3, kind: input, shape index: {}]   ;;  %s163_s2 = inlined_call_operand.vmem [shape: f32[1,32], index: 2, kind: input, shape index: {}]   ;;  %s164_s4 = inlined_call_operand.vmem [shape: bf16[8,32], index: 4, kind: output, shape index: {}]  }
   0x1   :  { %103 = vmatprep.subr.bf16.mxu0 %v115_v0  ;;  %v113_v1 = vld [vmem:[%s160_s1 + $0x8] sm:$0xff]   ;;  %107 = vmatprep.mubr.msk.bf16.mxu0 %vm116_vm0, %v115_v0  ;;  %v114_v2 = vld [vmem:[%s160_s1] sm:$0xff]  }
   0x2   :  { %104 = vmatpush3.bf16.msra.mxu0 %v113_v1  ;;  %v18_v3 = vld [vmem:[%s161_s0] sm:$0xf] }
   0x3   :  { %105 = vmatprep.subr.bf16.mxu0 %v115_v0  ;;  %v86_v4 = vld [vmem:[%s162_s3] sm:$0xf] }
   0x4   :  { %v96_v5 = vld [vmem:[%s163_s2] ss:$0 sm:$0xff]  ;;  %v87_v6 = vunpack.c.l.bf16 %v86_v4 }
   0x6   :  { %106 = vmatpush3.bf16.msra.mxu0 %v114_v2 }
   0x9   :  { %108 = vmatmul.mubr.msk.bf16.vlgmr.msra.gmra.mxu0 %vm42_vm1, %v18_v3 }
  0xc9   :  { %v80_v7 = vpop.f32.mrf.mxu0 }
  0xca   :  { %v81_v8 = vadd.f32 %v96_v5, %v80_v7 }
  0xcb   :  { %v109_v9 = vpop.f32.mrf.mxu0 }
  0xcc   :  { %v88_v10 = vadd.f32 %v87_v6, %v81_v8 }
  0xcd   :  { %v83_v11 = vpop.f32.mrf.mxu0 }
  0xce   :  { %v89_v12 = vpack.c.bf16 %v88_v10, %v88_v10 }
  0xcf   :  { %v110_v13 = vpop.f32.mrf.mxu0 }
  0xd0   :  { %91 = vst.msk [vmem:[%s164_s4] sm:$0xf] %vm90_vm2, %v89_v12 }

// kernel: ext_summarizer_forward.39
= control target key start
LH: loop header
LB: loop body
LE: loop exit
PB: predicated region body
PF: predicated region fallthrough
CT: control target
= control target key end

     0   :  { %vm16_vm0 = vcmask 261120   ;;  %vm48_vm1 = vcmask 257024   ;;  %s90_s0 = inlined_call_operand.vmem [shape: bf16[8,32], index: 0, kind: input, shape index: {}]   ;;  %s91_s1 = inlined_call_operand.vmem [shape: f32[1,32], index: 1, kind: input, shape index: {}]   ;;  %s92_s2 = inlined_call_operand.vmem [shape: f32[1,32], index: 2, kind: input, shape index: {}]   ;;  %s93_s3 = inlined_call_operand.vmem [shape: bf16[8,32], index: 3, kind: output, shape index: {}]  }
   0x1   :  { %v14_v0 = vld [vmem:[%s90_s0] sm:$0xf] }
   0x2   :  { %v15_v1 = vunpack.c.l.bf16 %v14_v0  ;;  %v54_v12 = vld [vmem:[%s91_s1] ss:$0 sm:$0xff] }
   0x3   :  { %v55_v14 = vld [vmem:[%s92_s2] ss:$0 sm:$0xff] }
   0x4   :  { %v17_v2 = vsel %vm16_vm0, %v15_v1, 0.0 }
   0x5   :  { %18 = vadd.xlane.f32.xlu0 %v17_v2 }
  0x8e   :  { %v19_v3 = vpop.xlane.xlu0 %18 }
  0x8f   :  { %v21_v4 = vmul.f32 0.03125, %v19_v3 }
  0x91   :  { %v22_v5 = vsub.f32 %v15_v1, %v21_v4 }
  0x93   :  { %v23_v6 = vmul.f32 %v22_v5, %v22_v5 }
  0x95   :  { %v24_v7 = vsel %vm16_vm0, %v23_v6, 0.0 }
  0x96   :  { %25 = vadd.xlane.f32.xlu0 %v24_v7 }
 0x11f   :  { %v26_v8 = vpop.xlane.xlu0 %25 }
 0x120   :  { %v27_v9 = vmul.f32 0.03125, %v26_v8 }
 0x122   :  { %v28_v10 = vadd.f32 1e-06, %v27_v9 }
 0x124   :  { %56 = vrsqrt.f32 %v28_v10 }
 0x131   :  { %v57_v11 = vpop.eup %56 }
 0x132   :  { %v30_v13 = vmul.f32 %v57_v11, %v22_v5 }
 0x134   :  { %v38_v15 = vmul.f32 %v54_v12, %v30_v13 }
 0x136   :  { %v46_v16 = vadd.f32 %v55_v14, %v38_v15 }
 0x138   :  { %v47_v17 = vpack.c.bf16 %v46_v16, %v46_v16 }
 0x13a   :  { %49 = vst.msk [vmem:[%s93_s3] sm:$0xf] %vm48_vm1, %v47_v17 }

// kernel: ext_summarizer_forward.37
= control target key start
LH: loop header
LB: loop body
LE: loop exit
PB: predicated region body
PF: predicated region fallthrough
CT: control target
= control target key end

     0   :  { %s1044_s9 = smov 0   ;;  %s1046_s10 = smov 0   ;;  %s1201_s0 = inlined_call_operand.vmem [shape: bf16[3,2,4,32], index: 0, kind: input, shape index: {}]   ;;  %s1202_s1 = inlined_call_operand.vmem [shape: f32[2,1,4], index: 1, kind: input, shape index: {}]   ;;  %s1203_s2 = inlined_call_operand.vmem [shape: bf16[2,4,32], index: 2, kind: output, shape index: {}]  }
   0x1   :  { %s1048_s11 = smov 0   ;;  %s1050_s12 = smov 0  }
   0x2   :  { %s1052_s13 = smov 0  }
   0x3 LB: > { %s24_s14 = sadd.s32 1, %s1014_s12  ;;  %p40_p1 = scmp.ne.s32.totalorder %s1006_s10, %s1002_s9  ;;  %s1018_s13 = sphi %s1052_s13, %s12_s13   ;;  %s1014_s12 = sphi %s1050_s12, %s1207_s12   ;;  %s1010_s11 = sphi %s1048_s11, %s1206_s11   ;;  %s1006_s10 = sphi %s1046_s10, %s1205_s10   ;;  %s1002_s9 = sphi %s1044_s9, %s1204_s9  }
   0x4   : > { %p26_p0 = scmp.ge.s32.totalorder %s24_s14, 2  ;;  %p41_p2 = scmp.eq.s32.totalorder %s1018_s13, 0 }
   0x5   : > { %s33_s16 = sadd.s32 1, %s1006_s10  ;;  %p832_p5 = scmp.ge.s32.totalorder %s1018_s13, 2 }
   0x6   : > { %s1209_s14 = smov (%p26_p0, %s24_s14), 0  ;;  %p42_p3 = por %p41_p2, %p40_p1 }
   0x7   : > { %s28_s15 = ssub.s32 %s1014_s12, %s1209_s14  ;;  %120 = sbr.rel (%p832_p5) target bundleno = 19 (0x13), region = 16 }
   0x8   : > { %p31_p4 = scmp.eq.s32.totalorder %s28_s15, 0 }
   0xa   : > { %s1079_s17 = scalar_select %p31_p4, %s1006_s10, %s33_s16  }
   0xc   : > { %123 = sbr.rel (!%p42_p3) target bundleno = 19 (0x13), region = 20  ;;  %s125_s18 = sand.u32 (%p42_p3), 1, %s1006_s10  }
   0xd   : > { %s833_s19 = sshll.u32 (%p42_p3), %s1014_s12, 1  ;;  %s913_s20 = smul.u32 (%p42_p3), 6, %s125_s18 }
   0xe   : > { %s130_s23 = scalar_lea.vmem (%p42_p3), %s1201_s0, %s833_s19 }
   0xf   : > { %v147_v0 = vld [vmem:[%s130_s23] sm:$0x3] (%p42_p3)  ;;  %v149_v1 = vld [vmem:[%s130_s23 + $0x4] sm:$0x3] (%p42_p3)  ;;  %v151_v2 = vld [vmem:[%s130_s23 + $0x8] sm:$0x3] (%p42_p3) }
  0x10   : > { %s127_s24 = scalar_lea.vmem (%p42_p3), [#allocation2], %s913_s20 }
  0x11   : > { %148 = vst [vmem:[%s127_s24] sm:$0x3] %v147_v0  ;;  %150 = vst [vmem:[%s127_s24 + $0x2] sm:$0x3] %v149_v1 }
  0x12   : > { %152 = vst [vmem:[%s127_s24 + $0x4] sm:$0x3] %v151_v2 }
  0x13 PF: > { %p834_p6 = scmp.ge.s32.totalorder %s1018_s13, 1  ;;  %p179_p7 = scmp.lt.s32.totalorder %s1018_s13, 3 }
  0x15   : > { %p180_p8 = pnand %p834_p6, %p179_p7 }
  0x16   : > { %s186_s25 = sand.u32 (!%p180_p8), 1, %s1002_s9   ;;  %s1023_s28 = smov (!%p180_p8), 120  }
  0x17   : > { %183 = sbr.rel (%p180_p8) target bundleno = 1122 (0x462), region = 58  ;;  %s1024_s29 = smov (!%p180_p8), 112  }
  0x18   : > { %s914_s26 = smul.u32 (!%p180_p8), 6, %s186_s25  ;;  %s1025_s30 = smov (!%p180_p8), 104  }
  0x19   : > { %p212_p9 = scmp.lt.s32.totalorder (!%p180_p8), %s1010_s11, 1  ;;  %s1026_s6 = smov (!%p180_p8), 8  }
  0x1a   : > { %s1096_s27 = scalar_lea.vmem (!%p180_p8), [#allocation2], %s914_s26  ;;  %s1027_s8 = smov (!%p180_p8), 16  }
  0x1c   : > { %v1020_v3 = vmov 0.0   ;;  %vm235_vm0 = vcmask 64512   ;;  %vm1021_vm1 = vmmov 0   ;;  %v836_v4 = vld [vmem:[%s1096_s27 + $0x2] sm:$0x3]  ;;  %v350_v9 = vlaneseq  ;;  %s1211_s11 = smov (!%p212_p9, %s1010_s11), 1 }
  0x1d   : > { %865 = vmatprep.subr.bf16.mxu0 %v1020_v3  ;;  %871 = vmatprep.subr.bf16.mxu1 %v1020_v3  ;;  %v240_v5 = vsel %vm235_vm0, %v836_v4, 0  ;;  %v223_v6 = vld [vmem:[%s1096_s27] sm:$0x3]  ;;  %v1022_v7 = vmov 1983009808   ;;  %s214_s5 = scalar_lea.vmem %s1202_s1, %s1211_s11  ;;  %vm282_vm2 = vcmask 27648  }
  0x1e   : > { %867 = vmatprep.mubr.msk.bf16.mxu0 %vm1021_vm1, %v1020_v3  ;;  %873 = vmatprep.mubr.msk.bf16.mxu1 %vm1021_vm1, %v1020_v3  ;;  %v348_v8 = vunpack.c.l.s4 %v1022_v7  ;;  %v351_v11 = vshrl.u32 %v350_v9, 7  ;;  %v1122_v15 = vld [vmem:[%s214_s5] ss:$0 sm:$0xff]  ;;  %v837_v22 = vld [vmem:[%s1096_s27 + $0x4] sm:$0x3]  ;;  %vm298_vm3 = vcmask 1041408  }
  0x1f   : > { %866 = vmatpush3.bf16.xpose.msra.mxu0 %v240_v5  ;;  %v300_v23 = vsel %vm298_vm3, %v837_v22, 0  ;;  %vm294_vm4 = vcmask 31744   ;;  %s835_s7 = sshll.u32 %s1211_s11, 1  ;;  %vm344_vm5 = vcmask 58368   ;;  %s1028_s11 = smov 24   ;;  %vm492_vm6 = vcmask 123968  }
  0x20   : > { %883 = vmatprep.subr.bf16.mxu0 %v1020_v3  ;;  %v349_v10 = vunpack.c.0.s8 %v348_v8  ;;  %872 = vmatpush3.bf16.msra.mxu1 %v300_v23  ;;  %s221_s16 = scalar_lea.vmem %s1203_s2, %s835_s7  ;;  %vm616_vm7 = vcmask 189568   ;;  %vm740_vm8 = vcmask 255168  }
  0x21   : > { %877 = vmatprep.subr.bf16.mxu1 %v1020_v3 }
  0x22   : > { %v1105_v12 = vsub.s32 %v349_v10, %v351_v11 }
  0x24   : > { %v353_v13 = vrot.slane %v223_v6, %v1105_v12  ;;  %v363_v14 = vrot.slane %v836_v4, %v1105_v12  ;;  %v430_v55 = vrot.slane %v837_v22, %v1105_v12 }
  0x26   : > { %868 = vmatmul.mubr.msk.bf16.vlgmr.msra.gmra.mxu0 %vm235_vm0, %v223_v6  ;;  %354 = vrot.lane.b32.xlu1 %v353_v13, %s1023_s28 }
  0x27   : > { %885 = vmatprep.mubr.msk.bf16.mxu0 %vm1021_vm1, %v1020_v3 }
  0x2a   : > { %496 = vrot.lane.b32.xlu1 %v363_v14, %s1024_s29 }
  0x2e   : > { %494 = vrot.lane.b32.xlu1 %v353_v13, %s1024_s29 }
  0x32   : > { %620 = vrot.lane.b32.xlu1 %v363_v14, %s1025_s30 }
  0x36   : > { %618 = vrot.lane.b32.xlu1 %v353_v13, %s1025_s30 }
  0x98   : > { %v355_v29 = vpop.permute.xlu1 %354 }
  0x9c   : > { %v497_v32 = vpop.permute.xlu1 %496 }
  0x9d   : > { %v502_v33 = vsel %vm235_vm0, %v497_v32, 0 }
  0xa0   : > { %v495_v34 = vpop.permute.xlu1 %494 }
  0xa4   : > { %v621_v35 = vpop.permute.xlu1 %620 }
  0xa5   : > { %v626_v36 = vsel %vm235_vm0, %v621_v35, 0 }
  0xa8   : > { %v619_v37 = vpop.permute.xlu1 %618 }
  0xe6   : > { %v276_v16 = vpop.f32.mrf.mxu0 }
  0xe7   : > { %v277_v17 = vadd.f32 %v1122_v15, %v276_v16 }
  0xe8   : > { %v869_v18 = vpop.f32.mrf.mxu0 }
  0xe9   : > { %v283_v19 = vsel %vm282_vm2, %v277_v17, -inf }
  0xea   : > { %284 = vmax.xlane.f32.xlu0 %v283_v19  ;;  %v279_v20 = vpop.f32.mrf.mxu0 }
  0xec   : > { %v870_v21 = vpop.f32.mrf.mxu0 }
 0x100   : > { %364 = vrot.lane.b32.xlu0 %v363_v14, %s1023_s28 }
 0x173   : > { %v285_v24 = vpop.xlane.xlu0 %284 }
 0x174   : > { %v286_v25 = vsub.f32 %v277_v17, %v285_v24 }
 0x176   : > { %v287_v26 = vmul.f32 1.442695, %v286_v25 }
 0x177   : > { %v365_v27 = vpop.permute.xlu0 %364 }
 0x178   : > { %964 = vpow2.f32 %v287_v26  ;;  %v370_v30 = vsel %vm235_vm0, %v365_v27, 0 }
 0x185   : > { %v1130_v28 = vpop.eup %964 }
 0x186   : > { %v293_v31 = vpack.c.bf16 %v1130_v28, %v1130_v28  ;;  %v289_v23 = vsel %vm282_vm2, %v1130_v28, 0.0 }
 0x188   : > { %874 = vmatmul.mubr.msk.bf16.vlgmr.msra.gmra.mxu1 %vm294_vm4, %v293_v31 }
 0x189   : > { %878 = vmatpush3.bf16.xpose.msra.mxu1 %v370_v30  ;;  %879 = vmatprep.mubr.msk.bf16.mxu1 %vm1021_vm1, %v1020_v3 }
 0x18a   : > { %889 = vmatprep.subr.bf16.mxu1 %v1020_v3 }
 0x190   : > { %880 = vmatmul.mubr.msk.bf16.vlgmr.msra.gmra.mxu1 %vm235_vm0, %v355_v29 }
 0x191   : > { %890 = vmatpush3.bf16.xpose.msra.mxu1 %v502_v33  ;;  %891 = vmatprep.mubr.msk.bf16.mxu1 %vm1021_vm1, %v1020_v3 }
 0x192   : > { %901 = vmatprep.subr.bf16.mxu1 %v1020_v3 }
 0x198   : > { %892 = vmatmul.mubr.msk.bf16.vlgmr.msra.gmra.mxu1 %vm235_vm0, %v495_v34 }
 0x199   : > { %902 = vmatpush3.bf16.xpose.msra.mxu1 %v626_v36  ;;  %903 = vmatprep.mubr.msk.bf16.mxu1 %vm1021_vm1, %v1020_v3 }
 0x1a0   : > { %904 = vmatmul.mubr.msk.bf16.vlgmr.msra.gmra.mxu1 %vm235_vm0, %v619_v37 }
 0x248   : > { %v1149_v38 = vpop.f32.mrf.mxu1 }
 0x24a   : > { %v875_v39 = vpop.f32.mrf.mxu1 }
 0x24c   : > { %v339_v40 = vpop.f32.mrf.mxu1 }
 0x24e   : > { %v876_v41 = vpop.f32.mrf.mxu1 }
 0x250   : > { %v406_v42 = vpop.f32.mrf.mxu1 }
 0x251   : > { %v407_v43 = vadd.f32 %v1122_v15, %v406_v42 }
 0x252   : > { %v881_v44 = vpop.f32.mrf.mxu1 }
 0x253   : > { %v412_v45 = vsel %vm282_vm2, %v407_v43, -inf }
 0x254   : > { %413 = vmax.xlane.f32.xlu1 %v412_v45  ;;  %v409_v46 = vpop.f32.mrf.mxu1 }
 0x256   : > { %v882_v47 = vpop.f32.mrf.mxu1 }
 0x258   : > { %v538_v48 = vpop.f32.mrf.mxu1 }
 0x259   : > { %v539_v49 = vadd.f32 %v1122_v15, %v538_v48 }
 0x25a   : > { %v893_v50 = vpop.f32.mrf.mxu1 }
 0x25b   : > { %v544_v51 = vsel %vm282_vm2, %v539_v49, -inf }
 0x25c   : > { %545 = vmax.xlane.f32.xlu0 %v544_v51  ;;  %v541_v52 = vpop.f32.mrf.mxu1 }
 0x25e   : > { %v894_v53 = vpop.f32.mrf.mxu1 }
 0x260   : > { %v662_v54 = vpop.f32.mrf.mxu1 }
 0x261   : > { %v663_v59 = vadd.f32 %v1122_v15, %v662_v54 }
 0x262   : > { %v905_v56 = vpop.f32.mrf.mxu1 }
 0x263   : > { %v668_v60 = vsel %vm282_vm2, %v663_v59, -inf }
 0x264   : > { %v665_v57 = vpop.f32.mrf.mxu1 }
 0x265   : > { %555 = vrot.lane.b32.xlu1 %v430_v55, %s1024_s29 }
 0x266   : > { %v906_v58 = vpop.f32.mrf.mxu1 }
 0x272   : > { %431 = vrot.lane.b32.xlu0 %v430_v55, %s1023_s28 }
 0x289   : > { %669 = vmax.xlane.f32.xlu1 %v668_v60 }
 0x29a   : > { %679 = vrot.lane.b32.xlu1 %v430_v55, %s1025_s30 }
 0x2dd   : > { %v414_v61 = vpop.xlane.xlu1 %413 }
 0x2de   : > { %v415_v62 = vsub.f32 %v407_v43, %v414_v61 }
 0x2e0   : > { %v416_v63 = vmul.f32 1.442695, %v415_v62 }
 0x2e1   : > { %v556_v7 = vpop.permute.xlu1 %555 }
 0x2e2   : > { %966 = vpow2.f32 %v416_v63  ;;  %v561_v10 = vsel %vm298_vm3, %v556_v7, 0 }
 0x2e5   : > { %v546_v0 = vpop.xlane.xlu0 %545 }
 0x2e6   : > { %v547_v1 = vsub.f32 %v539_v49, %v546_v0 }
 0x2e8   : > { %v548_v2 = vmul.f32 1.442695, %v547_v1 }
 0x2e9   : > { %v432_v4 = vpop.permute.xlu0 %431 }
 0x2ea   : > { %968 = vpow2.f32 %v548_v2  ;;  %v437_v5 = vsel %vm298_vm3, %v432_v4, 0 }
 0x2eb   : > { %884 = vmatpush3.bf16.msra.mxu0 %v437_v5 }
 0x2ec   : > { %895 = vmatprep.subr.bf16.mxu0 %v1020_v3 }
 0x2ef   : > { %v967_v6 = vpop.eup %966 }
 0x2f0   : > { %v418_v8 = vsel %vm282_vm2, %v967_v6, 0.0  ;;  %v422_v9 = vpack.c.bf16 %v967_v6, %v967_v6 }
 0x2f1   : > { %419 = vadd.xlane.f32.xlu0 %v418_v8 }
 0x2f2   : > { %886 = vmatmul.mubr.msk.bf16.vlgmr.msra.gmra.mxu0 %vm294_vm4, %v422_v9 }
 0x2f3   : > { %896 = vmatpush3.bf16.msra.mxu0 %v561_v10  ;;  %897 = vmatprep.mubr.msk.bf16.mxu0 %vm1021_vm1, %v1020_v3 }
 0x2f4   : > { %907 = vmatprep.subr.bf16.mxu0 %v1020_v3 }
 0x2f7   : > { %v969_v11 = vpop.eup %968 }
 0x2f8   : > { %v550_v13 = vsel %vm282_vm2, %v969_v11, 0.0  ;;  %v554_v14 = vpack.c.bf16 %v969_v11, %v969_v11 }
 0x2f9   : > { %551 = vadd.xlane.f32.xlu1 %v550_v13 }
 0x2fa   : > { %898 = vmatmul.mubr.msk.bf16.vlgmr.msra.gmra.mxu0 %vm294_vm4, %v554_v14 }
 0x2fb   : > { %909 = vmatprep.mubr.msk.bf16.mxu0 %vm1021_vm1, %v1020_v3 }
 0x312   : > { %v670_v15 = vpop.xlane.xlu1 %669 }
 0x313   : > { %v671_v16 = vsub.f32 %v663_v59, %v670_v15 }
 0x315   : > { %v672_v17 = vmul.f32 1.442695, %v671_v16 }
 0x316   : > { %v680_v18 = vpop.permute.xlu1 %679 }
 0x317   : > { %970 = vpow2.f32 %v672_v17  ;;  %v685_v19 = vsel %vm298_vm3, %v680_v18, 0 }
 0x318   : > { %908 = vmatpush3.bf16.msra.mxu0 %v685_v19 }
 0x324   : > { %v971_v20 = vpop.eup %970 }
 0x325   : > { %v674_v21 = vsel %vm282_vm2, %v971_v20, 0.0  ;;  %v678_v22 = vpack.c.bf16 %v971_v20, %v971_v20 }
 0x326   : > { %675 = vadd.xlane.f32.xlu0 %v674_v21 }
 0x327   : > { %910 = vmatmul.mubr.msk.bf16.vlgmr.msra.gmra.mxu0 %vm294_vm4, %v678_v22 }
 0x32a   : > { %290 = vadd.xlane.f32.xlu0 %v289_v23 }
 0x37a   : > { %v420_v3 = vpop.xlane.xlu0 %419 }
 0x37b   : > { %972 = vrcp.f32 %v420_v3 }
 0x382   : > { %v552_v24 = vpop.xlane.xlu1 %551 }
 0x383   : > { %974 = vrcp.f32 %v552_v24 }
 0x388   : > { %v973_v26 = vpop.eup %972 }
 0x390   : > { %v975_v28 = vpop.eup %974 }
 0x3af   : > { %v676_v25 = vpop.xlane.xlu0 %675 }
 0x3b2   : > { %v473_v27 = vpop.f32.mrf.mxu0 }
 0x3b3   : > { %v479_v29 = vmul.f32 %v973_v26, %v473_v27  ;;  %v291_v30 = vpop.xlane.xlu0 %290 }
 0x3b4   : > { %976 = vrcp.f32 %v291_v30  ;;  %v887_v31 = vpop.f32.mrf.mxu0 }
 0x3b5   : > { %v480_v32 = vpack.c.bf16 %v479_v29, %v479_v29  ;;  %978 = vrcp.f32 %v676_v25 }
 0x3b6   : > { %v476_v33 = vpop.f32.mrf.mxu0 }
 0x3b7   : > { %v488_v34 = vrot.slane %v480_v32, %v1105_v12 }
 0x3b8   : > { %v888_v35 = vpop.f32.mrf.mxu0 }
 0x3b9   : > { %489 = vrot.lane.b32.xlu1 %v488_v34, %s1026_s6 }
 0x3ba   : > { %v597_v36 = vpop.f32.mrf.mxu0 }
 0x3bb   : > { %v603_v37 = vmul.f32 %v975_v28, %v597_v36 }
 0x3bc   : > { %v899_v39 = vpop.f32.mrf.mxu0 }
 0x3bd   : > { %v604_v40 = vpack.c.bf16 %v603_v37, %v603_v37 }
 0x3be   : > { %v600_v41 = vpop.f32.mrf.mxu0 }
 0x3bf   : > { %v612_v42 = vrot.slane %v604_v40, %v1105_v12 }
 0x3c0   : > { %v900_v43 = vpop.f32.mrf.mxu0 }
 0x3c1   : > { %v977_v44 = vpop.eup %976  ;;  %613 = vrot.lane.b32.xlu0 %v612_v42, %s1027_s8 }
 0x3c2   : > { %v342_v45 = vmul.f32 %v977_v44, %v1149_v38  ;;  %v979_v47 = vpop.eup %978 }
 0x3c4   : > { %v343_v46 = vpack.c.bf16 %v342_v45, %v342_v45 }
 0x3c6   : > { %345 = vst.msk [vmem:[%s221_s16] sm:$0x3] %vm344_vm5, %v343_v46 }
 0x3e7   : > { %v721_v48 = vpop.f32.mrf.mxu0 }
 0x3e8   : > { %v727_v49 = vmul.f32 %v979_v47, %v721_v48 }
 0x3e9   : > { %v911_v50 = vpop.f32.mrf.mxu0 }
 0x3ea   : > { %v728_v51 = vpack.c.bf16 %v727_v49, %v727_v49 }
 0x3eb   : > { %v724_v52 = vpop.f32.mrf.mxu0 }
 0x3ec   : > { %v736_v53 = vrot.slane %v728_v51, %v1105_v12 }
 0x3ed   : > { %v912_v54 = vpop.f32.mrf.mxu0 }
 0x3ee   : > { %737 = vrot.lane.b32.xlu1 %v736_v53, %s1028_s11 }
 0x42b   : > { %v490_v38 = vpop.permute.xlu1 %489 }
 0x42c   : > { %493 = vst.msk [vmem:[%s221_s16] sm:$0x3] %vm492_vm6, %v490_v38 }
 0x433   : > { %v614_v55 = vpop.permute.xlu0 %613 }
 0x434   : > { %617 = vst.msk [vmem:[%s221_s16] sm:$0x3] %vm616_vm7, %v614_v55 }
 0x460   : > { %v738_v56 = vpop.permute.xlu1 %737 }
 0x461   : > { %741 = vst.msk [vmem:[%s221_s16] sm:$0x3] %vm740_vm8, %v738_v56 }
 0x462 PF: > { %s12_s13 = sadd.s32 1, %s1018_s13   ;;  %s1204_s9 = smov %s1006_s10 }
 0x463   : > { %p9_p10 = scmp.ge.s32.totalorder %s12_s13, 4   ;;  %s1205_s10 = smov %s1079_s17 }
 0x464   : > { %s1206_s11 = smov %s1014_s12  ;;  %s1207_s12 = smov %s1209_s14 }
 0x465   :  { %11 = sbr.rel (!%p9_p10) target bundleno = 3 (0x3), region = 102 }

// kernel: ext_summarizer_forward.40
= control target key start
LH: loop header
LB: loop body
LE: loop exit
PB: predicated region body
PF: predicated region fallthrough
CT: control target
= control target key end

     0   :  { %v120_v0 = vmov 0.0   ;;  %vm121_vm0 = vmmov 0   ;;  %vm39_vm1 = vcmask 261120   ;;  %vm93_vm2 = vcmask 519168   ;;  %s157_s1 = inlined_call_operand.vmem [shape: bf16[32,64], index: 1, kind: input, shape index: {}]   ;;  %s158_s0 = inlined_call_operand.vmem [shape: bf16[8,32], index: 0, kind: input, shape index: {}]   ;;  %s159_s2 = inlined_call_operand.vmem [shape: f32[1,64], index: 2, kind: input, shape index: {}]   ;;  %s160_s3 = inlined_call_operand.vmem [shape: bf16[8,64], index: 3, kind: output, shape index: {}]  }
   0x1   :  { %106 = vmatprep.subr.bf16.mxu0 %v120_v0  ;;  %v116_v1 = vld [vmem:[%s157_s1 + $0x8] sm:$0xff]   ;;  %110 = vmatprep.mubr.msk.bf16.mxu0 %vm121_vm0, %v120_v0  ;;  %v117_v2 = vld [vmem:[%s157_s1] sm:$0xff]  }
   0x2   :  { %107 = vmatpush3.bf16.msra.mxu0 %v116_v1  ;;  %v15_v3 = vld [vmem:[%s158_s0] sm:$0xf] }
   0x3   :  { %108 = vmatprep.subr.bf16.mxu0 %v120_v0  ;;  %v99_v4 = vld [vmem:[%s159_s2] ss:$0 sm:$0xff] }
   0x6   :  { %109 = vmatpush3.bf16.msra.mxu0 %v117_v2 }
   0x9   :  { %111 = vmatmul.mubr.msk.bf16.vlgmr.msra.gmra.mxu0 %vm39_vm1, %v15_v3 }
  0xc9   :  { %v77_v5 = vpop.f32.mrf.mxu0 }
  0xca   :  { %v78_v6 = vadd.f32 %v99_v4, %v77_v5 }
  0xcb   :  { %v112_v7 = vpop.f32.mrf.mxu0 }
  0xcc   :  { %v84_v8 = vmul.f32 0.044715, %v78_v6  ;;  %v83_v16 = vmul.f32 0.5, %v78_v6 }
  0xcd   :  { %v80_v9 = vpop.f32.mrf.mxu0 }
  0xce   :  { %v85_v10 = vmul.f32 %v84_v8, %v78_v6 }
  0xcf   :  { %v113_v11 = vpop.f32.mrf.mxu0 }
  0xd0   :  { %v86_v12 = vmul.f32 %v85_v10, %v78_v6 }
  0xd2   :  { %v87_v13 = vadd.f32 %v86_v12, %v78_v6 }
  0xd4   :  { %v88_v14 = vmul.f32 0.7978846, %v87_v13 }
  0xd6   :  { %118 = vtanh.f32 %v88_v14 }
  0xe3   :  { %v119_v15 = vpop.eup %118 }
  0xe4   :  { %v90_v17 = vadd.f32 1.0, %v119_v15 }
  0xe6   :  { %v91_v18 = vmul.f32 %v90_v17, %v83_v16 }
  0xe8   :  { %v92_v19 = vpack.c.bf16 %v91_v18, %v91_v18 }
  0xea   :  { %94 = vst.msk [vmem:[%s160_s3] sm:$0xf] %vm93_vm2, %v92_v19 }

// kernel: squeeze.3
= control target key start
LH: loop header
LB: loop body
LE: loop exit
PB: predicated region body
PF: predicated region fallthrough
CT: control target
= control target key end

     0   :  { %s77_s0 = inlined_call_operand.vmem [shape: f32[8], index: 0, kind: input, shape index: {}]   ;;  %s78_s1 = inlined_call_operand.hbm [shape: f32[2,4], index: 1, kind: output, shape index: {}]  }
   0x1   :  { %v6_v0 = vld [vmem:[%s77_s0] sm:$0x1] }
   0x2   :  { %2 = vsyncpa [#allocation1], 0  ;;  %7 = vst [vmem:[#allocation3] sm:$0x1] %v6_v0  ;;  %vm9_vm0 = vcmask 31744   ;;  %s59_s0 = smov 124  }
   0x3   :  { %s60_s8 = smov [#allocation0]  }
   0x4   :  { %s29_s9 = sshll.u32 %s60_s8, 4  ;;  %s30_s9 = int_to_ptr.vmem [resolvable:$true] %s29_s9 }
   0x5   :  { %s37_s10 = scalar_lea.vmem %s30_s9, 32  ;;  %p42_p1 = scmp.lt.s32.totalorder %s30_s9, %s30_s9 }
   0x6   :  { %p38_p0 = scmp.ne.s32.totalorder %s30_s9, %s37_s10  ;;  %p43_p2 = scmp.lt.s32.totalorder %s37_s10, %s37_s10 }
   0x8   :  { %p44_p3 = por %p43_p2, %p42_p1 }
   0x9   :  { %v11_v1 = vld [vmem:[#allocation3] sm:$0x1]  }
   0xa   :  { %v8_v2 = vld [vmem:[#allocation3] sm:$0x1]   ;;  %12 = vrot.lane.b32.xlu0 %v11_v1, %s59_s0  ;;  %p45_p4 = pnand %p44_p3, %p38_p0 }
   0xb   :  { %10 = vst.msk [vmem:[#allocation2] sm:$0x1] %vm9_vm0, %v8_v2  }
  0x7c   :  { %v13_v3 = vpop.permute.xlu0 %12  }
  0x7d   :  { %16 = vst.msk [vmem:[#allocation2 + $0x1] sm:$0x1] %vm9_vm0, %v13_v3  }
  0x84   :  { %v21_v4 = vld [vmem:[#allocation2] sm:$0x3] }
  0x85   :  { %24 = vst [vmem:[#allocation0] sm:$0x3] %v21_v4 }
  0x86   :  { %48 = shalt.err (!%p45_p4)
}
  0x87   :  { %32 = dma.vmem_to_hbm [thread:$0]  %s30_s9, 32, %s78_s1, [#allocation1]  }
  0x88   :  { %57 = dma.done.wait [#allocation1], 32  }
  0x89   :  { %58 = vsyncadd [#allocation1], 4294967264 }
  0x8a   :  { %34 = vsyncpa [#allocation1], 1 }

// kernel: ext_summarizer_forward.41
= control target key start
LH: loop header
LB: loop body
LE: loop exit
PB: predicated region body
PF: predicated region fallthrough
CT: control target
= control target key end

     0   :  { %v141_v0 = vmov 0.0   ;;  %vm142_vm0 = vmmov 0   ;;  %vm58_vm1 = vcmask 523264   ;;  %vm106_vm2 = vcmask 257024   ;;  %s192_s1 = inlined_call_operand.vmem [shape: bf16[64,32], index: 1, kind: input, shape index: {}]   ;;  %s193_s0 = inlined_call_operand.vmem [shape: bf16[8,64], index: 0, kind: input, shape index: {}]   ;;  %s194_s3 = inlined_call_operand.vmem [shape: bf16[8,32], index: 3, kind: input, shape index: {}]   ;;  %s195_s2 = inlined_call_operand.vmem [shape: f32[1,32], index: 2, kind: input, shape index: {}]   ;;  %s196_s4 = inlined_call_operand.vmem [shape: bf16[8,32], index: 4, kind: output, shape index: {}]  }
   0x1   :  { %123 = vmatprep.subr.bf16.mxu0 %v141_v0  ;;  %v137_v1 = vld [vmem:[%s192_s1 + $0x18] sm:$0xff]   ;;  %131 = vmatprep.mubr.msk.bf16.mxu0 %vm142_vm0, %v141_v0  ;;  %v138_v2 = vld [vmem:[%s192_s1 + $0x10] sm:$0xff]   ;;  %v139_v3 = vld [vmem:[%s192_s1 + $0x8] sm:$0xff]  }
   0x2   :  { %124 = vmatpush3.bf16.msra.mxu0 %v137_v1  ;;  %v140_v4 = vld [vmem:[%s192_s1] sm:$0xff]  }
   0x3   :  { %125 = vmatprep.subr.bf16.mxu0 %v141_v0  ;;  %v18_v5 = vld [vmem:[%s193_s0] sm:$0xf] }
   0x4   :  { %v102_v6 = vld [vmem:[%s194_s3] sm:$0xf] }
   0x5   :  { %v112_v7 = vld [vmem:[%s195_s2] ss:$0 sm:$0xff]  ;;  %v103_v8 = vunpack.c.l.bf16 %v102_v6 }
   0x6   :  { %126 = vmatpush3.bf16.msra.mxu0 %v138_v2 }
   0x7   :  { %127 = vmatprep.subr.bf16.mxu0 %v141_v0 }
   0xa   :  { %128 = vmatpush3.bf16.msra.mxu0 %v139_v3 }
   0xb   :  { %129 = vmatprep.subr.bf16.mxu0 %v141_v0 }
   0xe   :  { %130 = vmatpush3.bf16.msra.mxu0 %v140_v4 }
  0x11   :  { %132 = vmatmul.mubr.msk.bf16.vlgmr.msra.gmra.mxu0 %vm58_vm1, %v18_v5 }
  0xd1   :  { %v96_v9 = vpop.f32.mrf.mxu0 }
  0xd2   :  { %v97_v10 = vadd.f32 %v112_v7, %v96_v9 }
  0xd3   :  { %v133_v11 = vpop.f32.mrf.mxu0 }
  0xd4   :  { %v104_v12 = vadd.f32 %v103_v8, %v97_v10 }
  0xd5   :  { %v99_v13 = vpop.f32.mrf.mxu0 }
  0xd6   :  { %v105_v14 = vpack.c.bf16 %v104_v12, %v104_v12 }
  0xd7   :  { %v134_v15 = vpop.f32.mrf.mxu0 }
  0xd8   :  { %107 = vst.msk [vmem:[%s196_s4] sm:$0xf] %vm106_vm2, %v105_v14 }

// kernel: ext_summarizer_forward.49
= control target key start
LH: loop header
LB: loop body
LE: loop exit
PB: predicated region body
PF: predicated region fallthrough
CT: control target
= control target key end

     0   :  { %vm26_vm0 = vcmask 261120   ;;  %v172_v8 = vmov 0.0   ;;  %vm173_vm1 = vmmov 0   ;;  %v174_v11 = vmov 0   ;;  %s237_s0 = inlined_call_operand.vmem [shape: bf16[8,32], index: 0, kind: input, shape index: {}]   ;;  %s238_s3 = inlined_call_operand.vmem [shape: bf16[32,128], index: 3, kind: input, shape index: {}]   ;;  %s239_s5 = inlined_call_operand.vmem [shape: f32[8,1], index: 5, kind: input, shape index: {}]   ;;  %s240_s1 = inlined_call_operand.vmem [shape: f32[1,32], index: 1, kind: input, shape index: {}]   ;;  %s241_s2 = inlined_call_operand.vmem [shape: f32[1,32], index: 2, kind: input, shape index: {}]   ;;  %s242_s4 = inlined_call_operand.vmem [shape: f32[1,128], index: 4, kind: input, shape index: {}]   ;;  %s243_s6 = inlined_call_operand.vmem [shape: f32[8,128], index: 6, kind: output, shape index: {}]  }
   0x1   :  { %v24_v0 = vld [vmem:[%s237_s0] sm:$0xf]  ;;  %151 = vmatprep.subr.bf16.mxu0 %v172_v8  ;;  %v164_v9 = vld [vmem:[%s238_s3 + $0x8] sm:$0xff]   ;;  %155 = vmatprep.mubr.msk.bf16.mxu0 %vm173_vm1, %v172_v8 }
   0x2   :  { %v25_v1 = vunpack.c.l.bf16 %v24_v0  ;;  %152 = vmatpush3.bf16.msra.mxu0 %v164_v9  ;;  %v165_v10 = vld [vmem:[%s238_s3] sm:$0xff]   ;;  %162 = vset.pattern.permute.xlu1 %v174_v11 }
   0x3   :  { %153 = vmatprep.subr.bf16.mxu0 %v172_v8  ;;  %v130_v12 = vld [vmem:[%s239_s5] sm:$0xff]  ;;  %163 = vset.pattern.permute.xlu0 %v174_v11 }
   0x4   :  { %v27_v2 = vsel %vm26_vm0, %v25_v1, 0.0  ;;  %133 = vperm.xlu1 %162, %v130_v12   ;;  %v142_v17 = vld [vmem:[%s240_s1] ss:$0 sm:$0xff] }
   0x5   :  { %28 = vadd.xlane.f32.xlu0 %v27_v2  ;;  %v143_v19 = vld [vmem:[%s241_s2] ss:$0 sm:$0xff] }
   0x6   :  { %154 = vmatpush3.bf16.msra.mxu0 %v165_v10  ;;  %v144_v23 = vld [vmem:[%s242_s4] ss:$0 sm:$0xff] }
  0x7f   :  { %v134_v33 = vpop.permute.xlu1 %133 }
  0x8e   :  { %v29_v3 = vpop.xlane.xlu0 %28 }
  0x8f   :  { %v31_v4 = vmul.f32 0.03125, %v29_v3 }
  0x91   :  { %v32_v5 = vsub.f32 %v25_v1, %v31_v4 }
  0x93   :  { %v33_v6 = vmul.f32 %v32_v5, %v32_v5 }
  0x95   :  { %v34_v7 = vsel %vm26_vm0, %v33_v6, 0.0 }
  0x96   :  { %35 = vadd.xlane.f32.xlu0 %v34_v7 }
 0x11f   :  { %v36_v13 = vpop.xlane.xlu0 %35 }
 0x120   :  { %v37_v14 = vmul.f32 0.03125, %v36_v13 }
 0x122   :  { %v38_v15 = vadd.f32 1e-06, %v37_v14 }
 0x124   :  { %166 = vrsqrt.f32 %v38_v15 }
 0x131   :  { %v167_v16 = vpop.eup %166 }
 0x132   :  { %v40_v18 = vmul.f32 %v167_v16, %v32_v5 }
 0x134   :  { %v48_v20 = vmul.f32 %v142_v17, %v40_v18 }
 0x136   :  { %v56_v21 = vadd.f32 %v143_v19, %v48_v20 }
 0x138   :  { %v57_v22 = vpack.c.bf16 %v56_v21, %v56_v21 }
 0x13a   :  { %156 = vmatmul.mubr.msk.bf16.vlgmr.msra.gmra.mxu0 %vm26_vm0, %v57_v22 }
 0x1fa   :  { %v118_v24 = vpop.f32.mrf.mxu0 }
 0x1fb   :  { %v119_v25 = vadd.f32 %v144_v23, %v118_v24 }
 0x1fc   :  { %v157_v26 = vpop.f32.mrf.mxu0 }
 0x1fd   :  { %v124_v27 = vsub.f32 0.0, %v119_v25 }
 0x1fe   :  { %v121_v28 = vpop.f32.mrf.mxu0 }
 0x1ff   :  { %v125_v29 = vmul.f32 1.442695, %v124_v27 }
 0x200   :  { %v158_v30 = vpop.f32.mrf.mxu0 }
 0x201   :  { %168 = vpow2.f32 %v125_v29 }
 0x20e   :  { %v169_v31 = vpop.eup %168 }
 0x20f   :  { %v127_v32 = vadd.f32 1.0, %v169_v31 }
 0x211   :  { %170 = vrcp.f32 %v127_v32 }
 0x21e   :  { %v171_v34 = vpop.eup %170 }
 0x21f   :  { %v136_v35 = vmul.f32 %v171_v34, %v134_v33 }
 0x221   :  { %137 = vst [vmem:[%s243_s6] sm:$0xff] %v136_v35 }

</bundles_post_ra>
